<compile_context>
chip_gen: v6e
topology: v6e:2x2x1
jax: 0.10.0
libtpu: 0.0.40
codegen_flags: <defaults>
</compile_context>

<pallas_src>
import math

import jax
import jax.numpy as jnp
from jax import lax
from jax.experimental import pallas as pl
from jax.experimental.pallas import tpu as pltpu

# ---------------------------------------------------------------------------
# Static network geometry (CIFAR: 3x32x32 input)
# ---------------------------------------------------------------------------
IMG_H = IMG_W = 32
C_IN = 3
KSZ = 5

C1_OC = 32
C1_OH = C1_OW = IMG_H - KSZ + 1            # 28
P1_H = P1_W = C1_OH // 2                   # 14

C2_OC = 16
C2_OH = C2_OW = P1_H - KSZ + 1             # 10
P2_H = P2_W = C2_OH // 2                   # 5

N_FLAT = C2_OC * P2_H * P2_W               # 400
F1, F2, F3 = 120, 84, 10

# Flat row-buffers: row index = h*W + w, channels on the lane dim.
X_ROWS = (IMG_H + 1) * IMG_W               # 1056: 1 zero row keeps tap slices in-bounds
H1_ROWS = 200                              # 14*14=196 pooled rows + 4 pad rows for conv2 taps


# ---------------------------------------------------------------------------
# The fused whole-network kernel (one grid step == one image)
# ---------------------------------------------------------------------------
def _net_kernel(x_ref, w1_ref, b1_ref, w2_ref, b2_ref,
                wf1_ref, bf1_ref, wf2_ref, bf2_ref, wf3_ref, bf3_ref,
                out_ref,
                band1_ref, band2_ref, h1_ref, h2_ref):
    f32 = jnp.float32

    # conv2's tap slices read a few rows past the 196 valid pooled rows; zero
    # them so the (discarded) out-of-range contributions stay finite.
    pad_rows = H1_ROWS - P1_H * P1_W
    h1_ref[pl.ds(P1_H * P1_W, pad_rows), :] = jnp.zeros((pad_rows, C1_OC), f32)

    # ------------------------------------------------------------------
    # conv1 (3->32, 5x5 valid) + bias + relu + 2x2/2 maxpool, fused.
    # Each iteration computes a two-row conv-output "band" (full width, the
    # wrap columns j>=28 are junk and never pooled) and pools it into one
    # 14-wide pooled row of the flat h1 buffer.
    # ------------------------------------------------------------------
    @pl.loop(0, P1_H)
    def _conv1_band(p):
        acc = jnp.zeros((2 * IMG_W, C1_OC), f32)
        for kh in range(KSZ):
            for kw in range(KSZ):
                t = kh * KSZ + kw
                base = (2 * p + kh) * IMG_W + kw
                xs = x_ref[pl.ds(base, 2 * IMG_W), :]              # (64, 3)
                wt = w1_ref[t * C_IN:(t + 1) * C_IN, :]            # (3, 32)
                acc = acc + jnp.dot(xs, wt, preferred_element_type=f32)
        band1_ref[...] = jnp.maximum(acc + b1_ref[...], 0.0)
        pooled = jnp.maximum(
            jnp.maximum(band1_ref[pl.ds(0, P1_W, 2), :],
                        band1_ref[pl.ds(1, P1_W, 2), :]),
            jnp.maximum(band1_ref[pl.ds(IMG_W, P1_W, 2), :],
                        band1_ref[pl.ds(IMG_W + 1, P1_W, 2), :]))  # (14, 32)
        h1_ref[pl.ds(p * P1_W, P1_W), :] = pooled

    # ------------------------------------------------------------------
    # conv2 (32->16, 5x5 valid) + bias + relu + 2x2/2 maxpool, fused.
    # ------------------------------------------------------------------
    @pl.loop(0, P2_H)
    def _conv2_band(p):
        acc = jnp.zeros((2 * P1_W, C2_OC), f32)
        for kh in range(KSZ):
            for kw in range(KSZ):
                t = kh * KSZ + kw
                base = (2 * p + kh) * P1_W + kw
                xs = h1_ref[pl.ds(base, 2 * P1_W), :]              # (28, 32)
                wt = w2_ref[t * C1_OC:(t + 1) * C1_OC, :]          # (32, 16)
                acc = acc + jnp.dot(xs, wt, preferred_element_type=f32)
        band2_ref[...] = jnp.maximum(acc + b2_ref[...], 0.0)
        pooled = jnp.maximum(
            jnp.maximum(band2_ref[pl.ds(0, P2_W, 2), :],
                        band2_ref[pl.ds(1, P2_W, 2), :]),
            jnp.maximum(band2_ref[pl.ds(P1_W, P2_W, 2), :],
                        band2_ref[pl.ds(P1_W + 1, P2_W, 2), :]))   # (5, 16)
        h2_ref[pl.ds(p * P2_W, P2_W), :] = pooled

    # ------------------------------------------------------------------
    # fc1 (400->120) + relu.  The contraction over the 25 pooled spatial
    # positions is unrolled so no in-kernel reshape/flatten is needed; fc1's
    # weight rows were pre-permuted at init to this (h, w, c) order.
    # ------------------------------------------------------------------
    z = bf1_ref[...]                                               # (1, 120)
    for r in range(P2_H * P2_W):
        z = z + jnp.dot(h2_ref[r:r + 1, :],                        # (1, 16)
                        wf1_ref[r * C2_OC:(r + 1) * C2_OC, :],     # (16, 120)
                        preferred_element_type=f32)
    z = jnp.maximum(z, 0.0)

    # fc2 (120->84) + relu, fc3 (84->10)
    z = jnp.maximum(jnp.dot(z, wf2_ref[...], preferred_element_type=f32)
                    + bf2_ref[...], 0.0)
    out_ref[...] = (jnp.dot(z, wf3_ref[...], preferred_element_type=f32)
                    + bf3_ref[...])


# ---------------------------------------------------------------------------
# Wrapper: one pallas_call for the whole forward pass
# ---------------------------------------------------------------------------
@jax.jit
def net_forward(params, x_nchw):
    B = x_nchw.shape[0]
    # NCHW -> NHWC -> flat (H*W, C) rows per image, + one zero row of padding.
    x = jnp.transpose(x_nchw.astype(jnp.float32), (0, 2, 3, 1))
    x = x.reshape(B, IMG_H * IMG_W, C_IN)
    x = jnp.pad(x, ((0, 0), (0, X_ROWS - IMG_H * IMG_W), (0, 0)))

    const = lambda b: (0, 0)
    grid_spec = pltpu.PrefetchScalarGridSpec(
        num_scalar_prefetch=0,
        grid=(B,),
        in_specs=[
            pl.BlockSpec((None, X_ROWS, C_IN), lambda b: (b, 0, 0)),
            pl.BlockSpec((KSZ * KSZ * C_IN, C1_OC), const),
            pl.BlockSpec((1, C1_OC), const),
            pl.BlockSpec((KSZ * KSZ * C1_OC, C2_OC), const),
            pl.BlockSpec((1, C2_OC), const),
            pl.BlockSpec((N_FLAT, F1), const),
            pl.BlockSpec((1, F1), const),
            pl.BlockSpec((F1, F2), const),
            pl.BlockSpec((1, F2), const),
            pl.BlockSpec((F2, F3), const),
            pl.BlockSpec((1, F3), const),
        ],
        out_specs=pl.BlockSpec((None, 1, F3), lambda b: (b, 0, 0)),
        scratch_shapes=[
            pltpu.VMEM((2 * IMG_W, C1_OC), jnp.float32),      # conv1 band
            pltpu.VMEM((2 * P1_W, C2_OC), jnp.float32),       # conv2 band
            pltpu.VMEM((H1_ROWS, C1_OC), jnp.float32),        # pooled conv1 (flat)
            pltpu.VMEM((P2_H * P2_W, C2_OC), jnp.float32),    # pooled conv2 (flat)
        ],
    )
    out = pl.pallas_call(
        _net_kernel,
        out_shape=jax.ShapeDtypeStruct((B, 1, F3), jnp.float32),
        grid_spec=grid_spec,
        compiler_params=pltpu.CompilerParams(
            dimension_semantics=("parallel",)),
    )(x, params["w1"], params["b1"], params["w2"], params["b2"],
      params["wf1"], params["bf1"], params["wf2"], params["bf2"],
      params["wf3"], params["bf3"])
    return out.reshape(B, F3)


# ---------------------------------------------------------------------------
# Parameters: PyTorch-style init + one-time layout prep (hoisted out of the
# per-call path, per the performance review)
# ---------------------------------------------------------------------------
def init_params(key):
    """PyTorch-default-style uniform init, in PyTorch's native layouts."""
    ks = jax.random.split(key, 10)

    def u(k, shape, fan_in):
        bound = 1.0 / math.sqrt(fan_in)
        return jax.random.uniform(k, shape, jnp.float32, -bound, bound)

    p = {}
    p["conv1_w"] = u(ks[0], (C1_OC, C_IN, KSZ, KSZ), C_IN * KSZ * KSZ)
    p["conv1_b"] = u(ks[1], (C1_OC,), C_IN * KSZ * KSZ)
    p["conv2_w"] = u(ks[2], (C2_OC, C1_OC, KSZ, KSZ), C1_OC * KSZ * KSZ)
    p["conv2_b"] = u(ks[3], (C2_OC,), C1_OC * KSZ * KSZ)
    p["fc1_w"] = u(ks[4], (F1, N_FLAT), N_FLAT)
    p["fc1_b"] = u(ks[5], (F1,), N_FLAT)
    p["fc2_w"] = u(ks[6], (F2, F1), F1)
    p["fc2_b"] = u(ks[7], (F2,), F1)
    p["fc3_w"] = u(ks[8], (F3, F2), F2)
    p["fc3_b"] = u(ks[9], (F3,), F2)
    return p


def prepare_params(p):
    """One-time weight layout prep:
       * conv weights -> (kh*kw*cin, cout) matmul layout
       * fc weights   -> (in, out); fc1 rows permuted from torch's (c,h,w)
         flatten order to the kernel's (h,w,c) order (absorbs the flatten)
       * biases       -> (1, n) row vectors
    """
    w1 = jnp.transpose(p["conv1_w"], (2, 3, 1, 0)).reshape(KSZ * KSZ * C_IN, C1_OC)
    w2 = jnp.transpose(p["conv2_w"], (2, 3, 1, 0)).reshape(KSZ * KSZ * C1_OC, C2_OC)
    wf1 = jnp.transpose(
        p["fc1_w"].reshape(F1, C2_OC, P2_H * P2_W), (2, 1, 0)).reshape(N_FLAT, F1)
    return {
        "w1": w1, "b1": p["conv1_b"].reshape(1, C1_OC),
        "w2": w2, "b2": p["conv2_b"].reshape(1, C2_OC),
        "wf1": wf1, "bf1": p["fc1_b"].reshape(1, F1),
        "wf2": p["fc2_w"].T, "bf2": p["fc2_b"].reshape(1, F2),
        "wf3": p["fc3_w"].T, "bf3": p["fc3_b"].reshape(1, F3),
    }


# ---------------------------------------------------------------------------
# Pure-JAX reference of the PyTorch forward (for validation only)
# ---------------------------------------------------------------------------
def reference_forward(p, x):
    dn = ("NCHW", "OIHW", "NCHW")

    def conv(x, w, b):
        y = lax.conv_general_dilated(x, w, (1, 1), "VALID", dimension_numbers=dn)
        return y + b[None, :, None, None]

    def pool(x):
        return lax.reduce_window(x, -jnp.inf, lax.max,
                                 (1, 1, 2, 2), (1, 1, 2, 2), "VALID")

    x = pool(jnp.maximum(conv(x, p["conv1_w"], p["conv1_b"]), 0.0))
    x = pool(jnp.maximum(conv(x, p["conv2_w"], p["conv2_b"]), 0.0))
    x = x.reshape(x.shape[0], -1)                       # torch.flatten(x, 1)
    x = jnp.maximum(x @ p["fc1_w"].T + p["fc1_b"], 0.0)
    x = jnp.maximum(x @ p["fc2_w"].T + p["fc2_b"], 0.0)
    return x @ p["fc3_w"].T + p["fc3_b"]


if __name__ == "__main__":
    key = jax.random.PRNGKey(0)
    k_param, k_x = jax.random.split(key)
    torch_params = init_params(k_param)
    params = prepare_params(torch_params)        # hoisted, once

    # 32x32x3 input is required by the module (16*5*5=400 flatten), batch=2.
    x = jax.random.normal(k_x, (2, C_IN, IMG_H, IMG_W), dtype=jnp.float32)

    out = jax.block_until_ready(net_forward(params, x))
    assert out.shape == (2, F3), out.shape
    assert out.dtype == jnp.float32
    assert bool(jnp.all(jnp.isfinite(out)))

    ref = reference_forward(torch_params, x)
    assert bool(jnp.allclose(out, ref, atol=2e-2, rtol=2e-2)), \
        float(jnp.max(jnp.abs(out - ref)))

    print("KERNEL_OK")
</pallas_src>

<mosaic_0001>
module attributes {stable_mosaic.version = 11 : i64} {
  func.func @_net_kernel(%arg0: i32, %arg1: memref<1x1056x3xf32, #tpu.memory_space<vmem>>, %arg2: memref<75x32xf32, #tpu.memory_space<vmem>>, %arg3: memref<1x32xf32, #tpu.memory_space<vmem>>, %arg4: memref<800x16xf32, #tpu.memory_space<vmem>>, %arg5: memref<1x16xf32, #tpu.memory_space<vmem>>, %arg6: memref<400x120xf32, #tpu.memory_space<vmem>>, %arg7: memref<1x120xf32, #tpu.memory_space<vmem>>, %arg8: memref<120x84xf32, #tpu.memory_space<vmem>>, %arg9: memref<1x84xf32, #tpu.memory_space<vmem>>, %arg10: memref<84x10xf32, #tpu.memory_space<vmem>>, %arg11: memref<1x10xf32, #tpu.memory_space<vmem>>, %arg12: memref<1x1x10xf32, #tpu.memory_space<vmem>>, %arg13: memref<64x32xf32, #tpu.memory_space<vmem>>, %arg14: memref<28x16xf32, #tpu.memory_space<vmem>>, %arg15: memref<200x32xf32, #tpu.memory_space<vmem>>, %arg16: memref<25x16xf32, #tpu.memory_space<vmem>>) attributes {dimension_semantics = [#tpu.dimension_semantics<parallel>], iteration_bounds = array<i64: 2>, scalar_prefetch = 0 : i64, scratch_operands = 4 : i64, tpu.core_type = #tpu.core_type<tc>, window_params = [{transform_indices = @transform_0, window_bounds = array<i64: 1, 1056, 3>}, {pipeline_mode = #tpu.pipeline_mode<synchronous>, transform_indices = @transform_1, window_bounds = array<i64: 75, 32>}, {pipeline_mode = #tpu.pipeline_mode<synchronous>, transform_indices = @transform_2, window_bounds = array<i64: 1, 32>}, {pipeline_mode = #tpu.pipeline_mode<synchronous>, transform_indices = @transform_3, window_bounds = array<i64: 800, 16>}, {pipeline_mode = #tpu.pipeline_mode<synchronous>, transform_indices = @transform_4, window_bounds = array<i64: 1, 16>}, {pipeline_mode = #tpu.pipeline_mode<synchronous>, transform_indices = @transform_5, window_bounds = array<i64: 400, 120>}, {pipeline_mode = #tpu.pipeline_mode<synchronous>, transform_indices = @transform_6, window_bounds = array<i64: 1, 120>}, {pipeline_mode = #tpu.pipeline_mode<synchronous>, transform_indices = @transform_7, window_bounds = array<i64: 120, 84>}, {pipeline_mode = #tpu.pipeline_mode<synchronous>, transform_indices = @transform_8, window_bounds = array<i64: 1, 84>}, {pipeline_mode = #tpu.pipeline_mode<synchronous>, transform_indices = @transform_9, window_bounds = array<i64: 84, 10>}, {pipeline_mode = #tpu.pipeline_mode<synchronous>, transform_indices = @transform_10, window_bounds = array<i64: 1, 10>}, {transform_indices = @transform_11, window_bounds = array<i64: 1, 1, 10>}]} {
    %cst = arith.constant 0.000000e+00 : f32
    %0 = vector.broadcast %cst : f32 to vector<4x32xf32>
    %c196 = arith.constant 196 : index
    %c0 = arith.constant 0 : index
    %1 = vector.load %arg15[%c196, %c0] : memref<200x32xf32, #tpu.memory_space<vmem>>, vector<4x32xf32>
    tpu.vector_store %arg15[%c196, %c0], %0 {strides = array<i32>} : memref<200x32xf32, #tpu.memory_space<vmem>>, vector<4x32xf32>,
    %c0_i32 = arith.constant 0 : i32
    %c14_i32 = arith.constant 14 : i32
    %2 = arith.addi %c0_i32, %c14_i32 : i32
    %c1_i32 = arith.constant 1 : i32
    scf.for %arg17 = %c0_i32 to %2 step %c1_i32  : i32 {
      %c1_i32_99 = arith.constant 1 : i32
      %120 = arith.muli %arg17, %c1_i32_99 : i32
      %c0_i32_100 = arith.constant 0 : i32
      %121 = arith.addi %c0_i32_100, %120 : i32
      %cst_101 = arith.constant 0.000000e+00 : f32
      %122 = vector.broadcast %cst_101 : f32 to vector<64x32xf32>
      %c2_i32 = arith.constant 2 : i32
      %123 = arith.muli %c2_i32, %121 : i32
      %c0_i32_102 = arith.constant 0 : i32
      %124 = arith.addi %123, %c0_i32_102 : i32
      %c32_i32 = arith.constant 32 : i32
      %125 = arith.muli %124, %c32_i32 : i32
      %c0_i32_103 = arith.constant 0 : i32
      %126 = arith.addi %125, %c0_i32_103 : i32
      %c0_104 = arith.constant 0 : index
      %127 = arith.index_cast %126 : i32 to index
      %c0_105 = arith.constant 0 : index
      %128 = vector.load %arg1[%c0_104, %127, %c0_105] : memref<1x1056x3xf32, #tpu.memory_space<vmem>>, vector<1x64x3xf32>
      %129 = vector.shape_cast %128 : vector<1x64x3xf32> to vector<64x3xf32>
      %c0_106 = arith.constant 0 : index
      %c0_107 = arith.constant 0 : index
      %130 = vector.load %arg2[%c0_106, %c0_107] : memref<75x32xf32, #tpu.memory_space<vmem>>, vector<3x32xf32>
      %cst_108 = arith.constant dense<0.000000e+00> : vector<64x32xf32>
      %131 = tpu.matmul %129, %130, %cst_108 {dimension_numbers = #tpu.dot_dimension_numbers<[1], [0], [0], [1], [0, 0, 1, 1], [], []>} : vector<64x3xf32>, vector<3x32xf32>, vector<64x32xf32> -> vector<64x32xf32>
      %132 = arith.addf %122, %131 : vector<64x32xf32>
      %c2_i32_109 = arith.constant 2 : i32
      %133 = arith.muli %c2_i32_109, %121 : i32
      %c0_i32_110 = arith.constant 0 : i32
      %134 = arith.addi %133, %c0_i32_110 : i32
      %c32_i32_111 = arith.constant 32 : i32
      %135 = arith.muli %134, %c32_i32_111 : i32
      %c1_i32_112 = arith.constant 1 : i32
      %136 = arith.addi %135, %c1_i32_112 : i32
      %c0_113 = arith.constant 0 : index
      %137 = arith.index_cast %136 : i32 to index
      %c0_114 = arith.constant 0 : index
      %138 = vector.load %arg1[%c0_113, %137, %c0_114] : memref<1x1056x3xf32, #tpu.memory_space<vmem>>, vector<1x64x3xf32>
      %139 = vector.shape_cast %138 : vector<1x64x3xf32> to vector<64x3xf32>
      %c3_115 = arith.constant 3 : index
      %c0_116 = arith.constant 0 : index
      %140 = vector.load %arg2[%c3_115, %c0_116] : memref<75x32xf32, #tpu.memory_space<vmem>>, vector<3x32xf32>
      %cst_117 = arith.constant dense<0.000000e+00> : vector<64x32xf32>
      %141 = tpu.matmul %139, %140, %cst_117 {dimension_numbers = #tpu.dot_dimension_numbers<[1], [0], [0], [1], [0, 0, 1, 1], [], []>} : vector<64x3xf32>, vector<3x32xf32>, vector<64x32xf32> -> vector<64x32xf32>
      %142 = arith.addf %132, %141 : vector<64x32xf32>
      %c2_i32_118 = arith.constant 2 : i32
      %143 = arith.muli %c2_i32_118, %121 : i32
      %c0_i32_119 = arith.constant 0 : i32
      %144 = arith.addi %143, %c0_i32_119 : i32
      %c32_i32_120 = arith.constant 32 : i32
      %145 = arith.muli %144, %c32_i32_120 : i32
      %c2_i32_121 = arith.constant 2 : i32
      %146 = arith.addi %145, %c2_i32_121 : i32
      %c0_122 = arith.constant 0 : index
      %147 = arith.index_cast %146 : i32 to index
      %c0_123 = arith.constant 0 : index
      %148 = vector.load %arg1[%c0_122, %147, %c0_123] : memref<1x1056x3xf32, #tpu.memory_space<vmem>>, vector<1x64x3xf32>
      %149 = vector.shape_cast %148 : vector<1x64x3xf32> to vector<64x3xf32>
      %c6_124 = arith.constant 6 : index
      %c0_125 = arith.constant 0 : index
      %150 = vector.load %arg2[%c6_124, %c0_125] : memref<75x32xf32, #tpu.memory_space<vmem>>, vector<3x32xf32>
      %cst_126 = arith.constant dense<0.000000e+00> : vector<64x32xf32>
      %151 = tpu.matmul %149, %150, %cst_126 {dimension_numbers = #tpu.dot_dimension_numbers<[1], [0], [0], [1], [0, 0, 1, 1], [], []>} : vector<64x3xf32>, vector<3x32xf32>, vector<64x32xf32> -> vector<64x32xf32>
      %152 = arith.addf %142, %151 : vector<64x32xf32>
      %c2_i32_127 = arith.constant 2 : i32
      %153 = arith.muli %c2_i32_127, %121 : i32
      %c0_i32_128 = arith.constant 0 : i32
      %154 = arith.addi %153, %c0_i32_128 : i32
      %c32_i32_129 = arith.constant 32 : i32
      %155 = arith.muli %154, %c32_i32_129 : i32
      %c3_i32 = arith.constant 3 : i32
      %156 = arith.addi %155, %c3_i32 : i32
      %c0_130 = arith.constant 0 : index
      %157 = arith.index_cast %156 : i32 to index
      %c0_131 = arith.constant 0 : index
      %158 = vector.load %arg1[%c0_130, %157, %c0_131] : memref<1x1056x3xf32, #tpu.memory_space<vmem>>, vector<1x64x3xf32>
      %159 = vector.shape_cast %158 : vector<1x64x3xf32> to vector<64x3xf32>
      %c9_132 = arith.constant 9 : index
      %c0_133 = arith.constant 0 : index
      %160 = vector.load %arg2[%c9_132, %c0_133] : memref<75x32xf32, #tpu.memory_space<vmem>>, vector<3x32xf32>
      %cst_134 = arith.constant dense<0.000000e+00> : vector<64x32xf32>
      %161 = tpu.matmul %159, %160, %cst_134 {dimension_numbers = #tpu.dot_dimension_numbers<[1], [0], [0], [1], [0, 0, 1, 1], [], []>} : vector<64x3xf32>, vector<3x32xf32>, vector<64x32xf32> -> vector<64x32xf32>
      %162 = arith.addf %152, %161 : vector<64x32xf32>
      %c2_i32_135 = arith.constant 2 : i32
      %163 = arith.muli %c2_i32_135, %121 : i32
      %c0_i32_136 = arith.constant 0 : i32
      %164 = arith.addi %163, %c0_i32_136 : i32
      %c32_i32_137 = arith.constant 32 : i32
      %165 = arith.muli %164, %c32_i32_137 : i32
      %c4_i32 = arith.constant 4 : i32
      %166 = arith.addi %165, %c4_i32 : i32
      %c0_138 = arith.constant 0 : index
      %167 = arith.index_cast %166 : i32 to index
      %c0_139 = arith.constant 0 : index
      %168 = vector.load %arg1[%c0_138, %167, %c0_139] : memref<1x1056x3xf32, #tpu.memory_space<vmem>>, vector<1x64x3xf32>
      %169 = vector.shape_cast %168 : vector<1x64x3xf32> to vector<64x3xf32>
      %c12_140 = arith.constant 12 : index
      %c0_141 = arith.constant 0 : index
      %170 = vector.load %arg2[%c12_140, %c0_141] : memref<75x32xf32, #tpu.memory_space<vmem>>, vector<3x32xf32>
      %cst_142 = arith.constant dense<0.000000e+00> : vector<64x32xf32>
      %171 = tpu.matmul %169, %170, %cst_142 {dimension_numbers = #tpu.dot_dimension_numbers<[1], [0], [0], [1], [0, 0, 1, 1], [], []>} : vector<64x3xf32>, vector<3x32xf32>, vector<64x32xf32> -> vector<64x32xf32>
      %172 = arith.addf %162, %171 : vector<64x32xf32>
      %c2_i32_143 = arith.constant 2 : i32
      %173 = arith.muli %c2_i32_143, %121 : i32
      %c1_i32_144 = arith.constant 1 : i32
      %174 = arith.addi %173, %c1_i32_144 : i32
      %c32_i32_145 = arith.constant 32 : i32
      %175 = arith.muli %174, %c32_i32_145 : i32
      %c0_i32_146 = arith.constant 0 : i32
      %176 = arith.addi %175, %c0_i32_146 : i32
      %c0_147 = arith.constant 0 : index
      %177 = arith.index_cast %176 : i32 to index
      %c0_148 = arith.constant 0 : index
      %178 = vector.load %arg1[%c0_147, %177, %c0_148] : memref<1x1056x3xf32, #tpu.memory_space<vmem>>, vector<1x64x3xf32>
      %179 = vector.shape_cast %178 : vector<1x64x3xf32> to vector<64x3xf32>
      %c15_149 = arith.constant 15 : index
      %c0_150 = arith.constant 0 : index
      %180 = vector.load %arg2[%c15_149, %c0_150] : memref<75x32xf32, #tpu.memory_space<vmem>>, vector<3x32xf32>
      %cst_151 = arith.constant dense<0.000000e+00> : vector<64x32xf32>
      %181 = tpu.matmul %179, %180, %cst_151 {dimension_numbers = #tpu.dot_dimension_numbers<[1], [0], [0], [1], [0, 0, 1, 1], [], []>} : vector<64x3xf32>, vector<3x32xf32>, vector<64x32xf32> -> vector<64x32xf32>
      %182 = arith.addf %172, %181 : vector<64x32xf32>
      %c2_i32_152 = arith.constant 2 : i32
      %183 = arith.muli %c2_i32_152, %121 : i32
      %c1_i32_153 = arith.constant 1 : i32
      %184 = arith.addi %183, %c1_i32_153 : i32
      %c32_i32_154 = arith.constant 32 : i32
      %185 = arith.muli %184, %c32_i32_154 : i32
      %c1_i32_155 = arith.constant 1 : i32
      %186 = arith.addi %185, %c1_i32_155 : i32
      %c0_156 = arith.constant 0 : index
      %187 = arith.index_cast %186 : i32 to index
      %c0_157 = arith.constant 0 : index
      %188 = vector.load %arg1[%c0_156, %187, %c0_157] : memref<1x1056x3xf32, #tpu.memory_space<vmem>>, vector<1x64x3xf32>
      %189 = vector.shape_cast %188 : vector<1x64x3xf32> to vector<64x3xf32>
      %c18_158 = arith.constant 18 : index
      %c0_159 = arith.constant 0 : index
      %190 = vector.load %arg2[%c18_158, %c0_159] : memref<75x32xf32, #tpu.memory_space<vmem>>, vector<3x32xf32>
      %cst_160 = arith.constant dense<0.000000e+00> : vector<64x32xf32>
      %191 = tpu.matmul %189, %190, %cst_160 {dimension_numbers = #tpu.dot_dimension_numbers<[1], [0], [0], [1], [0, 0, 1, 1], [], []>} : vector<64x3xf32>, vector<3x32xf32>, vector<64x32xf32> -> vector<64x32xf32>
      %192 = arith.addf %182, %191 : vector<64x32xf32>
      %c2_i32_161 = arith.constant 2 : i32
      %193 = arith.muli %c2_i32_161, %121 : i32
      %c1_i32_162 = arith.constant 1 : i32
      %194 = arith.addi %193, %c1_i32_162 : i32
      %c32_i32_163 = arith.constant 32 : i32
      %195 = arith.muli %194, %c32_i32_163 : i32
      %c2_i32_164 = arith.constant 2 : i32
      %196 = arith.addi %195, %c2_i32_164 : i32
      %c0_165 = arith.constant 0 : index
      %197 = arith.index_cast %196 : i32 to index
      %c0_166 = arith.constant 0 : index
      %198 = vector.load %arg1[%c0_165, %197, %c0_166] : memref<1x1056x3xf32, #tpu.memory_space<vmem>>, vector<1x64x3xf32>
      %199 = vector.shape_cast %198 : vector<1x64x3xf32> to vector<64x3xf32>
      %c21_167 = arith.constant 21 : index
      %c0_168 = arith.constant 0 : index
      %200 = vector.load %arg2[%c21_167, %c0_168] : memref<75x32xf32, #tpu.memory_space<vmem>>, vector<3x32xf32>
      %cst_169 = arith.constant dense<0.000000e+00> : vector<64x32xf32>
      %201 = tpu.matmul %199, %200, %cst_169 {dimension_numbers = #tpu.dot_dimension_numbers<[1], [0], [0], [1], [0, 0, 1, 1], [], []>} : vector<64x3xf32>, vector<3x32xf32>, vector<64x32xf32> -> vector<64x32xf32>
      %202 = arith.addf %192, %201 : vector<64x32xf32>
      %c2_i32_170 = arith.constant 2 : i32
      %203 = arith.muli %c2_i32_170, %121 : i32
      %c1_i32_171 = arith.constant 1 : i32
      %204 = arith.addi %203, %c1_i32_171 : i32
      %c32_i32_172 = arith.constant 32 : i32
      %205 = arith.muli %204, %c32_i32_172 : i32
      %c3_i32_173 = arith.constant 3 : i32
      %206 = arith.addi %205, %c3_i32_173 : i32
      %c0_174 = arith.constant 0 : index
      %207 = arith.index_cast %206 : i32 to index
      %c0_175 = arith.constant 0 : index
      %208 = vector.load %arg1[%c0_174, %207, %c0_175] : memref<1x1056x3xf32, #tpu.memory_space<vmem>>, vector<1x64x3xf32>
      %209 = vector.shape_cast %208 : vector<1x64x3xf32> to vector<64x3xf32>
      %c24_176 = arith.constant 24 : index
      %c0_177 = arith.constant 0 : index
      %210 = vector.load %arg2[%c24_176, %c0_177] : memref<75x32xf32, #tpu.memory_space<vmem>>, vector<3x32xf32>
      %cst_178 = arith.constant dense<0.000000e+00> : vector<64x32xf32>
      %211 = tpu.matmul %209, %210, %cst_178 {dimension_numbers = #tpu.dot_dimension_numbers<[1], [0], [0], [1], [0, 0, 1, 1], [], []>} : vector<64x3xf32>, vector<3x32xf32>, vector<64x32xf32> -> vector<64x32xf32>
      %212 = arith.addf %202, %211 : vector<64x32xf32>
      %c2_i32_179 = arith.constant 2 : i32
      %213 = arith.muli %c2_i32_179, %121 : i32
      %c1_i32_180 = arith.constant 1 : i32
      %214 = arith.addi %213, %c1_i32_180 : i32
      %c32_i32_181 = arith.constant 32 : i32
      %215 = arith.muli %214, %c32_i32_181 : i32
      %c4_i32_182 = arith.constant 4 : i32
      %216 = arith.addi %215, %c4_i32_182 : i32
      %c0_183 = arith.constant 0 : index
      %217 = arith.index_cast %216 : i32 to index
      %c0_184 = arith.constant 0 : index
      %218 = vector.load %arg1[%c0_183, %217, %c0_184] : memref<1x1056x3xf32, #tpu.memory_space<vmem>>, vector<1x64x3xf32>
      %219 = vector.shape_cast %218 : vector<1x64x3xf32> to vector<64x3xf32>
      %c27 = arith.constant 27 : index
      %c0_185 = arith.constant 0 : index
      %220 = vector.load %arg2[%c27, %c0_185] : memref<75x32xf32, #tpu.memory_space<vmem>>, vector<3x32xf32>
      %cst_186 = arith.constant dense<0.000000e+00> : vector<64x32xf32>
      %221 = tpu.matmul %219, %220, %cst_186 {dimension_numbers = #tpu.dot_dimension_numbers<[1], [0], [0], [1], [0, 0, 1, 1], [], []>} : vector<64x3xf32>, vector<3x32xf32>, vector<64x32xf32> -> vector<64x32xf32>
      %222 = arith.addf %212, %221 : vector<64x32xf32>
      %c2_i32_187 = arith.constant 2 : i32
      %223 = arith.muli %c2_i32_187, %121 : i32
      %c2_i32_188 = arith.constant 2 : i32
      %224 = arith.addi %223, %c2_i32_188 : i32
      %c32_i32_189 = arith.constant 32 : i32
      %225 = arith.muli %224, %c32_i32_189 : i32
      %c0_i32_190 = arith.constant 0 : i32
      %226 = arith.addi %225, %c0_i32_190 : i32
      %c0_191 = arith.constant 0 : index
      %227 = arith.index_cast %226 : i32 to index
      %c0_192 = arith.constant 0 : index
      %228 = vector.load %arg1[%c0_191, %227, %c0_192] : memref<1x1056x3xf32, #tpu.memory_space<vmem>>, vector<1x64x3xf32>
      %229 = vector.shape_cast %228 : vector<1x64x3xf32> to vector<64x3xf32>
      %c30 = arith.constant 30 : index
      %c0_193 = arith.constant 0 : index
      %230 = vector.load %arg2[%c30, %c0_193] : memref<75x32xf32, #tpu.memory_space<vmem>>, vector<3x32xf32>
      %cst_194 = arith.constant dense<0.000000e+00> : vector<64x32xf32>
      %231 = tpu.matmul %229, %230, %cst_194 {dimension_numbers = #tpu.dot_dimension_numbers<[1], [0], [0], [1], [0, 0, 1, 1], [], []>} : vector<64x3xf32>, vector<3x32xf32>, vector<64x32xf32> -> vector<64x32xf32>
      %232 = arith.addf %222, %231 : vector<64x32xf32>
      %c2_i32_195 = arith.constant 2 : i32
      %233 = arith.muli %c2_i32_195, %121 : i32
      %c2_i32_196 = arith.constant 2 : i32
      %234 = arith.addi %233, %c2_i32_196 : i32
      %c32_i32_197 = arith.constant 32 : i32
      %235 = arith.muli %234, %c32_i32_197 : i32
      %c1_i32_198 = arith.constant 1 : i32
      %236 = arith.addi %235, %c1_i32_198 : i32
      %c0_199 = arith.constant 0 : index
      %237 = arith.index_cast %236 : i32 to index
      %c0_200 = arith.constant 0 : index
      %238 = vector.load %arg1[%c0_199, %237, %c0_200] : memref<1x1056x3xf32, #tpu.memory_space<vmem>>, vector<1x64x3xf32>
      %239 = vector.shape_cast %238 : vector<1x64x3xf32> to vector<64x3xf32>
      %c33 = arith.constant 33 : index
      %c0_201 = arith.constant 0 : index
      %240 = vector.load %arg2[%c33, %c0_201] : memref<75x32xf32, #tpu.memory_space<vmem>>, vector<3x32xf32>
      %cst_202 = arith.constant dense<0.000000e+00> : vector<64x32xf32>
      %241 = tpu.matmul %239, %240, %cst_202 {dimension_numbers = #tpu.dot_dimension_numbers<[1], [0], [0], [1], [0, 0, 1, 1], [], []>} : vector<64x3xf32>, vector<3x32xf32>, vector<64x32xf32> -> vector<64x32xf32>
      %242 = arith.addf %232, %241 : vector<64x32xf32>
      %c2_i32_203 = arith.constant 2 : i32
      %243 = arith.muli %c2_i32_203, %121 : i32
      %c2_i32_204 = arith.constant 2 : i32
      %244 = arith.addi %243, %c2_i32_204 : i32
      %c32_i32_205 = arith.constant 32 : i32
      %245 = arith.muli %244, %c32_i32_205 : i32
      %c2_i32_206 = arith.constant 2 : i32
      %246 = arith.addi %245, %c2_i32_206 : i32
      %c0_207 = arith.constant 0 : index
      %247 = arith.index_cast %246 : i32 to index
      %c0_208 = arith.constant 0 : index
      %248 = vector.load %arg1[%c0_207, %247, %c0_208] : memref<1x1056x3xf32, #tpu.memory_space<vmem>>, vector<1x64x3xf32>
      %249 = vector.shape_cast %248 : vector<1x64x3xf32> to vector<64x3xf32>
      %c36 = arith.constant 36 : index
      %c0_209 = arith.constant 0 : index
      %250 = vector.load %arg2[%c36, %c0_209] : memref<75x32xf32, #tpu.memory_space<vmem>>, vector<3x32xf32>
      %cst_210 = arith.constant dense<0.000000e+00> : vector<64x32xf32>
      %251 = tpu.matmul %249, %250, %cst_210 {dimension_numbers = #tpu.dot_dimension_numbers<[1], [0], [0], [1], [0, 0, 1, 1], [], []>} : vector<64x3xf32>, vector<3x32xf32>, vector<64x32xf32> -> vector<64x32xf32>
      %252 = arith.addf %242, %251 : vector<64x32xf32>
      %c2_i32_211 = arith.constant 2 : i32
      %253 = arith.muli %c2_i32_211, %121 : i32
      %c2_i32_212 = arith.constant 2 : i32
      %254 = arith.addi %253, %c2_i32_212 : i32
      %c32_i32_213 = arith.constant 32 : i32
      %255 = arith.muli %254, %c32_i32_213 : i32
      %c3_i32_214 = arith.constant 3 : i32
      %256 = arith.addi %255, %c3_i32_214 : i32
      %c0_215 = arith.constant 0 : index
      %257 = arith.index_cast %256 : i32 to index
      %c0_216 = arith.constant 0 : index
      %258 = vector.load %arg1[%c0_215, %257, %c0_216] : memref<1x1056x3xf32, #tpu.memory_space<vmem>>, vector<1x64x3xf32>
      %259 = vector.shape_cast %258 : vector<1x64x3xf32> to vector<64x3xf32>
      %c39 = arith.constant 39 : index
      %c0_217 = arith.constant 0 : index
      %260 = vector.load %arg2[%c39, %c0_217] : memref<75x32xf32, #tpu.memory_space<vmem>>, vector<3x32xf32>
      %cst_218 = arith.constant dense<0.000000e+00> : vector<64x32xf32>
      %261 = tpu.matmul %259, %260, %cst_218 {dimension_numbers = #tpu.dot_dimension_numbers<[1], [0], [0], [1], [0, 0, 1, 1], [], []>} : vector<64x3xf32>, vector<3x32xf32>, vector<64x32xf32> -> vector<64x32xf32>
      %262 = arith.addf %252, %261 : vector<64x32xf32>
      %c2_i32_219 = arith.constant 2 : i32
      %263 = arith.muli %c2_i32_219, %121 : i32
      %c2_i32_220 = arith.constant 2 : i32
      %264 = arith.addi %263, %c2_i32_220 : i32
      %c32_i32_221 = arith.constant 32 : i32
      %265 = arith.muli %264, %c32_i32_221 : i32
      %c4_i32_222 = arith.constant 4 : i32
      %266 = arith.addi %265, %c4_i32_222 : i32
      %c0_223 = arith.constant 0 : index
      %267 = arith.index_cast %266 : i32 to index
      %c0_224 = arith.constant 0 : index
      %268 = vector.load %arg1[%c0_223, %267, %c0_224] : memref<1x1056x3xf32, #tpu.memory_space<vmem>>, vector<1x64x3xf32>
      %269 = vector.shape_cast %268 : vector<1x64x3xf32> to vector<64x3xf32>
      %c42 = arith.constant 42 : index
      %c0_225 = arith.constant 0 : index
      %270 = vector.load %arg2[%c42, %c0_225] : memref<75x32xf32, #tpu.memory_space<vmem>>, vector<3x32xf32>
      %cst_226 = arith.constant dense<0.000000e+00> : vector<64x32xf32>
      %271 = tpu.matmul %269, %270, %cst_226 {dimension_numbers = #tpu.dot_dimension_numbers<[1], [0], [0], [1], [0, 0, 1, 1], [], []>} : vector<64x3xf32>, vector<3x32xf32>, vector<64x32xf32> -> vector<64x32xf32>
      %272 = arith.addf %262, %271 : vector<64x32xf32>
      %c2_i32_227 = arith.constant 2 : i32
      %273 = arith.muli %c2_i32_227, %121 : i32
      %c3_i32_228 = arith.constant 3 : i32
      %274 = arith.addi %273, %c3_i32_228 : i32
      %c32_i32_229 = arith.constant 32 : i32
      %275 = arith.muli %274, %c32_i32_229 : i32
      %c0_i32_230 = arith.constant 0 : i32
      %276 = arith.addi %275, %c0_i32_230 : i32
      %c0_231 = arith.constant 0 : index
      %277 = arith.index_cast %276 : i32 to index
      %c0_232 = arith.constant 0 : index
      %278 = vector.load %arg1[%c0_231, %277, %c0_232] : memref<1x1056x3xf32, #tpu.memory_space<vmem>>, vector<1x64x3xf32>
      %279 = vector.shape_cast %278 : vector<1x64x3xf32> to vector<64x3xf32>
      %c45 = arith.constant 45 : index
      %c0_233 = arith.constant 0 : index
      %280 = vector.load %arg2[%c45, %c0_233] : memref<75x32xf32, #tpu.memory_space<vmem>>, vector<3x32xf32>
      %cst_234 = arith.constant dense<0.000000e+00> : vector<64x32xf32>
      %281 = tpu.matmul %279, %280, %cst_234 {dimension_numbers = #tpu.dot_dimension_numbers<[1], [0], [0], [1], [0, 0, 1, 1], [], []>} : vector<64x3xf32>, vector<3x32xf32>, vector<64x32xf32> -> vector<64x32xf32>
      %282 = arith.addf %272, %281 : vector<64x32xf32>
      %c2_i32_235 = arith.constant 2 : i32
      %283 = arith.muli %c2_i32_235, %121 : i32
      %c3_i32_236 = arith.constant 3 : i32
      %284 = arith.addi %283, %c3_i32_236 : i32
      %c32_i32_237 = arith.constant 32 : i32
      %285 = arith.muli %284, %c32_i32_237 : i32
      %c1_i32_238 = arith.constant 1 : i32
      %286 = arith.addi %285, %c1_i32_238 : i32
      %c0_239 = arith.constant 0 : index
      %287 = arith.index_cast %286 : i32 to index
      %c0_240 = arith.constant 0 : index
      %288 = vector.load %arg1[%c0_239, %287, %c0_240] : memref<1x1056x3xf32, #tpu.memory_space<vmem>>, vector<1x64x3xf32>
      %289 = vector.shape_cast %288 : vector<1x64x3xf32> to vector<64x3xf32>
      %c48_241 = arith.constant 48 : index
      %c0_242 = arith.constant 0 : index
      %290 = vector.load %arg2[%c48_241, %c0_242] : memref<75x32xf32, #tpu.memory_space<vmem>>, vector<3x32xf32>
      %cst_243 = arith.constant dense<0.000000e+00> : vector<64x32xf32>
      %291 = tpu.matmul %289, %290, %cst_243 {dimension_numbers = #tpu.dot_dimension_numbers<[1], [0], [0], [1], [0, 0, 1, 1], [], []>} : vector<64x3xf32>, vector<3x32xf32>, vector<64x32xf32> -> vector<64x32xf32>
      %292 = arith.addf %282, %291 : vector<64x32xf32>
      %c2_i32_244 = arith.constant 2 : i32
      %293 = arith.muli %c2_i32_244, %121 : i32
      %c3_i32_245 = arith.constant 3 : i32
      %294 = arith.addi %293, %c3_i32_245 : i32
      %c32_i32_246 = arith.constant 32 : i32
      %295 = arith.muli %294, %c32_i32_246 : i32
      %c2_i32_247 = arith.constant 2 : i32
      %296 = arith.addi %295, %c2_i32_247 : i32
      %c0_248 = arith.constant 0 : index
      %297 = arith.index_cast %296 : i32 to index
      %c0_249 = arith.constant 0 : index
      %298 = vector.load %arg1[%c0_248, %297, %c0_249] : memref<1x1056x3xf32, #tpu.memory_space<vmem>>, vector<1x64x3xf32>
      %299 = vector.shape_cast %298 : vector<1x64x3xf32> to vector<64x3xf32>
      %c51 = arith.constant 51 : index
      %c0_250 = arith.constant 0 : index
      %300 = vector.load %arg2[%c51, %c0_250] : memref<75x32xf32, #tpu.memory_space<vmem>>, vector<3x32xf32>
      %cst_251 = arith.constant dense<0.000000e+00> : vector<64x32xf32>
      %301 = tpu.matmul %299, %300, %cst_251 {dimension_numbers = #tpu.dot_dimension_numbers<[1], [0], [0], [1], [0, 0, 1, 1], [], []>} : vector<64x3xf32>, vector<3x32xf32>, vector<64x32xf32> -> vector<64x32xf32>
      %302 = arith.addf %292, %301 : vector<64x32xf32>
      %c2_i32_252 = arith.constant 2 : i32
      %303 = arith.muli %c2_i32_252, %121 : i32
      %c3_i32_253 = arith.constant 3 : i32
      %304 = arith.addi %303, %c3_i32_253 : i32
      %c32_i32_254 = arith.constant 32 : i32
      %305 = arith.muli %304, %c32_i32_254 : i32
      %c3_i32_255 = arith.constant 3 : i32
      %306 = arith.addi %305, %c3_i32_255 : i32
      %c0_256 = arith.constant 0 : index
      %307 = arith.index_cast %306 : i32 to index
      %c0_257 = arith.constant 0 : index
      %308 = vector.load %arg1[%c0_256, %307, %c0_257] : memref<1x1056x3xf32, #tpu.memory_space<vmem>>, vector<1x64x3xf32>
      %309 = vector.shape_cast %308 : vector<1x64x3xf32> to vector<64x3xf32>
      %c54 = arith.constant 54 : index
      %c0_258 = arith.constant 0 : index
      %310 = vector.load %arg2[%c54, %c0_258] : memref<75x32xf32, #tpu.memory_space<vmem>>, vector<3x32xf32>
      %cst_259 = arith.constant dense<0.000000e+00> : vector<64x32xf32>
      %311 = tpu.matmul %309, %310, %cst_259 {dimension_numbers = #tpu.dot_dimension_numbers<[1], [0], [0], [1], [0, 0, 1, 1], [], []>} : vector<64x3xf32>, vector<3x32xf32>, vector<64x32xf32> -> vector<64x32xf32>
      %312 = arith.addf %302, %311 : vector<64x32xf32>
      %c2_i32_260 = arith.constant 2 : i32
      %313 = arith.muli %c2_i32_260, %121 : i32
      %c3_i32_261 = arith.constant 3 : i32
      %314 = arith.addi %313, %c3_i32_261 : i32
      %c32_i32_262 = arith.constant 32 : i32
      %315 = arith.muli %314, %c32_i32_262 : i32
      %c4_i32_263 = arith.constant 4 : i32
      %316 = arith.addi %315, %c4_i32_263 : i32
      %c0_264 = arith.constant 0 : index
      %317 = arith.index_cast %316 : i32 to index
      %c0_265 = arith.constant 0 : index
      %318 = vector.load %arg1[%c0_264, %317, %c0_265] : memref<1x1056x3xf32, #tpu.memory_space<vmem>>, vector<1x64x3xf32>
      %319 = vector.shape_cast %318 : vector<1x64x3xf32> to vector<64x3xf32>
      %c57 = arith.constant 57 : index
      %c0_266 = arith.constant 0 : index
      %320 = vector.load %arg2[%c57, %c0_266] : memref<75x32xf32, #tpu.memory_space<vmem>>, vector<3x32xf32>
      %cst_267 = arith.constant dense<0.000000e+00> : vector<64x32xf32>
      %321 = tpu.matmul %319, %320, %cst_267 {dimension_numbers = #tpu.dot_dimension_numbers<[1], [0], [0], [1], [0, 0, 1, 1], [], []>} : vector<64x3xf32>, vector<3x32xf32>, vector<64x32xf32> -> vector<64x32xf32>
      %322 = arith.addf %312, %321 : vector<64x32xf32>
      %c2_i32_268 = arith.constant 2 : i32
      %323 = arith.muli %c2_i32_268, %121 : i32
      %c4_i32_269 = arith.constant 4 : i32
      %324 = arith.addi %323, %c4_i32_269 : i32
      %c32_i32_270 = arith.constant 32 : i32
      %325 = arith.muli %324, %c32_i32_270 : i32
      %c0_i32_271 = arith.constant 0 : i32
      %326 = arith.addi %325, %c0_i32_271 : i32
      %c0_272 = arith.constant 0 : index
      %327 = arith.index_cast %326 : i32 to index
      %c0_273 = arith.constant 0 : index
      %328 = vector.load %arg1[%c0_272, %327, %c0_273] : memref<1x1056x3xf32, #tpu.memory_space<vmem>>, vector<1x64x3xf32>
      %329 = vector.shape_cast %328 : vector<1x64x3xf32> to vector<64x3xf32>
      %c60 = arith.constant 60 : index
      %c0_274 = arith.constant 0 : index
      %330 = vector.load %arg2[%c60, %c0_274] : memref<75x32xf32, #tpu.memory_space<vmem>>, vector<3x32xf32>
      %cst_275 = arith.constant dense<0.000000e+00> : vector<64x32xf32>
      %331 = tpu.matmul %329, %330, %cst_275 {dimension_numbers = #tpu.dot_dimension_numbers<[1], [0], [0], [1], [0, 0, 1, 1], [], []>} : vector<64x3xf32>, vector<3x32xf32>, vector<64x32xf32> -> vector<64x32xf32>
      %332 = arith.addf %322, %331 : vector<64x32xf32>
      %c2_i32_276 = arith.constant 2 : i32
      %333 = arith.muli %c2_i32_276, %121 : i32
      %c4_i32_277 = arith.constant 4 : i32
      %334 = arith.addi %333, %c4_i32_277 : i32
      %c32_i32_278 = arith.constant 32 : i32
      %335 = arith.muli %334, %c32_i32_278 : i32
      %c1_i32_279 = arith.constant 1 : i32
      %336 = arith.addi %335, %c1_i32_279 : i32
      %c0_280 = arith.constant 0 : index
      %337 = arith.index_cast %336 : i32 to index
      %c0_281 = arith.constant 0 : index
      %338 = vector.load %arg1[%c0_280, %337, %c0_281] : memref<1x1056x3xf32, #tpu.memory_space<vmem>>, vector<1x64x3xf32>
      %339 = vector.shape_cast %338 : vector<1x64x3xf32> to vector<64x3xf32>
      %c63 = arith.constant 63 : index
      %c0_282 = arith.constant 0 : index
      %340 = vector.load %arg2[%c63, %c0_282] : memref<75x32xf32, #tpu.memory_space<vmem>>, vector<3x32xf32>
      %cst_283 = arith.constant dense<0.000000e+00> : vector<64x32xf32>
      %341 = tpu.matmul %339, %340, %cst_283 {dimension_numbers = #tpu.dot_dimension_numbers<[1], [0], [0], [1], [0, 0, 1, 1], [], []>} : vector<64x3xf32>, vector<3x32xf32>, vector<64x32xf32> -> vector<64x32xf32>
      %342 = arith.addf %332, %341 : vector<64x32xf32>
      %c2_i32_284 = arith.constant 2 : i32
      %343 = arith.muli %c2_i32_284, %121 : i32
      %c4_i32_285 = arith.constant 4 : i32
      %344 = arith.addi %343, %c4_i32_285 : i32
      %c32_i32_286 = arith.constant 32 : i32
      %345 = arith.muli %344, %c32_i32_286 : i32
      %c2_i32_287 = arith.constant 2 : i32
      %346 = arith.addi %345, %c2_i32_287 : i32
      %c0_288 = arith.constant 0 : index
      %347 = arith.index_cast %346 : i32 to index
      %c0_289 = arith.constant 0 : index
      %348 = vector.load %arg1[%c0_288, %347, %c0_289] : memref<1x1056x3xf32, #tpu.memory_space<vmem>>, vector<1x64x3xf32>
      %349 = vector.shape_cast %348 : vector<1x64x3xf32> to vector<64x3xf32>
      %c66 = arith.constant 66 : index
      %c0_290 = arith.constant 0 : index
      %350 = vector.load %arg2[%c66, %c0_290] : memref<75x32xf32, #tpu.memory_space<vmem>>, vector<3x32xf32>
      %cst_291 = arith.constant dense<0.000000e+00> : vector<64x32xf32>
      %351 = tpu.matmul %349, %350, %cst_291 {dimension_numbers = #tpu.dot_dimension_numbers<[1], [0], [0], [1], [0, 0, 1, 1], [], []>} : vector<64x3xf32>, vector<3x32xf32>, vector<64x32xf32> -> vector<64x32xf32>
      %352 = arith.addf %342, %351 : vector<64x32xf32>
      %c2_i32_292 = arith.constant 2 : i32
      %353 = arith.muli %c2_i32_292, %121 : i32
      %c4_i32_293 = arith.constant 4 : i32
      %354 = arith.addi %353, %c4_i32_293 : i32
      %c32_i32_294 = arith.constant 32 : i32
      %355 = arith.muli %354, %c32_i32_294 : i32
      %c3_i32_295 = arith.constant 3 : i32
      %356 = arith.addi %355, %c3_i32_295 : i32
      %c0_296 = arith.constant 0 : index
      %357 = arith.index_cast %356 : i32 to index
      %c0_297 = arith.constant 0 : index
      %358 = vector.load %arg1[%c0_296, %357, %c0_297] : memref<1x1056x3xf32, #tpu.memory_space<vmem>>, vector<1x64x3xf32>
      %359 = vector.shape_cast %358 : vector<1x64x3xf32> to vector<64x3xf32>
      %c69 = arith.constant 69 : index
      %c0_298 = arith.constant 0 : index
      %360 = vector.load %arg2[%c69, %c0_298] : memref<75x32xf32, #tpu.memory_space<vmem>>, vector<3x32xf32>
      %cst_299 = arith.constant dense<0.000000e+00> : vector<64x32xf32>
      %361 = tpu.matmul %359, %360, %cst_299 {dimension_numbers = #tpu.dot_dimension_numbers<[1], [0], [0], [1], [0, 0, 1, 1], [], []>} : vector<64x3xf32>, vector<3x32xf32>, vector<64x32xf32> -> vector<64x32xf32>
      %362 = arith.addf %352, %361 : vector<64x32xf32>
      %c2_i32_300 = arith.constant 2 : i32
      %363 = arith.muli %c2_i32_300, %121 : i32
      %c4_i32_301 = arith.constant 4 : i32
      %364 = arith.addi %363, %c4_i32_301 : i32
      %c32_i32_302 = arith.constant 32 : i32
      %365 = arith.muli %364, %c32_i32_302 : i32
      %c4_i32_303 = arith.constant 4 : i32
      %366 = arith.addi %365, %c4_i32_303 : i32
      %c0_304 = arith.constant 0 : index
      %367 = arith.index_cast %366 : i32 to index
      %c0_305 = arith.constant 0 : index
      %368 = vector.load %arg1[%c0_304, %367, %c0_305] : memref<1x1056x3xf32, #tpu.memory_space<vmem>>, vector<1x64x3xf32>
      %369 = vector.shape_cast %368 : vector<1x64x3xf32> to vector<64x3xf32>
      %c72 = arith.constant 72 : index
      %c0_306 = arith.constant 0 : index
      %370 = vector.load %arg2[%c72, %c0_306] : memref<75x32xf32, #tpu.memory_space<vmem>>, vector<3x32xf32>
      %cst_307 = arith.constant dense<0.000000e+00> : vector<64x32xf32>
      %371 = tpu.matmul %369, %370, %cst_307 {dimension_numbers = #tpu.dot_dimension_numbers<[1], [0], [0], [1], [0, 0, 1, 1], [], []>} : vector<64x3xf32>, vector<3x32xf32>, vector<64x32xf32> -> vector<64x32xf32>
      %372 = arith.addf %362, %371 : vector<64x32xf32>
      %c0_308 = arith.constant 0 : index
      %c0_309 = arith.constant 0 : index
      %373 = vector.load %arg3[%c0_308, %c0_309] : memref<1x32xf32, #tpu.memory_space<vmem>>, vector<1x32xf32>
      %374 = vector.broadcast %373 : vector<1x32xf32> to vector<64x32xf32>
      %375 = arith.addf %372, %374 : vector<64x32xf32>
      %cst_310 = arith.constant 0.000000e+00 : f32
      %376 = vector.broadcast %cst_310 : f32 to vector<64x32xf32>
      %377 = arith.maximumf %375, %376 : vector<64x32xf32>
      %c0_311 = arith.constant 0 : index
      %c0_312 = arith.constant 0 : index
      %378 = vector.load %arg13[%c0_311, %c0_312] : memref<64x32xf32, #tpu.memory_space<vmem>>, vector<64x32xf32>
      tpu.vector_store %arg13[%c0_311, %c0_312], %377 {strides = array<i32>} : memref<64x32xf32, #tpu.memory_space<vmem>>, vector<64x32xf32>,
      %c0_313 = arith.constant 0 : index
      %c0_314 = arith.constant 0 : index
      %379 = tpu.strided_load %arg13[%c0_313, %c0_314] {strides = array<i32: 2, 1>} : memref<64x32xf32, #tpu.memory_space<vmem>>, vector<14x32xf32>
      %c1_315 = arith.constant 1 : index
      %c0_316 = arith.constant 0 : index
      %380 = tpu.strided_load %arg13[%c1_315, %c0_316] {strides = array<i32: 2, 1>} : memref<64x32xf32, #tpu.memory_space<vmem>>, vector<14x32xf32>
      %381 = arith.maximumf %379, %380 : vector<14x32xf32>
      %c32_317 = arith.constant 32 : index
      %c0_318 = arith.constant 0 : index
      %382 = tpu.strided_load %arg13[%c32_317, %c0_318] {strides = array<i32: 2, 1>} : memref<64x32xf32, #tpu.memory_space<vmem>>, vector<14x32xf32>
      %c33_319 = arith.constant 33 : index
      %c0_320 = arith.constant 0 : index
      %383 = tpu.strided_load %arg13[%c33_319, %c0_320] {strides = array<i32: 2, 1>} : memref<64x32xf32, #tpu.memory_space<vmem>>, vector<14x32xf32>
      %384 = arith.maximumf %382, %383 : vector<14x32xf32>
      %385 = arith.maximumf %381, %384 : vector<14x32xf32>
      %c14_i32_321 = arith.constant 14 : i32
      %386 = arith.muli %121, %c14_i32_321 : i32
      %387 = arith.index_cast %386 : i32 to index
      %c0_322 = arith.constant 0 : index
      %388 = vector.load %arg15[%387, %c0_322] : memref<200x32xf32, #tpu.memory_space<vmem>>, vector<14x32xf32>
      tpu.vector_store %arg15[%387, %c0_322], %385 {strides = array<i32>} : memref<200x32xf32, #tpu.memory_space<vmem>>, vector<14x32xf32>,
    }
    %c14_i32_0 = arith.constant 14 : i32
    %c0_i32_1 = arith.constant 0 : i32
    %c5_i32 = arith.constant 5 : i32
    %3 = arith.addi %c0_i32_1, %c5_i32 : i32
    %c1_i32_2 = arith.constant 1 : i32
    scf.for %arg17 = %c0_i32_1 to %3 step %c1_i32_2  : i32 {
      %c1_i32_99 = arith.constant 1 : i32
      %120 = arith.muli %arg17, %c1_i32_99 : i32
      %c0_i32_100 = arith.constant 0 : i32
      %121 = arith.addi %c0_i32_100, %120 : i32
      %cst_101 = arith.constant 0.000000e+00 : f32
      %122 = vector.broadcast %cst_101 : f32 to vector<28x16xf32>
      %c2_i32 = arith.constant 2 : i32
      %123 = arith.muli %c2_i32, %121 : i32
      %c0_i32_102 = arith.constant 0 : i32
      %124 = arith.addi %123, %c0_i32_102 : i32
      %c14_i32_103 = arith.constant 14 : i32
      %125 = arith.muli %124, %c14_i32_103 : i32
      %c0_i32_104 = arith.constant 0 : i32
      %126 = arith.addi %125, %c0_i32_104 : i32
      %127 = arith.index_cast %126 : i32 to index
      %c0_105 = arith.constant 0 : index
      %128 = vector.load %arg15[%127, %c0_105] : memref<200x32xf32, #tpu.memory_space<vmem>>, vector<28x32xf32>
      %c0_106 = arith.constant 0 : index
      %c0_107 = arith.constant 0 : index
      %129 = vector.load %arg4[%c0_106, %c0_107] : memref<800x16xf32, #tpu.memory_space<vmem>>, vector<32x16xf32>
      %cst_108 = arith.constant dense<0.000000e+00> : vector<28x16xf32>
      %130 = tpu.matmul %128, %129, %cst_108 {dimension_numbers = #tpu.dot_dimension_numbers<[1], [0], [0], [1], [0, 0, 1, 1], [], []>} : vector<28x32xf32>, vector<32x16xf32>, vector<28x16xf32> -> vector<28x16xf32>
      %131 = arith.addf %122, %130 : vector<28x16xf32>
      %c2_i32_109 = arith.constant 2 : i32
      %132 = arith.muli %c2_i32_109, %121 : i32
      %c0_i32_110 = arith.constant 0 : i32
      %133 = arith.addi %132, %c0_i32_110 : i32
      %c14_i32_111 = arith.constant 14 : i32
      %134 = arith.muli %133, %c14_i32_111 : i32
      %c1_i32_112 = arith.constant 1 : i32
      %135 = arith.addi %134, %c1_i32_112 : i32
      %136 = arith.index_cast %135 : i32 to index
      %c0_113 = arith.constant 0 : index
      %137 = vector.load %arg15[%136, %c0_113] : memref<200x32xf32, #tpu.memory_space<vmem>>, vector<28x32xf32>
      %c32_114 = arith.constant 32 : index
      %c0_115 = arith.constant 0 : index
      %138 = vector.load %arg4[%c32_114, %c0_115] : memref<800x16xf32, #tpu.memory_space<vmem>>, vector<32x16xf32>
      %cst_116 = arith.constant dense<0.000000e+00> : vector<28x16xf32>
      %139 = tpu.matmul %137, %138, %cst_116 {dimension_numbers = #tpu.dot_dimension_numbers<[1], [0], [0], [1], [0, 0, 1, 1], [], []>} : vector<28x32xf32>, vector<32x16xf32>, vector<28x16xf32> -> vector<28x16xf32>
      %140 = arith.addf %131, %139 : vector<28x16xf32>
      %c2_i32_117 = arith.constant 2 : i32
      %141 = arith.muli %c2_i32_117, %121 : i32
      %c0_i32_118 = arith.constant 0 : i32
      %142 = arith.addi %141, %c0_i32_118 : i32
      %c14_i32_119 = arith.constant 14 : i32
      %143 = arith.muli %142, %c14_i32_119 : i32
      %c2_i32_120 = arith.constant 2 : i32
      %144 = arith.addi %143, %c2_i32_120 : i32
      %145 = arith.index_cast %144 : i32 to index
      %c0_121 = arith.constant 0 : index
      %146 = vector.load %arg15[%145, %c0_121] : memref<200x32xf32, #tpu.memory_space<vmem>>, vector<28x32xf32>
      %c64_122 = arith.constant 64 : index
      %c0_123 = arith.constant 0 : index
      %147 = vector.load %arg4[%c64_122, %c0_123] : memref<800x16xf32, #tpu.memory_space<vmem>>, vector<32x16xf32>
      %cst_124 = arith.constant dense<0.000000e+00> : vector<28x16xf32>
      %148 = tpu.matmul %146, %147, %cst_124 {dimension_numbers = #tpu.dot_dimension_numbers<[1], [0], [0], [1], [0, 0, 1, 1], [], []>} : vector<28x32xf32>, vector<32x16xf32>, vector<28x16xf32> -> vector<28x16xf32>
      %149 = arith.addf %140, %148 : vector<28x16xf32>
      %c2_i32_125 = arith.constant 2 : i32
      %150 = arith.muli %c2_i32_125, %121 : i32
      %c0_i32_126 = arith.constant 0 : i32
      %151 = arith.addi %150, %c0_i32_126 : i32
      %c14_i32_127 = arith.constant 14 : i32
      %152 = arith.muli %151, %c14_i32_127 : i32
      %c3_i32 = arith.constant 3 : i32
      %153 = arith.addi %152, %c3_i32 : i32
      %154 = arith.index_cast %153 : i32 to index
      %c0_128 = arith.constant 0 : index
      %155 = vector.load %arg15[%154, %c0_128] : memref<200x32xf32, #tpu.memory_space<vmem>>, vector<28x32xf32>
      %c96_129 = arith.constant 96 : index
      %c0_130 = arith.constant 0 : index
      %156 = vector.load %arg4[%c96_129, %c0_130] : memref<800x16xf32, #tpu.memory_space<vmem>>, vector<32x16xf32>
      %cst_131 = arith.constant dense<0.000000e+00> : vector<28x16xf32>
      %157 = tpu.matmul %155, %156, %cst_131 {dimension_numbers = #tpu.dot_dimension_numbers<[1], [0], [0], [1], [0, 0, 1, 1], [], []>} : vector<28x32xf32>, vector<32x16xf32>, vector<28x16xf32> -> vector<28x16xf32>
      %158 = arith.addf %149, %157 : vector<28x16xf32>
      %c2_i32_132 = arith.constant 2 : i32
      %159 = arith.muli %c2_i32_132, %121 : i32
      %c0_i32_133 = arith.constant 0 : i32
      %160 = arith.addi %159, %c0_i32_133 : i32
      %c14_i32_134 = arith.constant 14 : i32
      %161 = arith.muli %160, %c14_i32_134 : i32
      %c4_i32 = arith.constant 4 : i32
      %162 = arith.addi %161, %c4_i32 : i32
      %163 = arith.index_cast %162 : i32 to index
      %c0_135 = arith.constant 0 : index
      %164 = vector.load %arg15[%163, %c0_135] : memref<200x32xf32, #tpu.memory_space<vmem>>, vector<28x32xf32>
      %c128_136 = arith.constant 128 : index
      %c0_137 = arith.constant 0 : index
      %165 = vector.load %arg4[%c128_136, %c0_137] : memref<800x16xf32, #tpu.memory_space<vmem>>, vector<32x16xf32>
      %cst_138 = arith.constant dense<0.000000e+00> : vector<28x16xf32>
      %166 = tpu.matmul %164, %165, %cst_138 {dimension_numbers = #tpu.dot_dimension_numbers<[1], [0], [0], [1], [0, 0, 1, 1], [], []>} : vector<28x32xf32>, vector<32x16xf32>, vector<28x16xf32> -> vector<28x16xf32>
      %167 = arith.addf %158, %166 : vector<28x16xf32>
      %c2_i32_139 = arith.constant 2 : i32
      %168 = arith.muli %c2_i32_139, %121 : i32
      %c1_i32_140 = arith.constant 1 : i32
      %169 = arith.addi %168, %c1_i32_140 : i32
      %c14_i32_141 = arith.constant 14 : i32
      %170 = arith.muli %169, %c14_i32_141 : i32
      %c0_i32_142 = arith.constant 0 : i32
      %171 = arith.addi %170, %c0_i32_142 : i32
      %172 = arith.index_cast %171 : i32 to index
      %c0_143 = arith.constant 0 : index
      %173 = vector.load %arg15[%172, %c0_143] : memref<200x32xf32, #tpu.memory_space<vmem>>, vector<28x32xf32>
      %c160_144 = arith.constant 160 : index
      %c0_145 = arith.constant 0 : index
      %174 = vector.load %arg4[%c160_144, %c0_145] : memref<800x16xf32, #tpu.memory_space<vmem>>, vector<32x16xf32>
      %cst_146 = arith.constant dense<0.000000e+00> : vector<28x16xf32>
      %175 = tpu.matmul %173, %174, %cst_146 {dimension_numbers = #tpu.dot_dimension_numbers<[1], [0], [0], [1], [0, 0, 1, 1], [], []>} : vector<28x32xf32>, vector<32x16xf32>, vector<28x16xf32> -> vector<28x16xf32>
      %176 = arith.addf %167, %175 : vector<28x16xf32>
      %c2_i32_147 = arith.constant 2 : i32
      %177 = arith.muli %c2_i32_147, %121 : i32
      %c1_i32_148 = arith.constant 1 : i32
      %178 = arith.addi %177, %c1_i32_148 : i32
      %c14_i32_149 = arith.constant 14 : i32
      %179 = arith.muli %178, %c14_i32_149 : i32
      %c1_i32_150 = arith.constant 1 : i32
      %180 = arith.addi %179, %c1_i32_150 : i32
      %181 = arith.index_cast %180 : i32 to index
      %c0_151 = arith.constant 0 : index
      %182 = vector.load %arg15[%181, %c0_151] : memref<200x32xf32, #tpu.memory_space<vmem>>, vector<28x32xf32>
      %c192_152 = arith.constant 192 : index
      %c0_153 = arith.constant 0 : index
      %183 = vector.load %arg4[%c192_152, %c0_153] : memref<800x16xf32, #tpu.memory_space<vmem>>, vector<32x16xf32>
      %cst_154 = arith.constant dense<0.000000e+00> : vector<28x16xf32>
      %184 = tpu.matmul %182, %183, %cst_154 {dimension_numbers = #tpu.dot_dimension_numbers<[1], [0], [0], [1], [0, 0, 1, 1], [], []>} : vector<28x32xf32>, vector<32x16xf32>, vector<28x16xf32> -> vector<28x16xf32>
      %185 = arith.addf %176, %184 : vector<28x16xf32>
      %c2_i32_155 = arith.constant 2 : i32
      %186 = arith.muli %c2_i32_155, %121 : i32
      %c1_i32_156 = arith.constant 1 : i32
      %187 = arith.addi %186, %c1_i32_156 : i32
      %c14_i32_157 = arith.constant 14 : i32
      %188 = arith.muli %187, %c14_i32_157 : i32
      %c2_i32_158 = arith.constant 2 : i32
      %189 = arith.addi %188, %c2_i32_158 : i32
      %190 = arith.index_cast %189 : i32 to index
      %c0_159 = arith.constant 0 : index
      %191 = vector.load %arg15[%190, %c0_159] : memref<200x32xf32, #tpu.memory_space<vmem>>, vector<28x32xf32>
      %c224_160 = arith.constant 224 : index
      %c0_161 = arith.constant 0 : index
      %192 = vector.load %arg4[%c224_160, %c0_161] : memref<800x16xf32, #tpu.memory_space<vmem>>, vector<32x16xf32>
      %cst_162 = arith.constant dense<0.000000e+00> : vector<28x16xf32>
      %193 = tpu.matmul %191, %192, %cst_162 {dimension_numbers = #tpu.dot_dimension_numbers<[1], [0], [0], [1], [0, 0, 1, 1], [], []>} : vector<28x32xf32>, vector<32x16xf32>, vector<28x16xf32> -> vector<28x16xf32>
      %194 = arith.addf %185, %193 : vector<28x16xf32>
      %c2_i32_163 = arith.constant 2 : i32
      %195 = arith.muli %c2_i32_163, %121 : i32
      %c1_i32_164 = arith.constant 1 : i32
      %196 = arith.addi %195, %c1_i32_164 : i32
      %c14_i32_165 = arith.constant 14 : i32
      %197 = arith.muli %196, %c14_i32_165 : i32
      %c3_i32_166 = arith.constant 3 : i32
      %198 = arith.addi %197, %c3_i32_166 : i32
      %199 = arith.index_cast %198 : i32 to index
      %c0_167 = arith.constant 0 : index
      %200 = vector.load %arg15[%199, %c0_167] : memref<200x32xf32, #tpu.memory_space<vmem>>, vector<28x32xf32>
      %c256_168 = arith.constant 256 : index
      %c0_169 = arith.constant 0 : index
      %201 = vector.load %arg4[%c256_168, %c0_169] : memref<800x16xf32, #tpu.memory_space<vmem>>, vector<32x16xf32>
      %cst_170 = arith.constant dense<0.000000e+00> : vector<28x16xf32>
      %202 = tpu.matmul %200, %201, %cst_170 {dimension_numbers = #tpu.dot_dimension_numbers<[1], [0], [0], [1], [0, 0, 1, 1], [], []>} : vector<28x32xf32>, vector<32x16xf32>, vector<28x16xf32> -> vector<28x16xf32>
      %203 = arith.addf %194, %202 : vector<28x16xf32>
      %c2_i32_171 = arith.constant 2 : i32
      %204 = arith.muli %c2_i32_171, %121 : i32
      %c1_i32_172 = arith.constant 1 : i32
      %205 = arith.addi %204, %c1_i32_172 : i32
      %c14_i32_173 = arith.constant 14 : i32
      %206 = arith.muli %205, %c14_i32_173 : i32
      %c4_i32_174 = arith.constant 4 : i32
      %207 = arith.addi %206, %c4_i32_174 : i32
      %208 = arith.index_cast %207 : i32 to index
      %c0_175 = arith.constant 0 : index
      %209 = vector.load %arg15[%208, %c0_175] : memref<200x32xf32, #tpu.memory_space<vmem>>, vector<28x32xf32>
      %c288_176 = arith.constant 288 : index
      %c0_177 = arith.constant 0 : index
      %210 = vector.load %arg4[%c288_176, %c0_177] : memref<800x16xf32, #tpu.memory_space<vmem>>, vector<32x16xf32>
      %cst_178 = arith.constant dense<0.000000e+00> : vector<28x16xf32>
      %211 = tpu.matmul %209, %210, %cst_178 {dimension_numbers = #tpu.dot_dimension_numbers<[1], [0], [0], [1], [0, 0, 1, 1], [], []>} : vector<28x32xf32>, vector<32x16xf32>, vector<28x16xf32> -> vector<28x16xf32>
      %212 = arith.addf %203, %211 : vector<28x16xf32>
      %c2_i32_179 = arith.constant 2 : i32
      %213 = arith.muli %c2_i32_179, %121 : i32
      %c2_i32_180 = arith.constant 2 : i32
      %214 = arith.addi %213, %c2_i32_180 : i32
      %c14_i32_181 = arith.constant 14 : i32
      %215 = arith.muli %214, %c14_i32_181 : i32
      %c0_i32_182 = arith.constant 0 : i32
      %216 = arith.addi %215, %c0_i32_182 : i32
      %217 = arith.index_cast %216 : i32 to index
      %c0_183 = arith.constant 0 : index
      %218 = vector.load %arg15[%217, %c0_183] : memref<200x32xf32, #tpu.memory_space<vmem>>, vector<28x32xf32>
      %c320_184 = arith.constant 320 : index
      %c0_185 = arith.constant 0 : index
      %219 = vector.load %arg4[%c320_184, %c0_185] : memref<800x16xf32, #tpu.memory_space<vmem>>, vector<32x16xf32>
      %cst_186 = arith.constant dense<0.000000e+00> : vector<28x16xf32>
      %220 = tpu.matmul %218, %219, %cst_186 {dimension_numbers = #tpu.dot_dimension_numbers<[1], [0], [0], [1], [0, 0, 1, 1], [], []>} : vector<28x32xf32>, vector<32x16xf32>, vector<28x16xf32> -> vector<28x16xf32>
      %221 = arith.addf %212, %220 : vector<28x16xf32>
      %c2_i32_187 = arith.constant 2 : i32
      %222 = arith.muli %c2_i32_187, %121 : i32
      %c2_i32_188 = arith.constant 2 : i32
      %223 = arith.addi %222, %c2_i32_188 : i32
      %c14_i32_189 = arith.constant 14 : i32
      %224 = arith.muli %223, %c14_i32_189 : i32
      %c1_i32_190 = arith.constant 1 : i32
      %225 = arith.addi %224, %c1_i32_190 : i32
      %226 = arith.index_cast %225 : i32 to index
      %c0_191 = arith.constant 0 : index
      %227 = vector.load %arg15[%226, %c0_191] : memref<200x32xf32, #tpu.memory_space<vmem>>, vector<28x32xf32>
      %c352_192 = arith.constant 352 : index
      %c0_193 = arith.constant 0 : index
      %228 = vector.load %arg4[%c352_192, %c0_193] : memref<800x16xf32, #tpu.memory_space<vmem>>, vector<32x16xf32>
      %cst_194 = arith.constant dense<0.000000e+00> : vector<28x16xf32>
      %229 = tpu.matmul %227, %228, %cst_194 {dimension_numbers = #tpu.dot_dimension_numbers<[1], [0], [0], [1], [0, 0, 1, 1], [], []>} : vector<28x32xf32>, vector<32x16xf32>, vector<28x16xf32> -> vector<28x16xf32>
      %230 = arith.addf %221, %229 : vector<28x16xf32>
      %c2_i32_195 = arith.constant 2 : i32
      %231 = arith.muli %c2_i32_195, %121 : i32
      %c2_i32_196 = arith.constant 2 : i32
      %232 = arith.addi %231, %c2_i32_196 : i32
      %c14_i32_197 = arith.constant 14 : i32
      %233 = arith.muli %232, %c14_i32_197 : i32
      %c2_i32_198 = arith.constant 2 : i32
      %234 = arith.addi %233, %c2_i32_198 : i32
      %235 = arith.index_cast %234 : i32 to index
      %c0_199 = arith.constant 0 : index
      %236 = vector.load %arg15[%235, %c0_199] : memref<200x32xf32, #tpu.memory_space<vmem>>, vector<28x32xf32>
      %c384_200 = arith.constant 384 : index
      %c0_201 = arith.constant 0 : index
      %237 = vector.load %arg4[%c384_200, %c0_201] : memref<800x16xf32, #tpu.memory_space<vmem>>, vector<32x16xf32>
      %cst_202 = arith.constant dense<0.000000e+00> : vector<28x16xf32>
      %238 = tpu.matmul %236, %237, %cst_202 {dimension_numbers = #tpu.dot_dimension_numbers<[1], [0], [0], [1], [0, 0, 1, 1], [], []>} : vector<28x32xf32>, vector<32x16xf32>, vector<28x16xf32> -> vector<28x16xf32>
      %239 = arith.addf %230, %238 : vector<28x16xf32>
      %c2_i32_203 = arith.constant 2 : i32
      %240 = arith.muli %c2_i32_203, %121 : i32
      %c2_i32_204 = arith.constant 2 : i32
      %241 = arith.addi %240, %c2_i32_204 : i32
      %c14_i32_205 = arith.constant 14 : i32
      %242 = arith.muli %241, %c14_i32_205 : i32
      %c3_i32_206 = arith.constant 3 : i32
      %243 = arith.addi %242, %c3_i32_206 : i32
      %244 = arith.index_cast %243 : i32 to index
      %c0_207 = arith.constant 0 : index
      %245 = vector.load %arg15[%244, %c0_207] : memref<200x32xf32, #tpu.memory_space<vmem>>, vector<28x32xf32>
      %c416 = arith.constant 416 : index
      %c0_208 = arith.constant 0 : index
      %246 = vector.load %arg4[%c416, %c0_208] : memref<800x16xf32, #tpu.memory_space<vmem>>, vector<32x16xf32>
      %cst_209 = arith.constant dense<0.000000e+00> : vector<28x16xf32>
      %247 = tpu.matmul %245, %246, %cst_209 {dimension_numbers = #tpu.dot_dimension_numbers<[1], [0], [0], [1], [0, 0, 1, 1], [], []>} : vector<28x32xf32>, vector<32x16xf32>, vector<28x16xf32> -> vector<28x16xf32>
      %248 = arith.addf %239, %247 : vector<28x16xf32>
      %c2_i32_210 = arith.constant 2 : i32
      %249 = arith.muli %c2_i32_210, %121 : i32
      %c2_i32_211 = arith.constant 2 : i32
      %250 = arith.addi %249, %c2_i32_211 : i32
      %c14_i32_212 = arith.constant 14 : i32
      %251 = arith.muli %250, %c14_i32_212 : i32
      %c4_i32_213 = arith.constant 4 : i32
      %252 = arith.addi %251, %c4_i32_213 : i32
      %253 = arith.index_cast %252 : i32 to index
      %c0_214 = arith.constant 0 : index
      %254 = vector.load %arg15[%253, %c0_214] : memref<200x32xf32, #tpu.memory_space<vmem>>, vector<28x32xf32>
      %c448 = arith.constant 448 : index
      %c0_215 = arith.constant 0 : index
      %255 = vector.load %arg4[%c448, %c0_215] : memref<800x16xf32, #tpu.memory_space<vmem>>, vector<32x16xf32>
      %cst_216 = arith.constant dense<0.000000e+00> : vector<28x16xf32>
      %256 = tpu.matmul %254, %255, %cst_216 {dimension_numbers = #tpu.dot_dimension_numbers<[1], [0], [0], [1], [0, 0, 1, 1], [], []>} : vector<28x32xf32>, vector<32x16xf32>, vector<28x16xf32> -> vector<28x16xf32>
      %257 = arith.addf %248, %256 : vector<28x16xf32>
      %c2_i32_217 = arith.constant 2 : i32
      %258 = arith.muli %c2_i32_217, %121 : i32
      %c3_i32_218 = arith.constant 3 : i32
      %259 = arith.addi %258, %c3_i32_218 : i32
      %c14_i32_219 = arith.constant 14 : i32
      %260 = arith.muli %259, %c14_i32_219 : i32
      %c0_i32_220 = arith.constant 0 : i32
      %261 = arith.addi %260, %c0_i32_220 : i32
      %262 = arith.index_cast %261 : i32 to index
      %c0_221 = arith.constant 0 : index
      %263 = vector.load %arg15[%262, %c0_221] : memref<200x32xf32, #tpu.memory_space<vmem>>, vector<28x32xf32>
      %c480 = arith.constant 480 : index
      %c0_222 = arith.constant 0 : index
      %264 = vector.load %arg4[%c480, %c0_222] : memref<800x16xf32, #tpu.memory_space<vmem>>, vector<32x16xf32>
      %cst_223 = arith.constant dense<0.000000e+00> : vector<28x16xf32>
      %265 = tpu.matmul %263, %264, %cst_223 {dimension_numbers = #tpu.dot_dimension_numbers<[1], [0], [0], [1], [0, 0, 1, 1], [], []>} : vector<28x32xf32>, vector<32x16xf32>, vector<28x16xf32> -> vector<28x16xf32>
      %266 = arith.addf %257, %265 : vector<28x16xf32>
      %c2_i32_224 = arith.constant 2 : i32
      %267 = arith.muli %c2_i32_224, %121 : i32
      %c3_i32_225 = arith.constant 3 : i32
      %268 = arith.addi %267, %c3_i32_225 : i32
      %c14_i32_226 = arith.constant 14 : i32
      %269 = arith.muli %268, %c14_i32_226 : i32
      %c1_i32_227 = arith.constant 1 : i32
      %270 = arith.addi %269, %c1_i32_227 : i32
      %271 = arith.index_cast %270 : i32 to index
      %c0_228 = arith.constant 0 : index
      %272 = vector.load %arg15[%271, %c0_228] : memref<200x32xf32, #tpu.memory_space<vmem>>, vector<28x32xf32>
      %c512 = arith.constant 512 : index
      %c0_229 = arith.constant 0 : index
      %273 = vector.load %arg4[%c512, %c0_229] : memref<800x16xf32, #tpu.memory_space<vmem>>, vector<32x16xf32>
      %cst_230 = arith.constant dense<0.000000e+00> : vector<28x16xf32>
      %274 = tpu.matmul %272, %273, %cst_230 {dimension_numbers = #tpu.dot_dimension_numbers<[1], [0], [0], [1], [0, 0, 1, 1], [], []>} : vector<28x32xf32>, vector<32x16xf32>, vector<28x16xf32> -> vector<28x16xf32>
      %275 = arith.addf %266, %274 : vector<28x16xf32>
      %c2_i32_231 = arith.constant 2 : i32
      %276 = arith.muli %c2_i32_231, %121 : i32
      %c3_i32_232 = arith.constant 3 : i32
      %277 = arith.addi %276, %c3_i32_232 : i32
      %c14_i32_233 = arith.constant 14 : i32
      %278 = arith.muli %277, %c14_i32_233 : i32
      %c2_i32_234 = arith.constant 2 : i32
      %279 = arith.addi %278, %c2_i32_234 : i32
      %280 = arith.index_cast %279 : i32 to index
      %c0_235 = arith.constant 0 : index
      %281 = vector.load %arg15[%280, %c0_235] : memref<200x32xf32, #tpu.memory_space<vmem>>, vector<28x32xf32>
      %c544 = arith.constant 544 : index
      %c0_236 = arith.constant 0 : index
      %282 = vector.load %arg4[%c544, %c0_236] : memref<800x16xf32, #tpu.memory_space<vmem>>, vector<32x16xf32>
      %cst_237 = arith.constant dense<0.000000e+00> : vector<28x16xf32>
      %283 = tpu.matmul %281, %282, %cst_237 {dimension_numbers = #tpu.dot_dimension_numbers<[1], [0], [0], [1], [0, 0, 1, 1], [], []>} : vector<28x32xf32>, vector<32x16xf32>, vector<28x16xf32> -> vector<28x16xf32>
      %284 = arith.addf %275, %283 : vector<28x16xf32>
      %c2_i32_238 = arith.constant 2 : i32
      %285 = arith.muli %c2_i32_238, %121 : i32
      %c3_i32_239 = arith.constant 3 : i32
      %286 = arith.addi %285, %c3_i32_239 : i32
      %c14_i32_240 = arith.constant 14 : i32
      %287 = arith.muli %286, %c14_i32_240 : i32
      %c3_i32_241 = arith.constant 3 : i32
      %288 = arith.addi %287, %c3_i32_241 : i32
      %289 = arith.index_cast %288 : i32 to index
      %c0_242 = arith.constant 0 : index
      %290 = vector.load %arg15[%289, %c0_242] : memref<200x32xf32, #tpu.memory_space<vmem>>, vector<28x32xf32>
      %c576 = arith.constant 576 : index
      %c0_243 = arith.constant 0 : index
      %291 = vector.load %arg4[%c576, %c0_243] : memref<800x16xf32, #tpu.memory_space<vmem>>, vector<32x16xf32>
      %cst_244 = arith.constant dense<0.000000e+00> : vector<28x16xf32>
      %292 = tpu.matmul %290, %291, %cst_244 {dimension_numbers = #tpu.dot_dimension_numbers<[1], [0], [0], [1], [0, 0, 1, 1], [], []>} : vector<28x32xf32>, vector<32x16xf32>, vector<28x16xf32> -> vector<28x16xf32>
      %293 = arith.addf %284, %292 : vector<28x16xf32>
      %c2_i32_245 = arith.constant 2 : i32
      %294 = arith.muli %c2_i32_245, %121 : i32
      %c3_i32_246 = arith.constant 3 : i32
      %295 = arith.addi %294, %c3_i32_246 : i32
      %c14_i32_247 = arith.constant 14 : i32
      %296 = arith.muli %295, %c14_i32_247 : i32
      %c4_i32_248 = arith.constant 4 : i32
      %297 = arith.addi %296, %c4_i32_248 : i32
      %298 = arith.index_cast %297 : i32 to index
      %c0_249 = arith.constant 0 : index
      %299 = vector.load %arg15[%298, %c0_249] : memref<200x32xf32, #tpu.memory_space<vmem>>, vector<28x32xf32>
      %c608 = arith.constant 608 : index
      %c0_250 = arith.constant 0 : index
      %300 = vector.load %arg4[%c608, %c0_250] : memref<800x16xf32, #tpu.memory_space<vmem>>, vector<32x16xf32>
      %cst_251 = arith.constant dense<0.000000e+00> : vector<28x16xf32>
      %301 = tpu.matmul %299, %300, %cst_251 {dimension_numbers = #tpu.dot_dimension_numbers<[1], [0], [0], [1], [0, 0, 1, 1], [], []>} : vector<28x32xf32>, vector<32x16xf32>, vector<28x16xf32> -> vector<28x16xf32>
      %302 = arith.addf %293, %301 : vector<28x16xf32>
      %c2_i32_252 = arith.constant 2 : i32
      %303 = arith.muli %c2_i32_252, %121 : i32
      %c4_i32_253 = arith.constant 4 : i32
      %304 = arith.addi %303, %c4_i32_253 : i32
      %c14_i32_254 = arith.constant 14 : i32
      %305 = arith.muli %304, %c14_i32_254 : i32
      %c0_i32_255 = arith.constant 0 : i32
      %306 = arith.addi %305, %c0_i32_255 : i32
      %307 = arith.index_cast %306 : i32 to index
      %c0_256 = arith.constant 0 : index
      %308 = vector.load %arg15[%307, %c0_256] : memref<200x32xf32, #tpu.memory_space<vmem>>, vector<28x32xf32>
      %c640 = arith.constant 640 : index
      %c0_257 = arith.constant 0 : index
      %309 = vector.load %arg4[%c640, %c0_257] : memref<800x16xf32, #tpu.memory_space<vmem>>, vector<32x16xf32>
      %cst_258 = arith.constant dense<0.000000e+00> : vector<28x16xf32>
      %310 = tpu.matmul %308, %309, %cst_258 {dimension_numbers = #tpu.dot_dimension_numbers<[1], [0], [0], [1], [0, 0, 1, 1], [], []>} : vector<28x32xf32>, vector<32x16xf32>, vector<28x16xf32> -> vector<28x16xf32>
      %311 = arith.addf %302, %310 : vector<28x16xf32>
      %c2_i32_259 = arith.constant 2 : i32
      %312 = arith.muli %c2_i32_259, %121 : i32
      %c4_i32_260 = arith.constant 4 : i32
      %313 = arith.addi %312, %c4_i32_260 : i32
      %c14_i32_261 = arith.constant 14 : i32
      %314 = arith.muli %313, %c14_i32_261 : i32
      %c1_i32_262 = arith.constant 1 : i32
      %315 = arith.addi %314, %c1_i32_262 : i32
      %316 = arith.index_cast %315 : i32 to index
      %c0_263 = arith.constant 0 : index
      %317 = vector.load %arg15[%316, %c0_263] : memref<200x32xf32, #tpu.memory_space<vmem>>, vector<28x32xf32>
      %c672 = arith.constant 672 : index
      %c0_264 = arith.constant 0 : index
      %318 = vector.load %arg4[%c672, %c0_264] : memref<800x16xf32, #tpu.memory_space<vmem>>, vector<32x16xf32>
      %cst_265 = arith.constant dense<0.000000e+00> : vector<28x16xf32>
      %319 = tpu.matmul %317, %318, %cst_265 {dimension_numbers = #tpu.dot_dimension_numbers<[1], [0], [0], [1], [0, 0, 1, 1], [], []>} : vector<28x32xf32>, vector<32x16xf32>, vector<28x16xf32> -> vector<28x16xf32>
      %320 = arith.addf %311, %319 : vector<28x16xf32>
      %c2_i32_266 = arith.constant 2 : i32
      %321 = arith.muli %c2_i32_266, %121 : i32
      %c4_i32_267 = arith.constant 4 : i32
      %322 = arith.addi %321, %c4_i32_267 : i32
      %c14_i32_268 = arith.constant 14 : i32
      %323 = arith.muli %322, %c14_i32_268 : i32
      %c2_i32_269 = arith.constant 2 : i32
      %324 = arith.addi %323, %c2_i32_269 : i32
      %325 = arith.index_cast %324 : i32 to index
      %c0_270 = arith.constant 0 : index
      %326 = vector.load %arg15[%325, %c0_270] : memref<200x32xf32, #tpu.memory_space<vmem>>, vector<28x32xf32>
      %c704 = arith.constant 704 : index
      %c0_271 = arith.constant 0 : index
      %327 = vector.load %arg4[%c704, %c0_271] : memref<800x16xf32, #tpu.memory_space<vmem>>, vector<32x16xf32>
      %cst_272 = arith.constant dense<0.000000e+00> : vector<28x16xf32>
      %328 = tpu.matmul %326, %327, %cst_272 {dimension_numbers = #tpu.dot_dimension_numbers<[1], [0], [0], [1], [0, 0, 1, 1], [], []>} : vector<28x32xf32>, vector<32x16xf32>, vector<28x16xf32> -> vector<28x16xf32>
      %329 = arith.addf %320, %328 : vector<28x16xf32>
      %c2_i32_273 = arith.constant 2 : i32
      %330 = arith.muli %c2_i32_273, %121 : i32
      %c4_i32_274 = arith.constant 4 : i32
      %331 = arith.addi %330, %c4_i32_274 : i32
      %c14_i32_275 = arith.constant 14 : i32
      %332 = arith.muli %331, %c14_i32_275 : i32
      %c3_i32_276 = arith.constant 3 : i32
      %333 = arith.addi %332, %c3_i32_276 : i32
      %334 = arith.index_cast %333 : i32 to index
      %c0_277 = arith.constant 0 : index
      %335 = vector.load %arg15[%334, %c0_277] : memref<200x32xf32, #tpu.memory_space<vmem>>, vector<28x32xf32>
      %c736 = arith.constant 736 : index
      %c0_278 = arith.constant 0 : index
      %336 = vector.load %arg4[%c736, %c0_278] : memref<800x16xf32, #tpu.memory_space<vmem>>, vector<32x16xf32>
      %cst_279 = arith.constant dense<0.000000e+00> : vector<28x16xf32>
      %337 = tpu.matmul %335, %336, %cst_279 {dimension_numbers = #tpu.dot_dimension_numbers<[1], [0], [0], [1], [0, 0, 1, 1], [], []>} : vector<28x32xf32>, vector<32x16xf32>, vector<28x16xf32> -> vector<28x16xf32>
      %338 = arith.addf %329, %337 : vector<28x16xf32>
      %c2_i32_280 = arith.constant 2 : i32
      %339 = arith.muli %c2_i32_280, %121 : i32
      %c4_i32_281 = arith.constant 4 : i32
      %340 = arith.addi %339, %c4_i32_281 : i32
      %c14_i32_282 = arith.constant 14 : i32
      %341 = arith.muli %340, %c14_i32_282 : i32
      %c4_i32_283 = arith.constant 4 : i32
      %342 = arith.addi %341, %c4_i32_283 : i32
      %343 = arith.index_cast %342 : i32 to index
      %c0_284 = arith.constant 0 : index
      %344 = vector.load %arg15[%343, %c0_284] : memref<200x32xf32, #tpu.memory_space<vmem>>, vector<28x32xf32>
      %c768 = arith.constant 768 : index
      %c0_285 = arith.constant 0 : index
      %345 = vector.load %arg4[%c768, %c0_285] : memref<800x16xf32, #tpu.memory_space<vmem>>, vector<32x16xf32>
      %cst_286 = arith.constant dense<0.000000e+00> : vector<28x16xf32>
      %346 = tpu.matmul %344, %345, %cst_286 {dimension_numbers = #tpu.dot_dimension_numbers<[1], [0], [0], [1], [0, 0, 1, 1], [], []>} : vector<28x32xf32>, vector<32x16xf32>, vector<28x16xf32> -> vector<28x16xf32>
      %347 = arith.addf %338, %346 : vector<28x16xf32>
      %c0_287 = arith.constant 0 : index
      %c0_288 = arith.constant 0 : index
      %348 = vector.load %arg5[%c0_287, %c0_288] : memref<1x16xf32, #tpu.memory_space<vmem>>, vector<1x16xf32>
      %349 = vector.broadcast %348 : vector<1x16xf32> to vector<28x16xf32>
      %350 = arith.addf %347, %349 : vector<28x16xf32>
      %cst_289 = arith.constant 0.000000e+00 : f32
      %351 = vector.broadcast %cst_289 : f32 to vector<28x16xf32>
      %352 = arith.maximumf %350, %351 : vector<28x16xf32>
      %c0_290 = arith.constant 0 : index
      %c0_291 = arith.constant 0 : index
      %353 = vector.load %arg14[%c0_290, %c0_291] : memref<28x16xf32, #tpu.memory_space<vmem>>, vector<28x16xf32>
      tpu.vector_store %arg14[%c0_290, %c0_291], %352 {strides = array<i32>} : memref<28x16xf32, #tpu.memory_space<vmem>>, vector<28x16xf32>,
      %c0_292 = arith.constant 0 : index
      %c0_293 = arith.constant 0 : index
      %354 = tpu.strided_load %arg14[%c0_292, %c0_293] {strides = array<i32: 2, 1>} : memref<28x16xf32, #tpu.memory_space<vmem>>, vector<5x16xf32>
      %c1_294 = arith.constant 1 : index
      %c0_295 = arith.constant 0 : index
      %355 = tpu.strided_load %arg14[%c1_294, %c0_295] {strides = array<i32: 2, 1>} : memref<28x16xf32, #tpu.memory_space<vmem>>, vector<5x16xf32>
      %356 = arith.maximumf %354, %355 : vector<5x16xf32>
      %c14_296 = arith.constant 14 : index
      %c0_297 = arith.constant 0 : index
      %357 = tpu.strided_load %arg14[%c14_296, %c0_297] {strides = array<i32: 2, 1>} : memref<28x16xf32, #tpu.memory_space<vmem>>, vector<5x16xf32>
      %c15_298 = arith.constant 15 : index
      %c0_299 = arith.constant 0 : index
      %358 = tpu.strided_load %arg14[%c15_298, %c0_299] {strides = array<i32: 2, 1>} : memref<28x16xf32, #tpu.memory_space<vmem>>, vector<5x16xf32>
      %359 = arith.maximumf %357, %358 : vector<5x16xf32>
      %360 = arith.maximumf %356, %359 : vector<5x16xf32>
      %c5_i32_300 = arith.constant 5 : i32
      %361 = arith.muli %121, %c5_i32_300 : i32
      %362 = arith.index_cast %361 : i32 to index
      %c0_301 = arith.constant 0 : index
      %363 = vector.load %arg16[%362, %c0_301] : memref<25x16xf32, #tpu.memory_space<vmem>>, vector<5x16xf32>
      tpu.vector_store %arg16[%362, %c0_301], %360 {strides = array<i32>} : memref<25x16xf32, #tpu.memory_space<vmem>>, vector<5x16xf32>,
    }
    %c5_i32_3 = arith.constant 5 : i32
    %c0_4 = arith.constant 0 : index
    %c0_5 = arith.constant 0 : index
    %4 = vector.load %arg7[%c0_4, %c0_5] : memref<1x120xf32, #tpu.memory_space<vmem>>, vector<1x120xf32>
    %c0_6 = arith.constant 0 : index
    %c0_7 = arith.constant 0 : index
    %5 = vector.load %arg16[%c0_6, %c0_7] : memref<25x16xf32, #tpu.memory_space<vmem>>, vector<1x16xf32>
    %c0_8 = arith.constant 0 : index
    %c0_9 = arith.constant 0 : index
    %6 = vector.load %arg6[%c0_8, %c0_9] : memref<400x120xf32, #tpu.memory_space<vmem>>, vector<16x120xf32>
    %cst_10 = arith.constant dense<0.000000e+00> : vector<1x120xf32>
    %7 = tpu.matmul %5, %6, %cst_10 {dimension_numbers = #tpu.dot_dimension_numbers<[1], [0], [0], [1], [0, 0, 1, 1], [], []>} : vector<1x16xf32>, vector<16x120xf32>, vector<1x120xf32> -> vector<1x120xf32>
    %8 = arith.addf %4, %7 : vector<1x120xf32>
    %c1 = arith.constant 1 : index
    %c0_11 = arith.constant 0 : index
    %9 = vector.load %arg16[%c1, %c0_11] : memref<25x16xf32, #tpu.memory_space<vmem>>, vector<1x16xf32>
    %c16 = arith.constant 16 : index
    %c0_12 = arith.constant 0 : index
    %10 = vector.load %arg6[%c16, %c0_12] : memref<400x120xf32, #tpu.memory_space<vmem>>, vector<16x120xf32>
    %cst_13 = arith.constant dense<0.000000e+00> : vector<1x120xf32>
    %11 = tpu.matmul %9, %10, %cst_13 {dimension_numbers = #tpu.dot_dimension_numbers<[1], [0], [0], [1], [0, 0, 1, 1], [], []>} : vector<1x16xf32>, vector<16x120xf32>, vector<1x120xf32> -> vector<1x120xf32>
    %12 = arith.addf %8, %11 : vector<1x120xf32>
    %c2 = arith.constant 2 : index
    %c0_14 = arith.constant 0 : index
    %13 = vector.load %arg16[%c2, %c0_14] : memref<25x16xf32, #tpu.memory_space<vmem>>, vector<1x16xf32>
    %c32 = arith.constant 32 : index
    %c0_15 = arith.constant 0 : index
    %14 = vector.load %arg6[%c32, %c0_15] : memref<400x120xf32, #tpu.memory_space<vmem>>, vector<16x120xf32>
    %cst_16 = arith.constant dense<0.000000e+00> : vector<1x120xf32>
    %15 = tpu.matmul %13, %14, %cst_16 {dimension_numbers = #tpu.dot_dimension_numbers<[1], [0], [0], [1], [0, 0, 1, 1], [], []>} : vector<1x16xf32>, vector<16x120xf32>, vector<1x120xf32> -> vector<1x120xf32>
    %16 = arith.addf %12, %15 : vector<1x120xf32>
    %c3 = arith.constant 3 : index
    %c0_17 = arith.constant 0 : index
    %17 = vector.load %arg16[%c3, %c0_17] : memref<25x16xf32, #tpu.memory_space<vmem>>, vector<1x16xf32>
    %c48 = arith.constant 48 : index
    %c0_18 = arith.constant 0 : index
    %18 = vector.load %arg6[%c48, %c0_18] : memref<400x120xf32, #tpu.memory_space<vmem>>, vector<16x120xf32>
    %cst_19 = arith.constant dense<0.000000e+00> : vector<1x120xf32>
    %19 = tpu.matmul %17, %18, %cst_19 {dimension_numbers = #tpu.dot_dimension_numbers<[1], [0], [0], [1], [0, 0, 1, 1], [], []>} : vector<1x16xf32>, vector<16x120xf32>, vector<1x120xf32> -> vector<1x120xf32>
    %20 = arith.addf %16, %19 : vector<1x120xf32>
    %c4 = arith.constant 4 : index
    %c0_20 = arith.constant 0 : index
    %21 = vector.load %arg16[%c4, %c0_20] : memref<25x16xf32, #tpu.memory_space<vmem>>, vector<1x16xf32>
    %c64 = arith.constant 64 : index
    %c0_21 = arith.constant 0 : index
    %22 = vector.load %arg6[%c64, %c0_21] : memref<400x120xf32, #tpu.memory_space<vmem>>, vector<16x120xf32>
    %cst_22 = arith.constant dense<0.000000e+00> : vector<1x120xf32>
    %23 = tpu.matmul %21, %22, %cst_22 {dimension_numbers = #tpu.dot_dimension_numbers<[1], [0], [0], [1], [0, 0, 1, 1], [], []>} : vector<1x16xf32>, vector<16x120xf32>, vector<1x120xf32> -> vector<1x120xf32>
    %24 = arith.addf %20, %23 : vector<1x120xf32>
    %c5 = arith.constant 5 : index
    %c0_23 = arith.constant 0 : index
    %25 = vector.load %arg16[%c5, %c0_23] : memref<25x16xf32, #tpu.memory_space<vmem>>, vector<1x16xf32>
    %c80 = arith.constant 80 : index
    %c0_24 = arith.constant 0 : index
    %26 = vector.load %arg6[%c80, %c0_24] : memref<400x120xf32, #tpu.memory_space<vmem>>, vector<16x120xf32>
    %cst_25 = arith.constant dense<0.000000e+00> : vector<1x120xf32>
    %27 = tpu.matmul %25, %26, %cst_25 {dimension_numbers = #tpu.dot_dimension_numbers<[1], [0], [0], [1], [0, 0, 1, 1], [], []>} : vector<1x16xf32>, vector<16x120xf32>, vector<1x120xf32> -> vector<1x120xf32>
    %28 = arith.addf %24, %27 : vector<1x120xf32>
    %c6 = arith.constant 6 : index
    %c0_26 = arith.constant 0 : index
    %29 = vector.load %arg16[%c6, %c0_26] : memref<25x16xf32, #tpu.memory_space<vmem>>, vector<1x16xf32>
    %c96 = arith.constant 96 : index
    %c0_27 = arith.constant 0 : index
    %30 = vector.load %arg6[%c96, %c0_27] : memref<400x120xf32, #tpu.memory_space<vmem>>, vector<16x120xf32>
    %cst_28 = arith.constant dense<0.000000e+00> : vector<1x120xf32>
    %31 = tpu.matmul %29, %30, %cst_28 {dimension_numbers = #tpu.dot_dimension_numbers<[1], [0], [0], [1], [0, 0, 1, 1], [], []>} : vector<1x16xf32>, vector<16x120xf32>, vector<1x120xf32> -> vector<1x120xf32>
    %32 = arith.addf %28, %31 : vector<1x120xf32>
    %c7 = arith.constant 7 : index
    %c0_29 = arith.constant 0 : index
    %33 = vector.load %arg16[%c7, %c0_29] : memref<25x16xf32, #tpu.memory_space<vmem>>, vector<1x16xf32>
    %c112 = arith.constant 112 : index
    %c0_30 = arith.constant 0 : index
    %34 = vector.load %arg6[%c112, %c0_30] : memref<400x120xf32, #tpu.memory_space<vmem>>, vector<16x120xf32>
    %cst_31 = arith.constant dense<0.000000e+00> : vector<1x120xf32>
    %35 = tpu.matmul %33, %34, %cst_31 {dimension_numbers = #tpu.dot_dimension_numbers<[1], [0], [0], [1], [0, 0, 1, 1], [], []>} : vector<1x16xf32>, vector<16x120xf32>, vector<1x120xf32> -> vector<1x120xf32>
    %36 = arith.addf %32, %35 : vector<1x120xf32>
    %c8 = arith.constant 8 : index
    %c0_32 = arith.constant 0 : index
    %37 = vector.load %arg16[%c8, %c0_32] : memref<25x16xf32, #tpu.memory_space<vmem>>, vector<1x16xf32>
    %c128 = arith.constant 128 : index
    %c0_33 = arith.constant 0 : index
    %38 = vector.load %arg6[%c128, %c0_33] : memref<400x120xf32, #tpu.memory_space<vmem>>, vector<16x120xf32>
    %cst_34 = arith.constant dense<0.000000e+00> : vector<1x120xf32>
    %39 = tpu.matmul %37, %38, %cst_34 {dimension_numbers = #tpu.dot_dimension_numbers<[1], [0], [0], [1], [0, 0, 1, 1], [], []>} : vector<1x16xf32>, vector<16x120xf32>, vector<1x120xf32> -> vector<1x120xf32>
    %40 = arith.addf %36, %39 : vector<1x120xf32>
    %c9 = arith.constant 9 : index
    %c0_35 = arith.constant 0 : index
    %41 = vector.load %arg16[%c9, %c0_35] : memref<25x16xf32, #tpu.memory_space<vmem>>, vector<1x16xf32>
    %c144 = arith.constant 144 : index
    %c0_36 = arith.constant 0 : index
    %42 = vector.load %arg6[%c144, %c0_36] : memref<400x120xf32, #tpu.memory_space<vmem>>, vector<16x120xf32>
    %cst_37 = arith.constant dense<0.000000e+00> : vector<1x120xf32>
    %43 = tpu.matmul %41, %42, %cst_37 {dimension_numbers = #tpu.dot_dimension_numbers<[1], [0], [0], [1], [0, 0, 1, 1], [], []>} : vector<1x16xf32>, vector<16x120xf32>, vector<1x120xf32> -> vector<1x120xf32>
    %44 = arith.addf %40, %43 : vector<1x120xf32>
    %c10 = arith.constant 10 : index
    %c0_38 = arith.constant 0 : index
    %45 = vector.load %arg16[%c10, %c0_38] : memref<25x16xf32, #tpu.memory_space<vmem>>, vector<1x16xf32>
    %c160 = arith.constant 160 : index
    %c0_39 = arith.constant 0 : index
    %46 = vector.load %arg6[%c160, %c0_39] : memref<400x120xf32, #tpu.memory_space<vmem>>, vector<16x120xf32>
    %cst_40 = arith.constant dense<0.000000e+00> : vector<1x120xf32>
    %47 = tpu.matmul %45, %46, %cst_40 {dimension_numbers = #tpu.dot_dimension_numbers<[1], [0], [0], [1], [0, 0, 1, 1], [], []>} : vector<1x16xf32>, vector<16x120xf32>, vector<1x120xf32> -> vector<1x120xf32>
    %48 = arith.addf %44, %47 : vector<1x120xf32>
    %c11 = arith.constant 11 : index
    %c0_41 = arith.constant 0 : index
    %49 = vector.load %arg16[%c11, %c0_41] : memref<25x16xf32, #tpu.memory_space<vmem>>, vector<1x16xf32>
    %c176 = arith.constant 176 : index
    %c0_42 = arith.constant 0 : index
    %50 = vector.load %arg6[%c176, %c0_42] : memref<400x120xf32, #tpu.memory_space<vmem>>, vector<16x120xf32>
    %cst_43 = arith.constant dense<0.000000e+00> : vector<1x120xf32>
    %51 = tpu.matmul %49, %50, %cst_43 {dimension_numbers = #tpu.dot_dimension_numbers<[1], [0], [0], [1], [0, 0, 1, 1], [], []>} : vector<1x16xf32>, vector<16x120xf32>, vector<1x120xf32> -> vector<1x120xf32>
    %52 = arith.addf %48, %51 : vector<1x120xf32>
    %c12 = arith.constant 12 : index
    %c0_44 = arith.constant 0 : index
    %53 = vector.load %arg16[%c12, %c0_44] : memref<25x16xf32, #tpu.memory_space<vmem>>, vector<1x16xf32>
    %c192 = arith.constant 192 : index
    %c0_45 = arith.constant 0 : index
    %54 = vector.load %arg6[%c192, %c0_45] : memref<400x120xf32, #tpu.memory_space<vmem>>, vector<16x120xf32>
    %cst_46 = arith.constant dense<0.000000e+00> : vector<1x120xf32>
    %55 = tpu.matmul %53, %54, %cst_46 {dimension_numbers = #tpu.dot_dimension_numbers<[1], [0], [0], [1], [0, 0, 1, 1], [], []>} : vector<1x16xf32>, vector<16x120xf32>, vector<1x120xf32> -> vector<1x120xf32>
    %56 = arith.addf %52, %55 : vector<1x120xf32>
    %c13 = arith.constant 13 : index
    %c0_47 = arith.constant 0 : index
    %57 = vector.load %arg16[%c13, %c0_47] : memref<25x16xf32, #tpu.memory_space<vmem>>, vector<1x16xf32>
    %c208 = arith.constant 208 : index
    %c0_48 = arith.constant 0 : index
    %58 = vector.load %arg6[%c208, %c0_48] : memref<400x120xf32, #tpu.memory_space<vmem>>, vector<16x120xf32>
    %cst_49 = arith.constant dense<0.000000e+00> : vector<1x120xf32>
    %59 = tpu.matmul %57, %58, %cst_49 {dimension_numbers = #tpu.dot_dimension_numbers<[1], [0], [0], [1], [0, 0, 1, 1], [], []>} : vector<1x16xf32>, vector<16x120xf32>, vector<1x120xf32> -> vector<1x120xf32>
    %60 = arith.addf %56, %59 : vector<1x120xf32>
    %c14 = arith.constant 14 : index
    %c0_50 = arith.constant 0 : index
    %61 = vector.load %arg16[%c14, %c0_50] : memref<25x16xf32, #tpu.memory_space<vmem>>, vector<1x16xf32>
    %c224 = arith.constant 224 : index
    %c0_51 = arith.constant 0 : index
    %62 = vector.load %arg6[%c224, %c0_51] : memref<400x120xf32, #tpu.memory_space<vmem>>, vector<16x120xf32>
    %cst_52 = arith.constant dense<0.000000e+00> : vector<1x120xf32>
    %63 = tpu.matmul %61, %62, %cst_52 {dimension_numbers = #tpu.dot_dimension_numbers<[1], [0], [0], [1], [0, 0, 1, 1], [], []>} : vector<1x16xf32>, vector<16x120xf32>, vector<1x120xf32> -> vector<1x120xf32>
    %64 = arith.addf %60, %63 : vector<1x120xf32>
    %c15 = arith.constant 15 : index
    %c0_53 = arith.constant 0 : index
    %65 = vector.load %arg16[%c15, %c0_53] : memref<25x16xf32, #tpu.memory_space<vmem>>, vector<1x16xf32>
    %c240 = arith.constant 240 : index
    %c0_54 = arith.constant 0 : index
    %66 = vector.load %arg6[%c240, %c0_54] : memref<400x120xf32, #tpu.memory_space<vmem>>, vector<16x120xf32>
    %cst_55 = arith.constant dense<0.000000e+00> : vector<1x120xf32>
    %67 = tpu.matmul %65, %66, %cst_55 {dimension_numbers = #tpu.dot_dimension_numbers<[1], [0], [0], [1], [0, 0, 1, 1], [], []>} : vector<1x16xf32>, vector<16x120xf32>, vector<1x120xf32> -> vector<1x120xf32>
    %68 = arith.addf %64, %67 : vector<1x120xf32>
    %c16_56 = arith.constant 16 : index
    %c0_57 = arith.constant 0 : index
    %69 = vector.load %arg16[%c16_56, %c0_57] : memref<25x16xf32, #tpu.memory_space<vmem>>, vector<1x16xf32>
    %c256 = arith.constant 256 : index
    %c0_58 = arith.constant 0 : index
    %70 = vector.load %arg6[%c256, %c0_58] : memref<400x120xf32, #tpu.memory_space<vmem>>, vector<16x120xf32>
    %cst_59 = arith.constant dense<0.000000e+00> : vector<1x120xf32>
    %71 = tpu.matmul %69, %70, %cst_59 {dimension_numbers = #tpu.dot_dimension_numbers<[1], [0], [0], [1], [0, 0, 1, 1], [], []>} : vector<1x16xf32>, vector<16x120xf32>, vector<1x120xf32> -> vector<1x120xf32>
    %72 = arith.addf %68, %71 : vector<1x120xf32>
    %c17 = arith.constant 17 : index
    %c0_60 = arith.constant 0 : index
    %73 = vector.load %arg16[%c17, %c0_60] : memref<25x16xf32, #tpu.memory_space<vmem>>, vector<1x16xf32>
    %c272 = arith.constant 272 : index
    %c0_61 = arith.constant 0 : index
    %74 = vector.load %arg6[%c272, %c0_61] : memref<400x120xf32, #tpu.memory_space<vmem>>, vector<16x120xf32>
    %cst_62 = arith.constant dense<0.000000e+00> : vector<1x120xf32>
    %75 = tpu.matmul %73, %74, %cst_62 {dimension_numbers = #tpu.dot_dimension_numbers<[1], [0], [0], [1], [0, 0, 1, 1], [], []>} : vector<1x16xf32>, vector<16x120xf32>, vector<1x120xf32> -> vector<1x120xf32>
    %76 = arith.addf %72, %75 : vector<1x120xf32>
    %c18 = arith.constant 18 : index
    %c0_63 = arith.constant 0 : index
    %77 = vector.load %arg16[%c18, %c0_63] : memref<25x16xf32, #tpu.memory_space<vmem>>, vector<1x16xf32>
    %c288 = arith.constant 288 : index
    %c0_64 = arith.constant 0 : index
    %78 = vector.load %arg6[%c288, %c0_64] : memref<400x120xf32, #tpu.memory_space<vmem>>, vector<16x120xf32>
    %cst_65 = arith.constant dense<0.000000e+00> : vector<1x120xf32>
    %79 = tpu.matmul %77, %78, %cst_65 {dimension_numbers = #tpu.dot_dimension_numbers<[1], [0], [0], [1], [0, 0, 1, 1], [], []>} : vector<1x16xf32>, vector<16x120xf32>, vector<1x120xf32> -> vector<1x120xf32>
    %80 = arith.addf %76, %79 : vector<1x120xf32>
    %c19 = arith.constant 19 : index
    %c0_66 = arith.constant 0 : index
    %81 = vector.load %arg16[%c19, %c0_66] : memref<25x16xf32, #tpu.memory_space<vmem>>, vector<1x16xf32>
    %c304 = arith.constant 304 : index
    %c0_67 = arith.constant 0 : index
    %82 = vector.load %arg6[%c304, %c0_67] : memref<400x120xf32, #tpu.memory_space<vmem>>, vector<16x120xf32>
    %cst_68 = arith.constant dense<0.000000e+00> : vector<1x120xf32>
    %83 = tpu.matmul %81, %82, %cst_68 {dimension_numbers = #tpu.dot_dimension_numbers<[1], [0], [0], [1], [0, 0, 1, 1], [], []>} : vector<1x16xf32>, vector<16x120xf32>, vector<1x120xf32> -> vector<1x120xf32>
    %84 = arith.addf %80, %83 : vector<1x120xf32>
    %c20 = arith.constant 20 : index
    %c0_69 = arith.constant 0 : index
    %85 = vector.load %arg16[%c20, %c0_69] : memref<25x16xf32, #tpu.memory_space<vmem>>, vector<1x16xf32>
    %c320 = arith.constant 320 : index
    %c0_70 = arith.constant 0 : index
    %86 = vector.load %arg6[%c320, %c0_70] : memref<400x120xf32, #tpu.memory_space<vmem>>, vector<16x120xf32>
    %cst_71 = arith.constant dense<0.000000e+00> : vector<1x120xf32>
    %87 = tpu.matmul %85, %86, %cst_71 {dimension_numbers = #tpu.dot_dimension_numbers<[1], [0], [0], [1], [0, 0, 1, 1], [], []>} : vector<1x16xf32>, vector<16x120xf32>, vector<1x120xf32> -> vector<1x120xf32>
    %88 = arith.addf %84, %87 : vector<1x120xf32>
    %c21 = arith.constant 21 : index
    %c0_72 = arith.constant 0 : index
    %89 = vector.load %arg16[%c21, %c0_72] : memref<25x16xf32, #tpu.memory_space<vmem>>, vector<1x16xf32>
    %c336 = arith.constant 336 : index
    %c0_73 = arith.constant 0 : index
    %90 = vector.load %arg6[%c336, %c0_73] : memref<400x120xf32, #tpu.memory_space<vmem>>, vector<16x120xf32>
    %cst_74 = arith.constant dense<0.000000e+00> : vector<1x120xf32>
    %91 = tpu.matmul %89, %90, %cst_74 {dimension_numbers = #tpu.dot_dimension_numbers<[1], [0], [0], [1], [0, 0, 1, 1], [], []>} : vector<1x16xf32>, vector<16x120xf32>, vector<1x120xf32> -> vector<1x120xf32>
    %92 = arith.addf %88, %91 : vector<1x120xf32>
    %c22 = arith.constant 22 : index
    %c0_75 = arith.constant 0 : index
    %93 = vector.load %arg16[%c22, %c0_75] : memref<25x16xf32, #tpu.memory_space<vmem>>, vector<1x16xf32>
    %c352 = arith.constant 352 : index
    %c0_76 = arith.constant 0 : index
    %94 = vector.load %arg6[%c352, %c0_76] : memref<400x120xf32, #tpu.memory_space<vmem>>, vector<16x120xf32>
    %cst_77 = arith.constant dense<0.000000e+00> : vector<1x120xf32>
    %95 = tpu.matmul %93, %94, %cst_77 {dimension_numbers = #tpu.dot_dimension_numbers<[1], [0], [0], [1], [0, 0, 1, 1], [], []>} : vector<1x16xf32>, vector<16x120xf32>, vector<1x120xf32> -> vector<1x120xf32>
    %96 = arith.addf %92, %95 : vector<1x120xf32>
    %c23 = arith.constant 23 : index
    %c0_78 = arith.constant 0 : index
    %97 = vector.load %arg16[%c23, %c0_78] : memref<25x16xf32, #tpu.memory_space<vmem>>, vector<1x16xf32>
    %c368 = arith.constant 368 : index
    %c0_79 = arith.constant 0 : index
    %98 = vector.load %arg6[%c368, %c0_79] : memref<400x120xf32, #tpu.memory_space<vmem>>, vector<16x120xf32>
    %cst_80 = arith.constant dense<0.000000e+00> : vector<1x120xf32>
    %99 = tpu.matmul %97, %98, %cst_80 {dimension_numbers = #tpu.dot_dimension_numbers<[1], [0], [0], [1], [0, 0, 1, 1], [], []>} : vector<1x16xf32>, vector<16x120xf32>, vector<1x120xf32> -> vector<1x120xf32>
    %100 = arith.addf %96, %99 : vector<1x120xf32>
    %c24 = arith.constant 24 : index
    %c0_81 = arith.constant 0 : index
    %101 = vector.load %arg16[%c24, %c0_81] : memref<25x16xf32, #tpu.memory_space<vmem>>, vector<1x16xf32>
    %c384 = arith.constant 384 : index
    %c0_82 = arith.constant 0 : index
    %102 = vector.load %arg6[%c384, %c0_82] : memref<400x120xf32, #tpu.memory_space<vmem>>, vector<16x120xf32>
    %cst_83 = arith.constant dense<0.000000e+00> : vector<1x120xf32>
    %103 = tpu.matmul %101, %102, %cst_83 {dimension_numbers = #tpu.dot_dimension_numbers<[1], [0], [0], [1], [0, 0, 1, 1], [], []>} : vector<1x16xf32>, vector<16x120xf32>, vector<1x120xf32> -> vector<1x120xf32>
    %104 = arith.addf %100, %103 : vector<1x120xf32>
    %cst_84 = arith.constant 0.000000e+00 : f32
    %105 = vector.broadcast %cst_84 : f32 to vector<1x120xf32>
    %106 = arith.maximumf %104, %105 : vector<1x120xf32>
    %c0_85 = arith.constant 0 : index
    %c0_86 = arith.constant 0 : index
    %107 = vector.load %arg8[%c0_85, %c0_86] : memref<120x84xf32, #tpu.memory_space<vmem>>, vector<120x84xf32>
    %cst_87 = arith.constant dense<0.000000e+00> : vector<1x84xf32>
    %108 = tpu.matmul %106, %107, %cst_87 {dimension_numbers = #tpu.dot_dimension_numbers<[1], [0], [0], [1], [0, 0, 1, 1], [], []>} : vector<1x120xf32>, vector<120x84xf32>, vector<1x84xf32> -> vector<1x84xf32>
    %c0_88 = arith.constant 0 : index
    %c0_89 = arith.constant 0 : index
    %109 = vector.load %arg9[%c0_88, %c0_89] : memref<1x84xf32, #tpu.memory_space<vmem>>, vector<1x84xf32>
    %110 = arith.addf %108, %109 : vector<1x84xf32>
    %cst_90 = arith.constant 0.000000e+00 : f32
    %111 = vector.broadcast %cst_90 : f32 to vector<1x84xf32>
    %112 = arith.maximumf %110, %111 : vector<1x84xf32>
    %c0_91 = arith.constant 0 : index
    %c0_92 = arith.constant 0 : index
    %113 = vector.load %arg10[%c0_91, %c0_92] : memref<84x10xf32, #tpu.memory_space<vmem>>, vector<84x10xf32>
    %cst_93 = arith.constant dense<0.000000e+00> : vector<1x10xf32>
    %114 = tpu.matmul %112, %113, %cst_93 {dimension_numbers = #tpu.dot_dimension_numbers<[1], [0], [0], [1], [0, 0, 1, 1], [], []>} : vector<1x84xf32>, vector<84x10xf32>, vector<1x10xf32> -> vector<1x10xf32>
    %c0_94 = arith.constant 0 : index
    %c0_95 = arith.constant 0 : index
    %115 = vector.load %arg11[%c0_94, %c0_95] : memref<1x10xf32, #tpu.memory_space<vmem>>, vector<1x10xf32>
    %116 = arith.addf %114, %115 : vector<1x10xf32>
    %c0_96 = arith.constant 0 : index
    %c0_97 = arith.constant 0 : index
    %c0_98 = arith.constant 0 : index
    %117 = vector.load %arg12[%c0_96, %c0_97, %c0_98] : memref<1x1x10xf32, #tpu.memory_space<vmem>>, vector<1x1x10xf32>
    %118 = vector.shape_cast %117 : vector<1x1x10xf32> to vector<1x10xf32>
    %119 = vector.shape_cast %116 : vector<1x10xf32> to vector<1x1x10xf32>
    tpu.vector_store %arg12[%c0_96, %c0_97, %c0_98], %119 {strides = array<i32>} : memref<1x1x10xf32, #tpu.memory_space<vmem>>, vector<1x1x10xf32>,
    return
  }
  func.func @transform_0(%arg0: i32) -> (i32, i32, i32) {
    %c0_i32 = arith.constant 0 : i32
    %c0_i32_0 = arith.constant 0 : i32
    %c0_i32_1 = arith.constant 0 : i32
    return %arg0, %c0_i32, %c0_i32_0 : i32, i32, i32
  }
  func.func @transform_1(%arg0: i32) -> (i32, i32) {
    %c0_i32 = arith.constant 0 : i32
    %c0_i32_0 = arith.constant 0 : i32
    %c0_i32_1 = arith.constant 0 : i32
    return %c0_i32, %c0_i32_0 : i32, i32
  }
  func.func @transform_2(%arg0: i32) -> (i32, i32) {
    %c0_i32 = arith.constant 0 : i32
    %c0_i32_0 = arith.constant 0 : i32
    %c0_i32_1 = arith.constant 0 : i32
    return %c0_i32, %c0_i32_0 : i32, i32
  }
  func.func @transform_3(%arg0: i32) -> (i32, i32) {
    %c0_i32 = arith.constant 0 : i32
    %c0_i32_0 = arith.constant 0 : i32
    %c0_i32_1 = arith.constant 0 : i32
    return %c0_i32, %c0_i32_0 : i32, i32
  }
  func.func @transform_4(%arg0: i32) -> (i32, i32) {
    %c0_i32 = arith.constant 0 : i32
    %c0_i32_0 = arith.constant 0 : i32
    %c0_i32_1 = arith.constant 0 : i32
    return %c0_i32, %c0_i32_0 : i32, i32
  }
  func.func @transform_5(%arg0: i32) -> (i32, i32) {
    %c0_i32 = arith.constant 0 : i32
    %c0_i32_0 = arith.constant 0 : i32
    %c0_i32_1 = arith.constant 0 : i32
    return %c0_i32, %c0_i32_0 : i32, i32
  }
  func.func @transform_6(%arg0: i32) -> (i32, i32) {
    %c0_i32 = arith.constant 0 : i32
    %c0_i32_0 = arith.constant 0 : i32
    %c0_i32_1 = arith.constant 0 : i32
    return %c0_i32, %c0_i32_0 : i32, i32
  }
  func.func @transform_7(%arg0: i32) -> (i32, i32) {
    %c0_i32 = arith.constant 0 : i32
    %c0_i32_0 = arith.constant 0 : i32
    %c0_i32_1 = arith.constant 0 : i32
    return %c0_i32, %c0_i32_0 : i32, i32
  }
  func.func @transform_8(%arg0: i32) -> (i32, i32) {
    %c0_i32 = arith.constant 0 : i32
    %c0_i32_0 = arith.constant 0 : i32
    %c0_i32_1 = arith.constant 0 : i32
    return %c0_i32, %c0_i32_0 : i32, i32
  }
  func.func @transform_9(%arg0: i32) -> (i32, i32) {
    %c0_i32 = arith.constant 0 : i32
    %c0_i32_0 = arith.constant 0 : i32
    %c0_i32_1 = arith.constant 0 : i32
    return %c0_i32, %c0_i32_0 : i32, i32
  }
  func.func @transform_10(%arg0: i32) -> (i32, i32) {
    %c0_i32 = arith.constant 0 : i32
    %c0_i32_0 = arith.constant 0 : i32
    %c0_i32_1 = arith.constant 0 : i32
    return %c0_i32, %c0_i32_0 : i32, i32
  }
  func.func @transform_11(%arg0: i32) -> (i32, i32, i32) {
    %c0_i32 = arith.constant 0 : i32
    %c0_i32_0 = arith.constant 0 : i32
    %c0_i32_1 = arith.constant 0 : i32
    return %arg0, %c0_i32, %c0_i32_0 : i32, i32, i32
  }
}

</mosaic_0001>

<bundles_post_ra>
// kernel: net_forward.1
= control target key start
LH: loop header
LB: loop body
LE: loop exit
PB: predicated region body
PF: predicated region fallthrough
CT: control target
= control target key end

     0   :  { %s13678_s0 = inlined_call_operand.vmem [shape: f32[2,1056,3], index: 0, kind: input, shape index: {}]   ;;  %s13679_s1 = inlined_call_operand.vmem [shape: f32[75,32], index: 1, kind: input, shape index: {}]   ;;  %s13680_s2 = inlined_call_operand.vmem [shape: f32[1,32], index: 2, kind: input, shape index: {}]   ;;  %s13681_s3 = inlined_call_operand.vmem [shape: f32[800,16], index: 3, kind: input, shape index: {}]   ;;  %s13682_s4 = inlined_call_operand.vmem [shape: f32[1,16], index: 4, kind: input, shape index: {}]   ;;  %s13683_s5 = inlined_call_operand.vmem [shape: f32[400,120], index: 5, kind: input, shape index: {}]   ;;  %s13684_s6 = inlined_call_operand.vmem [shape: f32[1,120], index: 6, kind: input, shape index: {}]   ;;  %s13685_s7 = inlined_call_operand.vmem [shape: f32[120,84], index: 7, kind: input, shape index: {}]   ;;  %s13686_s8 = inlined_call_operand.vmem [shape: f32[1,84], index: 8, kind: input, shape index: {}]   ;;  %s13687_s9 = inlined_call_operand.vmem [shape: f32[84,10], index: 9, kind: input, shape index: {}]   ;;  %s13688_s10 = inlined_call_operand.vmem [shape: f32[1,10], index: 10, kind: input, shape index: {}]   ;;  %s13689_s11 = inlined_call_operand.hbm [shape: f32[2,1,10], index: 11, kind: output, shape index: {}]  }
   0x1   :  { %13693 = sst [smem:[#allocation19_spill]] %s13678_s0 }
   0x2   :  { %13694 = sst [smem:[#allocation20_spill]] %s13679_s1 }
   0x3   :  { %16 = vsyncpa [#allocation7], 0 }
   0x4   :  { %18 = vsyncpa [#allocation7 + $0x1], 0  ;;  %s11837_s17 = smov 0   ;;  %s11839_s18 = smov 0  }
   0x5   :  { %s11841_s19 = smov 0   ;;  %s11843_s20 = smov 0  }
   0x6 LB: > { %s11858_s21 = sadd.s32 4294967295, %s11764_s20   ;;  %s9411_s22 = sadd.s32 4294967294, %s11764_s20   ;;  %s11764_s20 = sphi %s11843_s20, %s13724_s20   ;;  %s11760_s19 = sphi %s11841_s19, %s13723_s19   ;;  %s11756_s18 = sphi %s11839_s18, %s13722_s18   ;;  %s11752_s17 = sphi %s11837_s17, %s13721_s17  }
   0x7   : > { %s11862_s23 = sadd.s32 1, %s11764_s20   ;;  %s267_s24 = sadd.s32 1, %s11760_s19 }
   0x8   : > { %s264_s25 = ssub.s32 %s11764_s20, %s11862_s23  ;;  %p277_p0 = scmp.ne.s32.totalorder %s11760_s19, %s11756_s18 }
   0x9   : > { %p265_p1 = scmp.eq.s32.totalorder %s264_s25, 0  ;;  %p278_p2 = scmp.eq.s32.totalorder %s11858_s21, 1 }
   0xa   : > { %p283_p3 = scmp.ne.s32.totalorder %s11756_s18, %s11752_s17  ;;  %p284_p4 = scmp.eq.s32.totalorder %s9411_s22, 1 }
   0xb   : > { %s11873_s26 = scalar_select %p265_p1, %s11760_s19, %s267_s24  }
   0xc   : > { %p11875_p5 = por %p278_p2, %p277_p0  ;;  %p11879_p6 = por %p284_p4, %p283_p3 }
   0xd   : > { %p9414_p7 = scmp.ge.s32.totalorder %s11764_s20, 1  ;;  %p340_p8 = scmp.lt.s32.totalorder %s11764_s20, 3 }
   0xf   : > { %p341_p9 = pnand %p9414_p7, %p340_p8 }
  0x10   : > { %s13692_s29 = sand.u32 (!%p341_p9), 1, %s11756_s18   ;;  %p379_p10 = scmp.lt.s32.totalorder (!%p341_p9), %s11858_s21, 1 }
  0x11   : > { %344 = sbr.rel (%p341_p9) target bundleno = 1496 (0x5d8), region = 64  ;;  %s13697_s0 = sld [smem:[#allocation19_spill]] (!%p341_p9) }
  0x12   : > { %s11896_s16 = scalar_lea.vmem (!%p341_p9), [#allocation6], %s13692_s29  ;;  %s11898_s22 = smov (!%p341_p9), 0  }
  0x16   : > { %vm384_vm0 = vcmask 257024   ;;  %v13690_v0 = vmov 0.0   ;;  %s380_s30 = scalar_select %p379_p10, %s11858_s21, 1 }
  0x17   : > { %385 = vst.msk [vmem:[#allocation4 + $0xc4] sm:$0xf] %vm384_vm0, %v13690_v0 }
  0x18   : > { %s11638_s12 = smul.u32 1056, %s380_s30 }
  0x1a   : > { %s11892_s15 = scalar_lea.vmem %s13697_s0, %s11638_s12 }
  0x1b LB: >> { %s13698_s1 = sld [smem:[#allocation20_spill]]  ;;  %vm439_vm1 = vcmask 1042432   ;;  %s9416_s24 = sshll.u32 %s11768_s22, 6  ;;  %vm414_vm2 = vcmask 23552   ;;  %vm4181_vm3 = vcmask 261120   ;;  %vm4214_vm4 = vcmask 259072   ;;  %s11768_s22 = sphi %s11898_s22, %s391_s22  }
  0x1c   : >> { %s11918_s25 = scalar_lea.vmem %s11892_s15, %s9416_s24  ;;  %s4211_s30 = smul.u32 14, %s11768_s22 }
  0x1d   : >> { %v9418_v4 = vld [vmem:[%s11918_s25 + $0x1] sm:$0xff]  ;;  %v9419_v6 = vld [vmem:[%s11918_s25 + $0x9] sm:$0xff]  ;;  %v9420_v8 = vld [vmem:[%s11918_s25 + $0x11] sm:$0xff]  ;;  %s391_s22 = sadd.s32 1, %s11768_s22  }
  0x1e   : >> { %v11924_v5 = vld [vmem:[%s11918_s25 + $0x21] sm:$0xff]  ;;  %10697 = vmatprep.mubr.msk.f32.mxu0 %vm414_vm2, %v9418_v4  ;;  %v11931_v7 = vld [vmem:[%s11918_s25 + $0x29] sm:$0xff]  ;;  %v11935_v9 = vld [vmem:[%s11918_s25 + $0x31] sm:$0xff]  ;;  %s4212_s12 = scalar_lea.vmem [#allocation4], %s4211_s30  ;;  %p388_p11 = scmp.ge.s32.totalorder %s391_s22, 14  }
  0x1f   : >> { %10703 = vmatprep.mubr.msk.f32.mxu1 %vm414_vm2, %v11924_v5  ;;  %v9421_v12 = vld [vmem:[%s11918_s25 + $0x19] sm:$0xff]  ;;  %v9445_v15 = vld [vmem:[%s11918_s25 + $0x2] sm:$0xff]  ;;  %v9446_v17 = vld [vmem:[%s11918_s25 + $0xa] sm:$0xff]  ;;  %s12683_s13 = smov (%p388_p11), 0  }
  0x20   : >> { %v11950_v13 = vld [vmem:[%s11918_s25 + $0x39] sm:$0xff]  ;;  %v395_v16 = vld [vmem:[%s11918_s25 + $0x8] sm:$0xff]  ;;  %v396_v18 = vld [vmem:[%s11918_s25 + $0x10] sm:$0xff] }
  0x21   : >> { %v413_v1 = vld [vmem:[%s13698_s1 + $0x3] sm:$0x7]  ;;  %v402_v2 = vld [vmem:[%s13698_s1] sm:$0x7]  ;;  %v690_v3 = vld [vmem:[%s13698_s1 + $0x6] sm:$0x7] }
  0x22   : >> { %11628 = vmatprep.subr.msk.mxu1 %vm439_vm1, %v413_v1  ;;  %10695 = vmatprep.subr.msk.mxu0 %vm439_vm1, %v413_v1  ;;  %v841_v10 = vld [vmem:[%s13698_s1 + $0x9] sm:$0x7]  ;;  %v992_v11 = vld [vmem:[%s13698_s1 + $0xc] sm:$0x7]  ;;  %v394_v14 = vld [vmem:[%s11918_s25] sm:$0xff] }
  0x23   : >> { %11629 = vmatpush3.msk.msra.mxu1 %vm439_vm1, %v413_v1  ;;  %10696 = vmatpush3.msk.msra.mxu0 %vm439_vm1, %v413_v1  ;;  %v9447_v19 = vld [vmem:[%s11918_s25 + $0x12] sm:$0xff]  ;;  %v1145_v20 = vld [vmem:[%s13698_s1 + $0xf] sm:$0x7]  ;;  %v9448_v23 = vld [vmem:[%s11918_s25 + $0x1a] sm:$0xff] }
  0x24   : >> { %10709 = vmatprep.subr.msk.mxu1 %vm439_vm1, %v402_v2  ;;  %10723 = vmatprep.subr.msk.mxu0 %vm439_vm1, %v690_v3  ;;  %v1296_v21 = vld [vmem:[%s13698_s1 + $0x12] sm:$0x7]  ;;  %v397_v22 = vld [vmem:[%s11918_s25 + $0x18] sm:$0xff]  ;;  %v398_v24 = vld [vmem:[%s11918_s25 + $0x20] sm:$0xff] }
  0x25   : >> { %10698 = vmatmul.mubr.msk.f32.vlgmr.msra.gmra.mxu0 %vm414_vm2, %v9419_v6  ;;  %10704 = vmatmul.mubr.msk.f32.vlgmr.msra.gmra.mxu1 %vm414_vm2, %v11931_v7  ;;  %v11984_v25 = vld [vmem:[%s11918_s25 + $0x22] sm:$0xff]  ;;  %v11995_v27 = vld [vmem:[%s11918_s25 + $0x2a] sm:$0xff]  ;;  %v11999_v29 = vld [vmem:[%s11918_s25 + $0x32] sm:$0xff] }
  0x26   : >> { %10710 = vmatpush3.msk.msra.mxu1 %vm439_vm1, %v402_v2  ;;  %10724 = vmatpush3.msk.msra.mxu0 %vm439_vm1, %v690_v3  ;;  %v399_v26 = vld [vmem:[%s11918_s25 + $0x28] sm:$0xff]  ;;  %v400_v28 = vld [vmem:[%s11918_s25 + $0x30] sm:$0xff]  ;;  %v401_v30 = vld [vmem:[%s11918_s25 + $0x38] sm:$0xff] }
  0x27   : >> { %10700 = vmatprep.mubr.msk.f32.mxu0 %vm414_vm2, %v9420_v8  ;;  %10706 = vmatprep.mubr.msk.f32.mxu1 %vm414_vm2, %v11935_v9  ;;  %v12009_v31 = vld [vmem:[%s11918_s25 + $0x3a] sm:$0xff]  ;;  %v9463_v32 = vld [vmem:[%s11918_s25 + $0x3] sm:$0xff]  ;;  %v9464_v34 = vld [vmem:[%s11918_s25 + $0xb] sm:$0xff] }
  0x28   : >> { %10737 = vmatprep.subr.msk.mxu1 %vm439_vm1, %v841_v10  ;;  %10751 = vmatprep.subr.msk.mxu0 %vm439_vm1, %v992_v11  ;;  %v9481_v33 = vld [vmem:[%s11918_s25 + $0x4] sm:$0xff]  ;;  %v9482_v35 = vld [vmem:[%s11918_s25 + $0xc] sm:$0xff]  ;;  %v9483_v37 = vld [vmem:[%s11918_s25 + $0x14] sm:$0xff] }
  0x29   : >> { %10701 = vmatmul.mubr.msk.f32.gmra.mxu0 %vm414_vm2, %v9421_v12  ;;  %10707 = vmatmul.mubr.msk.f32.gmra.mxu1 %vm414_vm2, %v11950_v13  ;;  %v9465_v36 = vld [vmem:[%s11918_s25 + $0x13] sm:$0xff]  ;;  %v9466_v40 = vld [vmem:[%s11918_s25 + $0x1b] sm:$0xff]  ;;  %v9467_v42 = vld [vmem:[%s11918_s25 + $0x23] sm:$0xff] }
  0x2a   : >> { %10711 = vmatprep.mubr.msk.f32.mxu1 %vm414_vm2, %v394_v14  ;;  %10725 = vmatprep.mubr.msk.f32.mxu0 %vm414_vm2, %v9445_v15  ;;  %v1447_v38 = vld [vmem:[%s13698_s1 + $0x15] sm:$0x7]  ;;  %v1598_v39 = vld [vmem:[%s13698_s1 + $0x18] sm:$0x7]  ;;  %v9484_v41 = vld [vmem:[%s11918_s25 + $0x1c] sm:$0xff] }
  0x2b   : >> { %v12038_v43 = vld [vmem:[%s11918_s25 + $0x24] sm:$0xff]  ;;  %v12049_v45 = vld [vmem:[%s11918_s25 + $0x2c] sm:$0xff]  ;;  %v12053_v47 = vld [vmem:[%s11918_s25 + $0x34] sm:$0xff] }
  0x2c   : >> { %v9468_v44 = vld [vmem:[%s11918_s25 + $0x2b] sm:$0xff]  ;;  %v9469_v46 = vld [vmem:[%s11918_s25 + $0x33] sm:$0xff]  ;;  %v9470_v48 = vld [vmem:[%s11918_s25 + $0x3b] sm:$0xff] }
  0x2d   : >> { %10712 = vmatmul.mubr.msk.f32.vlgmr.msra.gmra.mxu1 %vm414_vm2, %v395_v16  ;;  %10726 = vmatmul.mubr.msk.f32.vlgmr.msra.gmra.mxu0 %vm414_vm2, %v9446_v17  ;;  %v12063_v49 = vld [vmem:[%s11918_s25 + $0x3c] sm:$0xff]  ;;  %v9505_v54 = vld [vmem:[%s11918_s25 + $0x48] sm:$0xff]  ;;  %v9506_v56 = vld [vmem:[%s11918_s25 + $0x50] sm:$0xff] }
  0x2e   : >> { %10738 = vmatpush3.msk.msra.mxu1 %vm439_vm1, %v841_v10  ;;  %10752 = vmatpush3.msk.msra.mxu0 %vm439_vm1, %v992_v11  ;;  %v1749_v50 = vld [vmem:[%s13698_s1 + $0x1b] sm:$0x7]  ;;  %v1901_v51 = vld [vmem:[%s13698_s1 + $0x1e] sm:$0x7]  ;;  %v12087_v53 = vld [vmem:[%s11918_s25 + $0x41] sm:$0xff] }
  0x2f   : >> { %10714 = vmatprep.mubr.msk.f32.mxu1 %vm414_vm2, %v396_v18  ;;  %10728 = vmatprep.mubr.msk.f32.mxu0 %vm414_vm2, %v9447_v19  ;;  %v9504_v52 = vld [vmem:[%s11918_s25 + $0x40] sm:$0xff]  ;;  %v12099_v55 = vld [vmem:[%s11918_s25 + $0x49] sm:$0xff]  ;;  %v12103_v57 = vld [vmem:[%s11918_s25 + $0x51] sm:$0xff] }
  0x30   : >> { %10765 = vmatprep.subr.msk.mxu1 %vm439_vm1, %v1145_v20  ;;  %10779 = vmatprep.subr.msk.mxu0 %vm439_vm1, %v1296_v21  ;;  %v9507_v58 = vld [vmem:[%s11918_s25 + $0x58] sm:$0xff]  ;;  %v2052_v60 = vld [vmem:[%s13698_s1 + $0x21] sm:$0x7]  ;;  %v2203_v61 = vld [vmem:[%s13698_s1 + $0x24] sm:$0x7] }
  0x31   : >> { %10715 = vmatmul.mubr.msk.f32.gmra.mxu1 %vm414_vm2, %v397_v22  ;;  %10729 = vmatmul.mubr.msk.f32.gmra.mxu0 %vm414_vm2, %v9448_v23  ;;  %v12113_v59 = vld [vmem:[%s11918_s25 + $0x59] sm:$0xff]  ;;  %v9542_v62 = vld [vmem:[%s11918_s25 + $0x42] sm:$0xff]  ;;  %v9543_v1 = vld [vmem:[%s11918_s25 + $0x4a] sm:$0xff] }
  0x32   : >> { %10717 = vmatprep.mubr.msk.f32.mxu1 %vm414_vm2, %v398_v24  ;;  %10731 = vmatprep.mubr.msk.f32.mxu0 %vm414_vm2, %v11984_v25  ;;  %v12137_v63 = vld [vmem:[%s11918_s25 + $0x43] sm:$0xff]  ;;  %v12149_v2 = vld [vmem:[%s11918_s25 + $0x4b] sm:$0xff]  ;;  %v12153_v4 = vld [vmem:[%s11918_s25 + $0x53] sm:$0xff] }
  0x33   : >> { %v9544_v3 = vld [vmem:[%s11918_s25 + $0x52] sm:$0xff]  ;;  %v12163_v6 = vld [vmem:[%s11918_s25 + $0x5b] sm:$0xff]  ;;  %v2505_v8 = vld [vmem:[%s13698_s1 + $0x2a] sm:$0x7] }
  0x34   : >> { %v12187_v10 = vld [vmem:[%s11918_s25 + $0x60] sm:$0xff]  ;;  %v9581_v11 = vld [vmem:[%s11918_s25 + $0x4c] sm:$0xff]  ;;  %v12213_v16 = vld [vmem:[%s11918_s25 + $0x78] sm:$0xff] }
  0x35   : >> { %10718 = vmatmul.mubr.msk.f32.gmra.mxu1 %vm414_vm2, %v399_v26  ;;  %10732 = vmatmul.mubr.msk.f32.gmra.mxu0 %vm414_vm2, %v11995_v27  ;;  %v12199_v12 = vld [vmem:[%s11918_s25 + $0x68] sm:$0xff]  ;;  %v12203_v14 = vld [vmem:[%s11918_s25 + $0x70] sm:$0xff]  ;;  %v9583_v15 = vld [vmem:[%s11918_s25 + $0x5c] sm:$0xff] }
  0x36   : >> { %10720 = vmatprep.mubr.msk.f32.mxu1 %vm414_vm2, %v400_v28  ;;  %10734 = vmatprep.mubr.msk.f32.mxu0 %vm414_vm2, %v11999_v29  ;;  %v2657_v17 = vld [vmem:[%s13698_s1 + $0x2d] sm:$0x7]  ;;  %v2808_v18 = vld [vmem:[%s13698_s1 + $0x30] sm:$0x7]  ;;  %v9618_v19 = vld [vmem:[%s11918_s25 + $0x61] sm:$0xff] }
  0x37   : >> { %v12249_v22 = vld [vmem:[%s11918_s25 + $0x6a] sm:$0xff] }
  0x38   : >> { %v9620_v23 = vld [vmem:[%s11918_s25 + $0x71] sm:$0xff] }
  0x39   : >> { %10721 = vmatmul.mubr.msk.f32.gmra.mxu1 %vm414_vm2, %v401_v30  ;;  %10735 = vmatmul.mubr.msk.f32.gmra.mxu0 %vm414_vm2, %v12009_v31 }
  0x3a   : >> { %10739 = vmatprep.mubr.msk.f32.mxu1 %vm414_vm2, %v9463_v32  ;;  %10753 = vmatprep.mubr.msk.f32.mxu0 %vm414_vm2, %v9481_v33  ;;  %v12299_v32 = vld [vmem:[%s11918_s25 + $0x6c] sm:$0xff] }
  0x3b   : >> { %v9658_v33 = vld [vmem:[%s11918_s25 + $0x73] sm:$0xff] }
  0x3d   : >> { %10740 = vmatmul.mubr.msk.f32.vlgmr.msra.gmra.mxu1 %vm414_vm2, %v9464_v34  ;;  %10754 = vmatmul.mubr.msk.f32.vlgmr.msra.gmra.mxu0 %vm414_vm2, %v9482_v35  ;;  %v12303_v34 = vld [vmem:[%s11918_s25 + $0x74] sm:$0xff] }
  0x3e   : >> { %10766 = vmatpush3.msk.msra.mxu1 %vm439_vm1, %v1145_v20  ;;  %10780 = vmatpush3.msk.msra.mxu0 %vm439_vm1, %v1296_v21  ;;  %v12237_v20 = vld [vmem:[%s11918_s25 + $0x62] sm:$0xff] }
  0x3f   : >> { %10742 = vmatprep.mubr.msk.f32.mxu1 %vm414_vm2, %v9465_v36  ;;  %10756 = vmatprep.mubr.msk.f32.mxu0 %vm414_vm2, %v9483_v37  ;;  %v9619_v21 = vld [vmem:[%s11918_s25 + $0x69] sm:$0xff]  ;;  %v9659_v35 = vld [vmem:[%s11918_s25 + $0x7b] sm:$0xff] }
  0x40   : >> { %10793 = vmatprep.subr.msk.mxu1 %vm439_vm1, %v1447_v38  ;;  %10807 = vmatprep.subr.msk.mxu0 %vm439_vm1, %v1598_v39  ;;  %v12313_v36 = vld [vmem:[%s11918_s25 + $0x7c] sm:$0xff]  ;;  %v3261_v37 = vld [vmem:[%s13698_s1 + $0x39] sm:$0x7] }
  0x41   : >> { %10743 = vmatmul.mubr.msk.f32.gmra.mxu1 %vm414_vm2, %v9466_v40  ;;  %10757 = vmatmul.mubr.msk.f32.gmra.mxu0 %vm414_vm2, %v9484_v41  ;;  %v12337_v40 = vld [vmem:[%s11918_s25 + $0x81] sm:$0xff] }
  0x42   : >> { %10745 = vmatprep.mubr.msk.f32.mxu1 %vm414_vm2, %v9467_v42  ;;  %10759 = vmatprep.mubr.msk.f32.mxu0 %vm414_vm2, %v12038_v43  ;;  %v9695_v41 = vld [vmem:[%s11918_s25 + $0x88] sm:$0xff] }
  0x45   : >> { %10746 = vmatmul.mubr.msk.f32.gmra.mxu1 %vm414_vm2, %v9468_v44  ;;  %10760 = vmatmul.mubr.msk.f32.gmra.mxu0 %vm414_vm2, %v12049_v45 }
  0x46   : >> { %10748 = vmatprep.mubr.msk.f32.mxu1 %vm414_vm2, %v9469_v46  ;;  %10762 = vmatprep.mubr.msk.f32.mxu0 %vm414_vm2, %v12053_v47 }
  0x49   : >> { %10749 = vmatmul.mubr.msk.f32.gmra.mxu1 %vm414_vm2, %v9470_v48  ;;  %10763 = vmatmul.mubr.msk.f32.gmra.mxu0 %vm414_vm2, %v12063_v49 }
  0x4a   : >> { %10767 = vmatprep.mubr.msk.f32.mxu1 %vm414_vm2, %v398_v24  ;;  %10781 = vmatprep.mubr.msk.f32.mxu0 %vm414_vm2, %v11924_v5  ;;  %v9545_v5 = vld [vmem:[%s11918_s25 + $0x5a] sm:$0xff]  ;;  %v12253_v24 = vld [vmem:[%s11918_s25 + $0x72] sm:$0xff] }
  0x4d   : >> { %10768 = vmatmul.mubr.msk.f32.vlgmr.msra.gmra.mxu1 %vm414_vm2, %v399_v26  ;;  %10782 = vmatmul.mubr.msk.f32.vlgmr.msra.gmra.mxu0 %vm414_vm2, %v11931_v7  ;;  %v2354_v7 = vld [vmem:[%s13698_s1 + $0x27] sm:$0x7]  ;;  %v12263_v26 = vld [vmem:[%s11918_s25 + $0x7a] sm:$0xff] }
  0x4e   : >> { %10794 = vmatpush3.msk.msra.mxu1 %vm439_vm1, %v1447_v38  ;;  %10808 = vmatpush3.msk.msra.mxu0 %vm439_vm1, %v1598_v39  ;;  %v3413_v38 = vld [vmem:[%s13698_s1 + $0x3c] sm:$0x7]  ;;  %v9694_v39 = vld [vmem:[%s11918_s25 + $0x80] sm:$0xff] }
  0x4f   : >> { %10770 = vmatprep.mubr.msk.f32.mxu1 %vm414_vm2, %v400_v28  ;;  %10784 = vmatprep.mubr.msk.f32.mxu0 %vm414_vm2, %v11935_v9  ;;  %v9580_v9 = vld [vmem:[%s11918_s25 + $0x44] sm:$0xff]  ;;  %v3110_v28 = vld [vmem:[%s13698_s1 + $0x36] sm:$0x7] }
  0x50   : >> { %10821 = vmatprep.subr.msk.mxu1 %vm439_vm1, %v1749_v50  ;;  %10835 = vmatprep.subr.msk.mxu0 %vm439_vm1, %v1901_v51 }
  0x51   : >> { %10771 = vmatmul.mubr.msk.f32.gmra.mxu1 %vm414_vm2, %v401_v30  ;;  %10785 = vmatmul.mubr.msk.f32.gmra.mxu0 %vm414_vm2, %v11950_v13  ;;  %v9582_v13 = vld [vmem:[%s11918_s25 + $0x54] sm:$0xff]  ;;  %v12287_v30 = vld [vmem:[%s11918_s25 + $0x64] sm:$0xff] }
  0x52   : >> { %10773 = vmatprep.mubr.msk.f32.mxu1 %vm414_vm2, %v9504_v52  ;;  %10787 = vmatprep.mubr.msk.f32.mxu0 %vm414_vm2, %v12087_v53 }
  0x55   : >> { %10774 = vmatmul.mubr.msk.f32.gmra.mxu1 %vm414_vm2, %v9505_v54  ;;  %10788 = vmatmul.mubr.msk.f32.gmra.mxu0 %vm414_vm2, %v12099_v55 }
  0x56   : >> { %10776 = vmatprep.mubr.msk.f32.mxu1 %vm414_vm2, %v9506_v56  ;;  %10790 = vmatprep.mubr.msk.f32.mxu0 %vm414_vm2, %v12103_v57 }
  0x59   : >> { %10777 = vmatmul.mubr.msk.f32.gmra.mxu1 %vm414_vm2, %v9507_v58  ;;  %10791 = vmatmul.mubr.msk.f32.gmra.mxu0 %vm414_vm2, %v12113_v59 }
  0x5a   : >> { %10795 = vmatprep.mubr.msk.f32.mxu1 %vm414_vm2, %v11984_v25  ;;  %10809 = vmatprep.mubr.msk.f32.mxu0 %vm414_vm2, %v9467_v42  ;;  %v9621_v25 = vld [vmem:[%s11918_s25 + $0x79] sm:$0xff]  ;;  %v12349_v42 = vld [vmem:[%s11918_s25 + $0x89] sm:$0xff] }
  0x5d   : >> { %10796 = vmatmul.mubr.msk.f32.vlgmr.msra.gmra.mxu1 %vm414_vm2, %v11995_v27  ;;  %10810 = vmatmul.mubr.msk.f32.vlgmr.msra.gmra.mxu0 %vm414_vm2, %v9468_v44  ;;  %v2959_v27 = vld [vmem:[%s13698_s1 + $0x33] sm:$0x7] }
  0x5e   : >> { %10822 = vmatpush3.msk.msra.mxu1 %vm439_vm1, %v1749_v50  ;;  %10836 = vmatpush3.msk.msra.mxu0 %vm439_vm1, %v1901_v51  ;;  %v12353_v44 = vld [vmem:[%s11918_s25 + $0x91] sm:$0xff]  ;;  %v12387_v50 = vld [vmem:[%s11918_s25 + $0x83] sm:$0xff] }
  0x5f   : >> { %10798 = vmatprep.mubr.msk.f32.mxu1 %vm414_vm2, %v11999_v29  ;;  %10812 = vmatprep.mubr.msk.f32.mxu0 %vm414_vm2, %v9469_v46  ;;  %v9656_v29 = vld [vmem:[%s11918_s25 + $0x63] sm:$0xff]  ;;  %v12363_v46 = vld [vmem:[%s11918_s25 + $0x99] sm:$0xff] }
  0x60   : >> { %10849 = vmatprep.subr.msk.mxu1 %vm439_vm1, %v2052_v60  ;;  %10863 = vmatprep.subr.msk.mxu0 %vm439_vm1, %v2203_v61  ;;  %v9733_v51 = vld [vmem:[%s11918_s25 + $0x8a] sm:$0xff] }
  0x61   : >> { %10799 = vmatmul.mubr.msk.f32.gmra.mxu1 %vm414_vm2, %v12009_v31  ;;  %10813 = vmatmul.mubr.msk.f32.gmra.mxu0 %vm414_vm2, %v9470_v48  ;;  %v9657_v31 = vld [vmem:[%s11918_s25 + $0x6b] sm:$0xff]  ;;  %v3715_v48 = vld [vmem:[%s13698_s1 + $0x42] sm:$0x7] }
  0x62   : >> { %10801 = vmatprep.mubr.msk.f32.mxu1 %vm414_vm2, %v9542_v62  ;;  %10815 = vmatprep.mubr.msk.f32.mxu0 %vm414_vm2, %v12137_v63 }
  0x65   : >> { %10802 = vmatmul.mubr.msk.f32.gmra.mxu1 %vm414_vm2, %v9543_v1  ;;  %10816 = vmatmul.mubr.msk.f32.gmra.mxu0 %vm414_vm2, %v12149_v2 }
  0x66   : >> { %10804 = vmatprep.mubr.msk.f32.mxu1 %vm414_vm2, %v9544_v3  ;;  %10818 = vmatprep.mubr.msk.f32.mxu0 %vm414_vm2, %v12153_v4 }
  0x69   : >> { %10805 = vmatmul.mubr.msk.f32.gmra.mxu1 %vm414_vm2, %v9545_v5  ;;  %10819 = vmatmul.mubr.msk.f32.gmra.mxu0 %vm414_vm2, %v12163_v6 }
  0x6a   : >> { %10823 = vmatprep.mubr.msk.f32.mxu1 %vm414_vm2, %v12038_v43  ;;  %10837 = vmatprep.mubr.msk.f32.mxu0 %vm414_vm2, %v9504_v52  ;;  %v9696_v43 = vld [vmem:[%s11918_s25 + $0x90] sm:$0xff] }
  0x6b   : >> { %v12399_v52 = vld [vmem:[%s11918_s25 + $0x8b] sm:$0xff] }
  0x6d   : >> { %10824 = vmatmul.mubr.msk.f32.vlgmr.msra.gmra.mxu1 %vm414_vm2, %v12049_v45  ;;  %10838 = vmatmul.mubr.msk.f32.vlgmr.msra.gmra.mxu0 %vm414_vm2, %v9505_v54  ;;  %v9697_v45 = vld [vmem:[%s11918_s25 + $0x98] sm:$0xff] }
  0x6e   : >> { %10850 = vmatpush3.msk.msra.mxu1 %vm439_vm1, %v2052_v60  ;;  %10864 = vmatpush3.msk.msra.mxu0 %vm439_vm1, %v2203_v61  ;;  %v12403_v54 = vld [vmem:[%s11918_s25 + $0x93] sm:$0xff]  ;;  %v9789_v60 = vld [vmem:[%s11918_s25 + $0xa0] sm:$0xff] }
  0x6f   : >> { %10826 = vmatprep.mubr.msk.f32.mxu1 %vm414_vm2, %v12053_v47  ;;  %10840 = vmatprep.mubr.msk.f32.mxu0 %vm414_vm2, %v9506_v56  ;;  %v3564_v47 = vld [vmem:[%s13698_s1 + $0x3f] sm:$0x7]  ;;  %v9771_v61 = vld [vmem:[%s11918_s25 + $0x8c] sm:$0xff] }
  0x70   : >> { %10877 = vmatprep.subr.msk.mxu1 %vm439_vm1, %v2354_v7  ;;  %10891 = vmatprep.subr.msk.mxu0 %vm439_vm1, %v2505_v8  ;;  %v12413_v56 = vld [vmem:[%s11918_s25 + $0x9b] sm:$0xff] }
  0x71   : >> { %10827 = vmatmul.mubr.msk.f32.gmra.mxu1 %vm414_vm2, %v12063_v49  ;;  %10841 = vmatmul.mubr.msk.f32.gmra.mxu0 %vm414_vm2, %v9507_v58  ;;  %v9732_v49 = vld [vmem:[%s11918_s25 + $0x82] sm:$0xff] }
  0x72   : >> { %10829 = vmatprep.mubr.msk.f32.mxu1 %vm414_vm2, %v9580_v9  ;;  %10843 = vmatprep.mubr.msk.f32.mxu0 %vm414_vm2, %v12187_v10  ;;  %v4017_v58 = vld [vmem:[%s13698_s1 + $0x48] sm:$0x7] }
  0x75   : >> { %10830 = vmatmul.mubr.msk.f32.gmra.mxu1 %vm414_vm2, %v9581_v11  ;;  %10844 = vmatmul.mubr.msk.f32.gmra.mxu0 %vm414_vm2, %v12199_v12 }
  0x76   : >> { %10832 = vmatprep.mubr.msk.f32.mxu1 %vm414_vm2, %v9582_v13  ;;  %10846 = vmatprep.mubr.msk.f32.mxu0 %vm414_vm2, %v12203_v14 }
  0x79   : >> { %10833 = vmatmul.mubr.msk.f32.gmra.mxu1 %vm414_vm2, %v9583_v15  ;;  %10847 = vmatmul.mubr.msk.f32.gmra.mxu0 %vm414_vm2, %v12213_v16 }
  0x7a   : >> { %10851 = vmatprep.mubr.msk.f32.mxu1 %vm414_vm2, %v12087_v53  ;;  %10865 = vmatprep.mubr.msk.f32.mxu0 %vm414_vm2, %v9542_v62  ;;  %v9734_v53 = vld [vmem:[%s11918_s25 + $0x92] sm:$0xff]  ;;  %v9790_v62 = vld [vmem:[%s11918_s25 + $0xa8] sm:$0xff] }
  0x7d   : >> { %10852 = vmatmul.mubr.msk.f32.vlgmr.msra.gmra.mxu1 %vm414_vm2, %v12099_v55  ;;  %10866 = vmatmul.mubr.msk.f32.vlgmr.msra.gmra.mxu0 %vm414_vm2, %v9543_v1  ;;  %v9735_v55 = vld [vmem:[%s11918_s25 + $0x9a] sm:$0xff]  ;;  %v9791_v1 = vld [vmem:[%s11918_s25 + $0xb0] sm:$0xff] }
  0x7e   : >> { %10878 = vmatpush3.msk.msra.mxu1 %vm439_vm1, %v2354_v7  ;;  %10892 = vmatpush3.msk.msra.mxu0 %vm439_vm1, %v2505_v8  ;;  %v9828_v7 = vld [vmem:[%s11918_s25 + $0xaa] sm:$0xff] }
  0x7f   : >> { %10854 = vmatprep.mubr.msk.f32.mxu1 %vm414_vm2, %v12103_v57  ;;  %10868 = vmatprep.mubr.msk.f32.mxu0 %vm414_vm2, %v9544_v3  ;;  %v3866_v57 = vld [vmem:[%s13698_s1 + $0x45] sm:$0x7]  ;;  %v9792_v3 = vld [vmem:[%s11918_s25 + $0xb8] sm:$0xff] }
  0x80   : >> { %10905 = vmatprep.subr.msk.mxu1 %vm439_vm1, %v2657_v17  ;;  %10919 = vmatprep.subr.msk.mxu0 %vm439_vm1, %v2808_v18  ;;  %v9810_v8 = vld [vmem:[%s11918_s25 + $0xb1] sm:$0xff] }
  0x81   : >> { %10855 = vmatmul.mubr.msk.f32.gmra.mxu1 %vm414_vm2, %v12113_v59  ;;  %10869 = vmatmul.mubr.msk.f32.gmra.mxu0 %vm414_vm2, %v9545_v5  ;;  %v9770_v59 = vld [vmem:[%s11918_s25 + $0x84] sm:$0xff] }
  0x82   : >> { %10857 = vmatprep.mubr.msk.f32.mxu1 %vm414_vm2, %v9618_v19  ;;  %10871 = vmatprep.mubr.msk.f32.mxu0 %vm414_vm2, %v12237_v20  ;;  %v9827_v5 = vld [vmem:[%s11918_s25 + $0xa2] sm:$0xff] }
  0x85   : >> { %10858 = vmatmul.mubr.msk.f32.gmra.mxu1 %vm414_vm2, %v9619_v21  ;;  %10872 = vmatmul.mubr.msk.f32.gmra.mxu0 %vm414_vm2, %v12249_v22 }
  0x86   : >> { %10860 = vmatprep.mubr.msk.f32.mxu1 %vm414_vm2, %v9620_v23  ;;  %10874 = vmatprep.mubr.msk.f32.mxu0 %vm414_vm2, %v12253_v24 }
  0x89   : >> { %10861 = vmatmul.mubr.msk.f32.gmra.mxu1 %vm414_vm2, %v9621_v25  ;;  %10875 = vmatmul.mubr.msk.f32.gmra.mxu0 %vm414_vm2, %v12263_v26 }
  0x8a   : >> { %10879 = vmatprep.mubr.msk.f32.mxu1 %vm414_vm2, %v12137_v63  ;;  %10893 = vmatprep.mubr.msk.f32.mxu0 %vm414_vm2, %v9580_v9  ;;  %v9772_v63 = vld [vmem:[%s11918_s25 + $0x94] sm:$0xff] }
  0x8b   : >> { %v9829_v9 = vld [vmem:[%s11918_s25 + $0xb2] sm:$0xff] }
  0x8d   : >> { %10880 = vmatmul.mubr.msk.f32.vlgmr.msra.gmra.mxu1 %vm414_vm2, %v12149_v2  ;;  %10894 = vmatmul.mubr.msk.f32.vlgmr.msra.gmra.mxu0 %vm414_vm2, %v9581_v11  ;;  %v9773_v2 = vld [vmem:[%s11918_s25 + $0x9c] sm:$0xff] }
  0x8e   : >> { %10906 = vmatpush3.msk.msra.mxu1 %vm439_vm1, %v2657_v17  ;;  %10920 = vmatpush3.msk.msra.mxu0 %vm439_vm1, %v2808_v18  ;;  %v9830_v11 = vld [vmem:[%s11918_s25 + $0xba] sm:$0xff] }
  0x8f   : >> { %10882 = vmatprep.mubr.msk.f32.mxu1 %vm414_vm2, %v12153_v4  ;;  %10896 = vmatprep.mubr.msk.f32.mxu0 %vm414_vm2, %v9582_v13  ;;  %v9808_v4 = vld [vmem:[%s11918_s25 + $0xa1] sm:$0xff]  ;;  %v9867_v17 = vld [vmem:[%s11918_s25 + $0xb4] sm:$0xff] }
  0x90   : >> { %10933 = vmatprep.subr.msk.mxu1 %vm439_vm1, %v2959_v27  ;;  %10947 = vmatprep.subr.msk.mxu0 %vm439_vm1, %v3110_v28  ;;  %v9865_v13 = vld [vmem:[%s11918_s25 + $0xa4] sm:$0xff] }
  0x91   : >> { %10883 = vmatmul.mubr.msk.f32.gmra.mxu1 %vm414_vm2, %v12163_v6  ;;  %10897 = vmatmul.mubr.msk.f32.gmra.mxu0 %vm414_vm2, %v9583_v15  ;;  %v9809_v6 = vld [vmem:[%s11918_s25 + $0xa9] sm:$0xff] }
  0x92   : >> { %10885 = vmatprep.mubr.msk.f32.mxu1 %vm414_vm2, %v9656_v29  ;;  %10899 = vmatprep.mubr.msk.f32.mxu0 %vm414_vm2, %v12287_v30  ;;  %v9866_v15 = vld [vmem:[%s11918_s25 + $0xac] sm:$0xff] }
  0x95   : >> { %10886 = vmatmul.mubr.msk.f32.gmra.mxu1 %vm414_vm2, %v9657_v31  ;;  %10900 = vmatmul.mubr.msk.f32.gmra.mxu0 %vm414_vm2, %v12299_v32 }
  0x96   : >> { %10888 = vmatprep.mubr.msk.f32.mxu1 %vm414_vm2, %v9658_v33  ;;  %10902 = vmatprep.mubr.msk.f32.mxu0 %vm414_vm2, %v12303_v34 }
  0x99   : >> { %10889 = vmatmul.mubr.msk.f32.gmra.mxu1 %vm414_vm2, %v9659_v35  ;;  %10903 = vmatmul.mubr.msk.f32.gmra.mxu0 %vm414_vm2, %v12313_v36 }
  0x9a   : >> { %10907 = vmatprep.mubr.msk.f32.mxu1 %vm414_vm2, %v12187_v10  ;;  %10921 = vmatprep.mubr.msk.f32.mxu0 %vm414_vm2, %v9618_v19  ;;  %v9811_v10 = vld [vmem:[%s11918_s25 + $0xb9] sm:$0xff] }
  0x9d   : >> { %10908 = vmatmul.mubr.msk.f32.vlgmr.msra.gmra.mxu1 %vm414_vm2, %v12199_v12  ;;  %10922 = vmatmul.mubr.msk.f32.vlgmr.msra.gmra.mxu0 %vm414_vm2, %v9619_v21  ;;  %v9846_v12 = vld [vmem:[%s11918_s25 + $0xa3] sm:$0xff] }
  0x9e   : >> { %10934 = vmatpush3.msk.msra.mxu1 %vm439_vm1, %v2959_v27  ;;  %10948 = vmatpush3.msk.msra.mxu0 %vm439_vm1, %v3110_v28  ;;  %v9868_v21 = vld [vmem:[%s11918_s25 + $0xbc] sm:$0xff] }
  0x9f   : >> { %10910 = vmatprep.mubr.msk.f32.mxu1 %vm414_vm2, %v12203_v14  ;;  %10924 = vmatprep.mubr.msk.f32.mxu0 %vm414_vm2, %v9620_v23  ;;  %v9847_v14 = vld [vmem:[%s11918_s25 + $0xab] sm:$0xff] }
  0xa0   : >> { %10961 = vmatprep.subr.msk.mxu1 %vm439_vm1, %v3261_v37  ;;  %10975 = vmatprep.subr.msk.mxu0 %vm439_vm1, %v3413_v38 }
  0xa1   : >> { %10911 = vmatmul.mubr.msk.f32.gmra.mxu1 %vm414_vm2, %v12213_v16  ;;  %10925 = vmatmul.mubr.msk.f32.gmra.mxu0 %vm414_vm2, %v9621_v25  ;;  %v9848_v16 = vld [vmem:[%s11918_s25 + $0xb3] sm:$0xff] }
  0xa2   : >> { %10913 = vmatprep.mubr.msk.f32.mxu1 %vm414_vm2, %v9694_v39  ;;  %10927 = vmatprep.mubr.msk.f32.mxu0 %vm414_vm2, %v12337_v40 }
  0xa5   : >> { %10914 = vmatmul.mubr.msk.f32.gmra.mxu1 %vm414_vm2, %v9695_v41  ;;  %10928 = vmatmul.mubr.msk.f32.gmra.mxu0 %vm414_vm2, %v12349_v42 }
  0xa6   : >> { %10916 = vmatprep.mubr.msk.f32.mxu1 %vm414_vm2, %v9696_v43  ;;  %10930 = vmatprep.mubr.msk.f32.mxu0 %vm414_vm2, %v12353_v44 }
  0xa9   : >> { %10917 = vmatmul.mubr.msk.f32.gmra.mxu1 %vm414_vm2, %v9697_v45  ;;  %10931 = vmatmul.mubr.msk.f32.gmra.mxu0 %vm414_vm2, %v12363_v46 }
  0xaa   : >> { %10935 = vmatprep.mubr.msk.f32.mxu1 %vm414_vm2, %v12237_v20  ;;  %10949 = vmatprep.mubr.msk.f32.mxu0 %vm414_vm2, %v9656_v29  ;;  %v9849_v20 = vld [vmem:[%s11918_s25 + $0xbb] sm:$0xff] }
  0xad   : >> { %10936 = vmatmul.mubr.msk.f32.vlgmr.msra.gmra.mxu1 %vm414_vm2, %v12249_v22  ;;  %10950 = vmatmul.mubr.msk.f32.vlgmr.msra.gmra.mxu0 %vm414_vm2, %v9657_v31 }
  0xae   : >> { %10962 = vmatpush3.msk.msra.mxu1 %vm439_vm1, %v3261_v37  ;;  %10976 = vmatpush3.msk.msra.mxu0 %vm439_vm1, %v3413_v38 }
  0xaf   : >> { %10938 = vmatprep.mubr.msk.f32.mxu1 %vm414_vm2, %v12253_v24  ;;  %10952 = vmatprep.mubr.msk.f32.mxu0 %vm414_vm2, %v9658_v33 }
  0xb0   : >> { %10989 = vmatprep.subr.msk.mxu1 %vm439_vm1, %v3564_v47  ;;  %11003 = vmatprep.subr.msk.mxu0 %vm439_vm1, %v3715_v48 }
  0xb1   : >> { %10939 = vmatmul.mubr.msk.f32.gmra.mxu1 %vm414_vm2, %v12263_v26  ;;  %10953 = vmatmul.mubr.msk.f32.gmra.mxu0 %vm414_vm2, %v9659_v35 }
  0xb2   : >> { %10941 = vmatprep.mubr.msk.f32.mxu1 %vm414_vm2, %v9732_v49  ;;  %10955 = vmatprep.mubr.msk.f32.mxu0 %vm414_vm2, %v12387_v50 }
  0xb5   : >> { %10942 = vmatmul.mubr.msk.f32.gmra.mxu1 %vm414_vm2, %v9733_v51  ;;  %10956 = vmatmul.mubr.msk.f32.gmra.mxu0 %vm414_vm2, %v12399_v52 }
  0xb6   : >> { %10944 = vmatprep.mubr.msk.f32.mxu1 %vm414_vm2, %v9734_v53  ;;  %10958 = vmatprep.mubr.msk.f32.mxu0 %vm414_vm2, %v12403_v54 }
  0xb9   : >> { %10945 = vmatmul.mubr.msk.f32.gmra.mxu1 %vm414_vm2, %v9735_v55  ;;  %10959 = vmatmul.mubr.msk.f32.gmra.mxu0 %vm414_vm2, %v12413_v56 }
  0xba   : >> { %10963 = vmatprep.mubr.msk.f32.mxu1 %vm414_vm2, %v12287_v30  ;;  %10977 = vmatprep.mubr.msk.f32.mxu0 %vm414_vm2, %v9694_v39 }
  0xbd   : >> { %10964 = vmatmul.mubr.msk.f32.vlgmr.msra.gmra.mxu1 %vm414_vm2, %v12299_v32  ;;  %10978 = vmatmul.mubr.msk.f32.vlgmr.msra.gmra.mxu0 %vm414_vm2, %v9695_v41 }
  0xbe   : >> { %10990 = vmatpush3.msk.msra.mxu1 %vm439_vm1, %v3564_v47  ;;  %11004 = vmatpush3.msk.msra.mxu0 %vm439_vm1, %v3715_v48 }
  0xbf   : >> { %10966 = vmatprep.mubr.msk.f32.mxu1 %vm414_vm2, %v12303_v34  ;;  %10980 = vmatprep.mubr.msk.f32.mxu0 %vm414_vm2, %v9696_v43 }
  0xc0   : >> { %11017 = vmatprep.subr.msk.mxu1 %vm439_vm1, %v3866_v57  ;;  %11031 = vmatprep.subr.msk.mxu0 %vm439_vm1, %v4017_v58 }
  0xc1   : >> { %10967 = vmatmul.mubr.msk.f32.gmra.mxu1 %vm414_vm2, %v12313_v36  ;;  %10981 = vmatmul.mubr.msk.f32.gmra.mxu0 %vm414_vm2, %v9697_v45 }
  0xc2   : >> { %10969 = vmatprep.mubr.msk.f32.mxu1 %vm414_vm2, %v9770_v59  ;;  %10983 = vmatprep.mubr.msk.f32.mxu0 %vm414_vm2, %v9789_v60 }
  0xc5   : >> { %10970 = vmatmul.mubr.msk.f32.gmra.mxu1 %vm414_vm2, %v9771_v61  ;;  %10984 = vmatmul.mubr.msk.f32.gmra.mxu0 %vm414_vm2, %v9790_v62 }
  0xc6   : >> { %10972 = vmatprep.mubr.msk.f32.mxu1 %vm414_vm2, %v9772_v63  ;;  %10986 = vmatprep.mubr.msk.f32.mxu0 %vm414_vm2, %v9791_v1 }
  0xc9   : >> { %10973 = vmatmul.mubr.msk.f32.gmra.mxu1 %vm414_vm2, %v9773_v2  ;;  %10987 = vmatmul.mubr.msk.f32.gmra.mxu0 %vm414_vm2, %v9792_v3 }
  0xca   : >> { %10991 = vmatprep.mubr.msk.f32.mxu1 %vm414_vm2, %v12337_v40  ;;  %11005 = vmatprep.mubr.msk.f32.mxu0 %vm414_vm2, %v9732_v49 }
  0xcd   : >> { %10992 = vmatmul.mubr.msk.f32.vlgmr.msra.gmra.mxu1 %vm414_vm2, %v12349_v42  ;;  %11006 = vmatmul.mubr.msk.f32.vlgmr.msra.gmra.mxu0 %vm414_vm2, %v9733_v51 }
  0xce   : >> { %11018 = vmatpush3.msk.msra.mxu1 %vm439_vm1, %v3866_v57  ;;  %11032 = vmatpush3.msk.msra.mxu0 %vm439_vm1, %v4017_v58 }
  0xcf   : >> { %10994 = vmatprep.mubr.msk.f32.mxu1 %vm414_vm2, %v12353_v44  ;;  %11008 = vmatprep.mubr.msk.f32.mxu0 %vm414_vm2, %v9734_v53 }
  0xd1   : >> { %10995 = vmatmul.mubr.msk.f32.gmra.mxu1 %vm414_vm2, %v12363_v46  ;;  %11009 = vmatmul.mubr.msk.f32.gmra.mxu0 %vm414_vm2, %v9735_v55 }
  0xd2   : >> { %10997 = vmatprep.mubr.msk.f32.mxu1 %vm414_vm2, %v9808_v4  ;;  %11011 = vmatprep.mubr.msk.f32.mxu0 %vm414_vm2, %v9827_v5 }
  0xd5   : >> { %10998 = vmatmul.mubr.msk.f32.gmra.mxu1 %vm414_vm2, %v9809_v6  ;;  %11012 = vmatmul.mubr.msk.f32.gmra.mxu0 %vm414_vm2, %v9828_v7 }
  0xd6   : >> { %11000 = vmatprep.mubr.msk.f32.mxu1 %vm414_vm2, %v9810_v8  ;;  %11014 = vmatprep.mubr.msk.f32.mxu0 %vm414_vm2, %v9829_v9 }
  0xd9   : >> { %11001 = vmatmul.mubr.msk.f32.gmra.mxu1 %vm414_vm2, %v9811_v10  ;;  %11015 = vmatmul.mubr.msk.f32.gmra.mxu0 %vm414_vm2, %v9830_v11 }
  0xda   : >> { %11019 = vmatprep.mubr.msk.f32.mxu1 %vm414_vm2, %v12387_v50  ;;  %11033 = vmatprep.mubr.msk.f32.mxu0 %vm414_vm2, %v9770_v59 }
  0xdd   : >> { %11020 = vmatmul.mubr.msk.f32.vlgmr.msra.gmra.mxu1 %vm414_vm2, %v12399_v52  ;;  %11034 = vmatmul.mubr.msk.f32.vlgmr.msra.gmra.mxu0 %vm414_vm2, %v9771_v61 }
  0xde   : >> { %11022 = vmatprep.mubr.msk.f32.mxu1 %vm414_vm2, %v12403_v54  ;;  %11036 = vmatprep.mubr.msk.f32.mxu0 %vm414_vm2, %v9772_v63 }
  0xe1   : >> { %11023 = vmatmul.mubr.msk.f32.gmra.mxu1 %vm414_vm2, %v12413_v56  ;;  %11037 = vmatmul.mubr.msk.f32.gmra.mxu0 %vm414_vm2, %v9773_v2 }
  0xe2   : >> { %11025 = vmatprep.mubr.msk.f32.mxu1 %vm414_vm2, %v9846_v12  ;;  %11039 = vmatprep.mubr.msk.f32.mxu0 %vm414_vm2, %v9865_v13 }
  0xe5   : >> { %v10699_v18 = vpop.f32.mrf.mxu0  ;;  %v10705_v19 = vpop.f32.mrf.mxu1  ;;  %11026 = vmatmul.mubr.msk.f32.gmra.mxu1 %vm414_vm2, %v9847_v14  ;;  %11040 = vmatmul.mubr.msk.f32.gmra.mxu0 %vm414_vm2, %v9866_v15 }
  0xe6   : >> { %11028 = vmatprep.mubr.msk.f32.mxu1 %vm414_vm2, %v9848_v16  ;;  %11042 = vmatprep.mubr.msk.f32.mxu0 %vm414_vm2, %v9867_v17 }
  0xe7   : >> { %v509_v22 = vpop.f32.mrf.mxu0  ;;  %v529_v23 = vpop.f32.mrf.mxu1 }
  0xe9   : >> { %v10702_v24 = vpop.f32.mrf.mxu0  ;;  %v10708_v25 = vpop.f32.mrf.mxu1  ;;  %11029 = vmatmul.mubr.msk.f32.gmra.mxu1 %vm414_vm2, %v9849_v20  ;;  %11043 = vmatmul.mubr.msk.f32.gmra.mxu0 %vm414_vm2, %v9868_v21 }
  0xeb   : >> { %v519_v26 = vpop.f32.mrf.mxu0  ;;  %v539_v27 = vpop.f32.mrf.mxu1 }
  0xed   : >> { %v10713_v28 = vpop.f32.mrf.mxu1  ;;  %v10727_v29 = vpop.f32.mrf.mxu0 }
  0xee   : >> { %v647_v30 = vadd.f32 %v10713_v28, %v10699_v18 }
  0xef   : >> { %v641_v31 = vpop.f32.mrf.mxu1  ;;  %v784_v32 = vpop.f32.mrf.mxu0 }
  0xf0   : >> { %v824_v33 = vadd.f32 %v10727_v29, %v647_v30  ;;  %v642_v34 = vadd.f32 %v641_v31, %v509_v22 }
  0xf1   : >> { %v10716_v35 = vpop.f32.mrf.mxu1  ;;  %v10730_v36 = vpop.f32.mrf.mxu0 }
  0xf2   : >> { %v823_v37 = vadd.f32 %v784_v32, %v642_v34  ;;  %v657_v38 = vadd.f32 %v10716_v35, %v10702_v24 }
  0xf3   : >> { %v651_v39 = vpop.f32.mrf.mxu1  ;;  %v794_v40 = vpop.f32.mrf.mxu0 }
  0xf4   : >> { %v826_v41 = vadd.f32 %v10730_v36, %v657_v38  ;;  %v652_v42 = vadd.f32 %v651_v39, %v519_v26 }
  0xf5   : >> { %v10719_v43 = vpop.f32.mrf.mxu1  ;;  %v10733_v44 = vpop.f32.mrf.mxu0 }
  0xf6   : >> { %v825_v45 = vadd.f32 %v794_v40, %v652_v42  ;;  %v667_v46 = vadd.f32 %v10719_v43, %v10705_v19 }
  0xf7   : >> { %v661_v47 = vpop.f32.mrf.mxu1  ;;  %v804_v48 = vpop.f32.mrf.mxu0 }
  0xf8   : >> { %v828_v49 = vadd.f32 %v10733_v44, %v667_v46  ;;  %v662_v50 = vadd.f32 %v661_v47, %v529_v23 }
  0xf9   : >> { %v10722_v51 = vpop.f32.mrf.mxu1  ;;  %v10736_v52 = vpop.f32.mrf.mxu0 }
  0xfa   : >> { %v827_v53 = vadd.f32 %v804_v48, %v662_v50  ;;  %v677_v54 = vadd.f32 %v10722_v51, %v10708_v25 }
  0xfb   : >> { %v671_v55 = vpop.f32.mrf.mxu1  ;;  %v814_v56 = vpop.f32.mrf.mxu0 }
  0xfc   : >> { %v830_v57 = vadd.f32 %v10736_v52, %v677_v54  ;;  %v672_v58 = vadd.f32 %v671_v55, %v539_v27 }
  0xfd   : >> { %v10741_v59 = vpop.f32.mrf.mxu1  ;;  %v10755_v60 = vpop.f32.mrf.mxu0 }
  0xfe   : >> { %v829_v61 = vadd.f32 %v814_v56, %v672_v58  ;;  %v975_v62 = vadd.f32 %v10741_v59, %v824_v33 }
  0xff   : >> { %v935_v63 = vpop.f32.mrf.mxu1  ;;  %v1086_v1 = vpop.f32.mrf.mxu0 }
 0x100   : >> { %v1126_v2 = vadd.f32 %v10755_v60, %v975_v62  ;;  %v974_v3 = vadd.f32 %v935_v63, %v823_v37 }
 0x101   : >> { %v10744_v4 = vpop.f32.mrf.mxu1  ;;  %v10758_v5 = vpop.f32.mrf.mxu0 }
 0x102   : >> { %v1125_v6 = vadd.f32 %v1086_v1, %v974_v3  ;;  %v977_v7 = vadd.f32 %v10744_v4, %v826_v41 }
 0x103   : >> { %v945_v8 = vpop.f32.mrf.mxu1  ;;  %v1096_v9 = vpop.f32.mrf.mxu0 }
 0x104   : >> { %v1128_v10 = vadd.f32 %v10758_v5, %v977_v7  ;;  %v976_v11 = vadd.f32 %v945_v8, %v825_v45 }
 0x105   : >> { %v10747_v12 = vpop.f32.mrf.mxu1  ;;  %v10761_v13 = vpop.f32.mrf.mxu0 }
 0x106   : >> { %v1127_v14 = vadd.f32 %v1096_v9, %v976_v11  ;;  %v979_v15 = vadd.f32 %v10747_v12, %v828_v49 }
 0x107   : >> { %v955_v16 = vpop.f32.mrf.mxu1  ;;  %v1106_v17 = vpop.f32.mrf.mxu0 }
 0x108   : >> { %v1130_v18 = vadd.f32 %v10761_v13, %v979_v15  ;;  %v978_v19 = vadd.f32 %v955_v16, %v827_v53 }
 0x109   : >> { %v10750_v20 = vpop.f32.mrf.mxu1  ;;  %v10764_v21 = vpop.f32.mrf.mxu0 }
 0x10a   : >> { %v1129_v22 = vadd.f32 %v1106_v17, %v978_v19  ;;  %v981_v23 = vadd.f32 %v10750_v20, %v830_v57 }
 0x10b   : >> { %v965_v24 = vpop.f32.mrf.mxu1  ;;  %v1116_v25 = vpop.f32.mrf.mxu0 }
 0x10c   : >> { %v1132_v26 = vadd.f32 %v10764_v21, %v981_v23  ;;  %v980_v27 = vadd.f32 %v965_v24, %v829_v61 }
 0x10d   : >> { %v10769_v28 = vpop.f32.mrf.mxu1  ;;  %v10783_v29 = vpop.f32.mrf.mxu0 }
 0x10e   : >> { %v1131_v30 = vadd.f32 %v1116_v25, %v980_v27  ;;  %v1279_v31 = vadd.f32 %v10769_v28, %v1126_v2 }
 0x10f   : >> { %v1239_v32 = vpop.f32.mrf.mxu1  ;;  %v1390_v33 = vpop.f32.mrf.mxu0 }
 0x110   : >> { %v1430_v34 = vadd.f32 %v10783_v29, %v1279_v31  ;;  %v1278_v35 = vadd.f32 %v1239_v32, %v1125_v6 }
 0x111   : >> { %v10772_v36 = vpop.f32.mrf.mxu1  ;;  %v10786_v37 = vpop.f32.mrf.mxu0 }
 0x112   : >> { %v1429_v38 = vadd.f32 %v1390_v33, %v1278_v35  ;;  %v1281_v39 = vadd.f32 %v10772_v36, %v1128_v10 }
 0x113   : >> { %v1249_v40 = vpop.f32.mrf.mxu1  ;;  %v1400_v41 = vpop.f32.mrf.mxu0 }
 0x114   : >> { %v1432_v42 = vadd.f32 %v10786_v37, %v1281_v39  ;;  %v1280_v43 = vadd.f32 %v1249_v40, %v1127_v14 }
 0x115   : >> { %v10775_v44 = vpop.f32.mrf.mxu1  ;;  %v10789_v45 = vpop.f32.mrf.mxu0 }
 0x116   : >> { %v1431_v46 = vadd.f32 %v1400_v41, %v1280_v43  ;;  %v1283_v47 = vadd.f32 %v10775_v44, %v1130_v18 }
 0x117   : >> { %v1259_v48 = vpop.f32.mrf.mxu1  ;;  %v1410_v49 = vpop.f32.mrf.mxu0 }
 0x118   : >> { %v1434_v50 = vadd.f32 %v10789_v45, %v1283_v47  ;;  %v1282_v51 = vadd.f32 %v1259_v48, %v1129_v22 }
 0x119   : >> { %v10778_v52 = vpop.f32.mrf.mxu1  ;;  %v10792_v53 = vpop.f32.mrf.mxu0 }
 0x11a   : >> { %v1433_v54 = vadd.f32 %v1410_v49, %v1282_v51  ;;  %v1285_v55 = vadd.f32 %v10778_v52, %v1132_v26 }
 0x11b   : >> { %v1269_v56 = vpop.f32.mrf.mxu1  ;;  %v1420_v57 = vpop.f32.mrf.mxu0 }
 0x11c   : >> { %v1436_v58 = vadd.f32 %v10792_v53, %v1285_v55  ;;  %v1284_v59 = vadd.f32 %v1269_v56, %v1131_v30 }
 0x11d   : >> { %v10797_v60 = vpop.f32.mrf.mxu1  ;;  %v10811_v61 = vpop.f32.mrf.mxu0 }
 0x11e   : >> { %v1435_v62 = vadd.f32 %v1420_v57, %v1284_v59  ;;  %v1581_v63 = vadd.f32 %v10797_v60, %v1430_v34 }
 0x11f   : >> { %v1541_v1 = vpop.f32.mrf.mxu1  ;;  %v1692_v2 = vpop.f32.mrf.mxu0 }
 0x120   : >> { %v1732_v3 = vadd.f32 %v10811_v61, %v1581_v63  ;;  %v1580_v4 = vadd.f32 %v1541_v1, %v1429_v38 }
 0x121   : >> { %v10800_v5 = vpop.f32.mrf.mxu1  ;;  %v10814_v6 = vpop.f32.mrf.mxu0 }
 0x122   : >> { %v1731_v7 = vadd.f32 %v1692_v2, %v1580_v4  ;;  %v1583_v8 = vadd.f32 %v10800_v5, %v1432_v42 }
 0x123   : >> { %v1551_v9 = vpop.f32.mrf.mxu1  ;;  %v1702_v10 = vpop.f32.mrf.mxu0 }
 0x124   : >> { %v1734_v11 = vadd.f32 %v10814_v6, %v1583_v8  ;;  %v1582_v12 = vadd.f32 %v1551_v9, %v1431_v46 }
 0x125   : >> { %v10803_v13 = vpop.f32.mrf.mxu1  ;;  %v10817_v14 = vpop.f32.mrf.mxu0 }
 0x126   : >> { %v1733_v15 = vadd.f32 %v1702_v10, %v1582_v12  ;;  %v1585_v16 = vadd.f32 %v10803_v13, %v1434_v50 }
 0x127   : >> { %v1561_v17 = vpop.f32.mrf.mxu1  ;;  %v1712_v18 = vpop.f32.mrf.mxu0 }
 0x128   : >> { %v1736_v19 = vadd.f32 %v10817_v14, %v1585_v16  ;;  %v1584_v20 = vadd.f32 %v1561_v17, %v1433_v54 }
 0x129   : >> { %v10806_v21 = vpop.f32.mrf.mxu1  ;;  %v10820_v22 = vpop.f32.mrf.mxu0 }
 0x12a   : >> { %v1735_v23 = vadd.f32 %v1712_v18, %v1584_v20  ;;  %v1587_v24 = vadd.f32 %v10806_v21, %v1436_v58 }
 0x12b   : >> { %v1571_v25 = vpop.f32.mrf.mxu1  ;;  %v1722_v26 = vpop.f32.mrf.mxu0 }
 0x12c   : >> { %v1738_v27 = vadd.f32 %v10820_v22, %v1587_v24  ;;  %v1586_v28 = vadd.f32 %v1571_v25, %v1435_v62 }
 0x12d   : >> { %v10825_v29 = vpop.f32.mrf.mxu1  ;;  %v10839_v30 = vpop.f32.mrf.mxu0 }
 0x12e   : >> { %v1737_v31 = vadd.f32 %v1722_v26, %v1586_v28  ;;  %v1883_v32 = vadd.f32 %v10825_v29, %v1732_v3 }
 0x12f   : >> { %v1843_v33 = vpop.f32.mrf.mxu1  ;;  %v1995_v34 = vpop.f32.mrf.mxu0 }
 0x130   : >> { %v2035_v35 = vadd.f32 %v10839_v30, %v1883_v32  ;;  %v1882_v36 = vadd.f32 %v1843_v33, %v1731_v7 }
 0x131   : >> { %v10828_v37 = vpop.f32.mrf.mxu1  ;;  %v10842_v38 = vpop.f32.mrf.mxu0 }
 0x132   : >> { %v2034_v39 = vadd.f32 %v1995_v34, %v1882_v36  ;;  %v1885_v40 = vadd.f32 %v10828_v37, %v1734_v11 }
 0x133   : >> { %v1853_v41 = vpop.f32.mrf.mxu1  ;;  %v2005_v42 = vpop.f32.mrf.mxu0 }
 0x134   : >> { %v2037_v43 = vadd.f32 %v10842_v38, %v1885_v40  ;;  %v1884_v44 = vadd.f32 %v1853_v41, %v1733_v15 }
 0x135   : >> { %v10831_v45 = vpop.f32.mrf.mxu1  ;;  %v10845_v46 = vpop.f32.mrf.mxu0 }
 0x136   : >> { %v2036_v47 = vadd.f32 %v2005_v42, %v1884_v44  ;;  %v1887_v48 = vadd.f32 %v10831_v45, %v1736_v19 }
 0x137   : >> { %v1863_v49 = vpop.f32.mrf.mxu1  ;;  %v2015_v50 = vpop.f32.mrf.mxu0 }
 0x138   : >> { %v2039_v51 = vadd.f32 %v10845_v46, %v1887_v48  ;;  %v1886_v52 = vadd.f32 %v1863_v49, %v1735_v23 }
 0x139   : >> { %v10834_v53 = vpop.f32.mrf.mxu1  ;;  %v10848_v54 = vpop.f32.mrf.mxu0 }
 0x13a   : >> { %v2038_v55 = vadd.f32 %v2015_v50, %v1886_v52  ;;  %v1889_v56 = vadd.f32 %v10834_v53, %v1738_v27 }
 0x13b   : >> { %v1873_v57 = vpop.f32.mrf.mxu1  ;;  %v2025_v58 = vpop.f32.mrf.mxu0 }
 0x13c   : >> { %v2041_v59 = vadd.f32 %v10848_v54, %v1889_v56  ;;  %v1888_v60 = vadd.f32 %v1873_v57, %v1737_v31 }
 0x13d   : >> { %v10853_v61 = vpop.f32.mrf.mxu1  ;;  %v10867_v62 = vpop.f32.mrf.mxu0 }
 0x13e   : >> { %v2040_v63 = vadd.f32 %v2025_v58, %v1888_v60  ;;  %v2186_v1 = vadd.f32 %v10853_v61, %v2035_v35 }
 0x13f   : >> { %v2146_v2 = vpop.f32.mrf.mxu1  ;;  %v2297_v3 = vpop.f32.mrf.mxu0 }
 0x140   : >> { %v12514_v4 = vadd.f32 %v10867_v62, %v2186_v1  ;;  %v2185_v5 = vadd.f32 %v2146_v2, %v2034_v39 }
 0x141   : >> { %v10856_v6 = vpop.f32.mrf.mxu1  ;;  %v10870_v7 = vpop.f32.mrf.mxu0 }
 0x142   : >> { %v12516_v8 = vadd.f32 %v2297_v3, %v2185_v5  ;;  %v2188_v9 = vadd.f32 %v10856_v6, %v2037_v43 }
 0x143   : >> { %v2156_v10 = vpop.f32.mrf.mxu1  ;;  %v2307_v11 = vpop.f32.mrf.mxu0 }
 0x144   : >> { %v12518_v12 = vadd.f32 %v10870_v7, %v2188_v9  ;;  %v2187_v13 = vadd.f32 %v2156_v10, %v2036_v47 }
 0x145   : >> { %v10859_v14 = vpop.f32.mrf.mxu1  ;;  %v10873_v15 = vpop.f32.mrf.mxu0 }
 0x146   : >> { %v12520_v16 = vadd.f32 %v2307_v11, %v2187_v13  ;;  %v2190_v17 = vadd.f32 %v10859_v14, %v2039_v51 }
 0x147   : >> { %v2166_v18 = vpop.f32.mrf.mxu1  ;;  %v2317_v19 = vpop.f32.mrf.mxu0 }
 0x148   : >> { %v12522_v20 = vadd.f32 %v10873_v15, %v2190_v17  ;;  %v2189_v21 = vadd.f32 %v2166_v18, %v2038_v55 }
 0x149   : >> { %v10862_v22 = vpop.f32.mrf.mxu1  ;;  %v10876_v23 = vpop.f32.mrf.mxu0 }
 0x14a   : >> { %v12524_v24 = vadd.f32 %v2317_v19, %v2189_v21  ;;  %v2192_v25 = vadd.f32 %v10862_v22, %v2041_v59 }
 0x14b   : >> { %v2176_v26 = vpop.f32.mrf.mxu1  ;;  %v2327_v27 = vpop.f32.mrf.mxu0 }
 0x14c   : >> { %v12526_v28 = vadd.f32 %v10876_v23, %v2192_v25  ;;  %v2191_v29 = vadd.f32 %v2176_v26, %v2040_v63 }
 0x14d   : >> { %v10881_v30 = vpop.f32.mrf.mxu1  ;;  %v10895_v31 = vpop.f32.mrf.mxu0 }
 0x14e   : >> { %v12528_v32 = vadd.f32 %v2327_v27, %v2191_v29  ;;  %v2488_v26 = vadd.f32 %v10881_v30, %v12514_v4 }
 0x14f   : >> { %v2448_v33 = vpop.f32.mrf.mxu1  ;;  %v2599_v34 = vpop.f32.mrf.mxu0 }
 0x150   : >> { %v2487_v0 = vadd.f32 %v2448_v33, %v12516_v8 }
 0x151   : >> { %v10884_v35 = vpop.f32.mrf.mxu1  ;;  %v12530_v36 = vpop.f32.mrf.mxu0 }
 0x153   : >> { %v2458_v37 = vpop.f32.mrf.mxu1  ;;  %v12532_v38 = vpop.f32.mrf.mxu0 }
 0x154   : >> { %v2489_v4 = vadd.f32 %v2458_v37, %v12520_v16 }
 0x155   : >> { %v10887_v39 = vpop.f32.mrf.mxu1  ;;  %v12534_v40 = vpop.f32.mrf.mxu0 }
 0x157   : >> { %v2468_v41 = vpop.f32.mrf.mxu1  ;;  %v12536_v42 = vpop.f32.mrf.mxu0 }
 0x159   : >> { %v12538_v43 = vpop.f32.mrf.mxu1  ;;  %v12540_v44 = vpop.f32.mrf.mxu0 }
 0x15b   : >> { %v12542_v45 = vpop.f32.mrf.mxu1  ;;  %v12544_v46 = vpop.f32.mrf.mxu0 }
 0x15d   : >> { %v10909_v47 = vpop.f32.mrf.mxu1  ;;  %v10923_v48 = vpop.f32.mrf.mxu0 }
 0x15f   : >> { %v2751_v49 = vpop.f32.mrf.mxu1  ;;  %v2902_v50 = vpop.f32.mrf.mxu0 }
 0x161   : >> { %v10912_v51 = vpop.f32.mrf.mxu1  ;;  %v12546_v52 = vpop.f32.mrf.mxu0 }
 0x163   : >> { %v2761_v53 = vpop.f32.mrf.mxu1  ;;  %v12548_v54 = vpop.f32.mrf.mxu0 }
 0x165   : >> { %v10915_v55 = vpop.f32.mrf.mxu1  ;;  %v12550_v56 = vpop.f32.mrf.mxu0 }
 0x167   : >> { %v12552_v57 = vpop.f32.mrf.mxu1  ;;  %v12554_v58 = vpop.f32.mrf.mxu0 }
 0x169   : >> { %v12556_v59 = vpop.f32.mrf.mxu1  ;;  %v12558_v60 = vpop.f32.mrf.mxu0 }
 0x16b   : >> { %v12560_v61 = vpop.f32.mrf.mxu1  ;;  %v12562_v62 = vpop.f32.mrf.mxu0 }
 0x16c   : >> { %13699 = vst [vmem:[#allocation9_spill] sm:$0xff] %v12562_v62  ;;  %v2492_v62 = vadd.f32 %v10887_v39, %v12522_v20  ;;  %v2494_v20 = vadd.f32 %v12538_v43, %v12526_v28 }
 0x16d   : >> { %v10937_v63 = vpop.f32.mrf.mxu1  ;;  %v10951_v1 = vpop.f32.mrf.mxu0 }
 0x16e   : >> { %v2643_v37 = vadd.f32 %v12534_v40, %v2492_v62  ;;  %v2645_v28 = vadd.f32 %v12540_v44, %v2494_v20 }
 0x16f   : >> { %v3053_v2 = vpop.f32.mrf.mxu1  ;;  %v12564_v3 = vpop.f32.mrf.mxu0 }
 0x171   : >> { %v10940_v5 = vpop.f32.mrf.mxu1  ;;  %v12566_v6 = vpop.f32.mrf.mxu0 }
 0x173   : >> { %v12568_v7 = vpop.f32.mrf.mxu1  ;;  %v12570_v9 = vpop.f32.mrf.mxu0 }
 0x175   : >> { %v12572_v10 = vpop.f32.mrf.mxu1  ;;  %v12574_v11 = vpop.f32.mrf.mxu0 }
 0x176   : >> { %13700 = vst [vmem:[#allocation10_spill] sm:$0xff] %v12574_v11 }
 0x177   : >> { %v12576_v13 = vpop.f32.mrf.mxu1  ;;  %v12578_v14 = vpop.f32.mrf.mxu0 }
 0x178   : >> { %13701 = vst [vmem:[#allocation11_spill] sm:$0xff] %v12578_v14 }
 0x179   : >> { %v12580_v15 = vpop.f32.mrf.mxu1  ;;  %v12582_v17 = vpop.f32.mrf.mxu0 }
 0x17a   : >> { %13702 = vst [vmem:[#allocation12_spill] sm:$0xff] %v12580_v15  ;;  %13703 = vst [vmem:[#allocation13_spill] sm:$0xff] %v12582_v17 }
 0x17b   : >> { %v12584_v18 = vpop.f32.mrf.mxu1  ;;  %v12586_v19 = vpop.f32.mrf.mxu0 }
 0x17c   : >> { %13704 = vst [vmem:[#allocation14_spill] sm:$0xff] %v12584_v18  ;;  %13705 = vst [vmem:[#allocation15_spill] sm:$0xff] %v12586_v19  ;;  %v2639_v18 = vadd.f32 %v10895_v31, %v2488_v26  ;;  %v2490_v19 = vadd.f32 %v10884_v35, %v12518_v12  ;;  %v2491_v31 = vadd.f32 %v2468_v41, %v12524_v24 }
 0x17d   : >> { %v10965_v21 = vpop.f32.mrf.mxu1  ;;  %v12588_v22 = vpop.f32.mrf.mxu0 }
 0x17e   : >> { %v2791_v30 = vadd.f32 %v10909_v47, %v2639_v18  ;;  %v2641_v33 = vadd.f32 %v12530_v36, %v2490_v19  ;;  %v2642_v41 = vadd.f32 %v12536_v42, %v2491_v31  ;;  %v2493_v18 = vadd.f32 %v12542_v45, %v12528_v32 }
 0x17f   : >> { %v3355_v23 = vpop.f32.mrf.mxu1  ;;  %v12590_v25 = vpop.f32.mrf.mxu0  ;;  %v2797_v45 = vadd.f32 %v12556_v59, %v2645_v28  ;;  %v13713_v20 = vld [vmem:[#allocation11_spill] sm:$0xff] }
 0x180   : >> { %13706 = vst [vmem:[#allocation16_spill] sm:$0xff] %v12590_v25  ;;  %v2638_v25 = vadd.f32 %v2599_v34, %v2487_v0  ;;  %v2640_v0 = vadd.f32 %v12532_v38, %v2489_v4  ;;  %v2942_v34 = vadd.f32 %v10923_v48, %v2791_v30  ;;  %v2793_v16 = vadd.f32 %v10912_v51, %v2641_v33 }
 0x181   : >> { %v12593_v27 = vpop.f32.mrf.mxu1  ;;  %v12595_v29 = vpop.f32.mrf.mxu0  ;;  %v2795_v38 = vadd.f32 %v10915_v55, %v2643_v37  ;;  %v2794_v43 = vadd.f32 %v12552_v57, %v2642_v41  ;;  %v2644_v42 = vadd.f32 %v12544_v46, %v2493_v18  ;;  %v2948_v59 = vadd.f32 %v12558_v60, %v2797_v45 }
 0x182   : >> { %13707 = vst [vmem:[#allocation17_spill] sm:$0xff] %v12595_v29  ;;  %v3093_v24 = vadd.f32 %v10937_v63, %v2942_v34  ;;  %v2944_v40 = vadd.f32 %v12546_v52, %v2793_v16 }
 0x183   : >> { %v12598_v14 = vpop.f32.mrf.mxu1  ;;  %v12600_v17 = vpop.f32.mrf.mxu0  ;;  %v2946_v32 = vadd.f32 %v12550_v56, %v2795_v38  ;;  %v2945_v57 = vadd.f32 %v12554_v58, %v2794_v43  ;;  %v2796_v26 = vadd.f32 %v12560_v61, %v2644_v42  ;;  %v13709_v61 = vld [vmem:[#allocation9_spill] sm:$0xff]  ;;  %v13718_v42 = vld [vmem:[#allocation15_spill] sm:$0xff] }
 0x184   : >> { %13708 = vst [vmem:[#allocation18_spill] sm:$0xff] %v12600_v17  ;;  %v2790_v17 = vadd.f32 %v2751_v49, %v2638_v25  ;;  %v2792_v49 = vadd.f32 %v2761_v53, %v2640_v0  ;;  %v3244_v53 = vadd.f32 %v10951_v1, %v3093_v24  ;;  %v3095_v63 = vadd.f32 %v10940_v5, %v2944_v40  ;;  %v13711_v0 = vld [vmem:[#allocation12_spill] sm:$0xff]  ;;  %v13716_v40 = vld [vmem:[#allocation13_spill] sm:$0xff] }
 0x185   : >> { %v12603_v15 = vpop.f32.mrf.mxu1  ;;  %v12605_v11 = vpop.f32.mrf.mxu0  ;;  %v3096_v4 = vadd.f32 %v12576_v13, %v2945_v57  ;;  %v2947_v33 = vadd.f32 %v13709_v61, %v2796_v26  ;;  %v3099_v34 = vadd.f32 %v13711_v0, %v2948_v59 }
 0x186   : >> { %v2941_v36 = vadd.f32 %v2902_v50, %v2790_v17  ;;  %v2943_v50 = vadd.f32 %v12548_v54, %v2792_v49  ;;  %v3097_v54 = vadd.f32 %v12572_v10, %v2946_v32  ;;  %v3246_v46 = vadd.f32 %v12566_v6, %v3095_v63  ;;  %v13710_v10 = vld [vmem:[#allocation10_spill] sm:$0xff] }
 0x187   : >> { %v12609_v29 = vpop.f32.mrf.mxu1  ;;  %v12611_v8 = vpop.f32.mrf.mxu0  ;;  %v13712_v16 = vld [vmem:[#allocation16_spill] sm:$0xff] }
 0x188   : >> { %v3092_v62 = vadd.f32 %v3053_v2, %v2941_v36  ;;  %v3094_v44 = vadd.f32 %v12568_v7, %v2943_v50  ;;  %v3395_v2 = vadd.f32 %v10965_v21, %v3244_v53  ;;  %v3397_v58 = vadd.f32 %v12593_v27, %v3246_v46 }
 0x189   : >> { %v12615_v12 = vpop.f32.mrf.mxu1  ;;  %v12617_v35 = vpop.f32.mrf.mxu0  ;;  %v3248_v31 = vadd.f32 %v13710_v10, %v3097_v54  ;;  %v3247_v36 = vadd.f32 %v13713_v20, %v3096_v4  ;;  %v13715_v41 = vld [vmem:[#allocation17_spill] sm:$0xff] }
 0x18a   : >> { %v3243_v52 = vadd.f32 %v12564_v3, %v3092_v62  ;;  %v3245_v7 = vadd.f32 %v12570_v9, %v3094_v44  ;;  %v3547_v21 = vadd.f32 %v12588_v22, %v3395_v2  ;;  %v13714_v9 = vld [vmem:[#allocation14_spill] sm:$0xff]  ;;  %v3549_v18 = vadd.f32 %v13715_v41, %v3397_v58 }
 0x18b   : >> { %v12623_v39 = vpop.f32.mrf.mxu1  ;;  %v12625_v47 = vpop.f32.mrf.mxu0  ;;  %v3098_v49 = vadd.f32 %v13714_v9, %v2947_v33  ;;  %v3399_v22 = vadd.f32 %v12603_v15, %v3248_v31  ;;  %v3250_v62 = vadd.f32 %v13716_v40, %v3099_v34  ;;  %v3398_v28 = vadd.f32 %v12609_v29, %v3247_v36  ;;  %v13717_v53 = vld [vmem:[#allocation18_spill] sm:$0xff] }
 0x18c   : >> { %v3394_v56 = vadd.f32 %v3355_v23, %v3243_v52  ;;  %v3396_v13 = vadd.f32 %v12598_v14, %v3245_v7 }
 0x18d   : >> { %v10993_v48 = vpop.f32.mrf.mxu1  ;;  %v11007_v51 = vpop.f32.mrf.mxu0  ;;  %v3249_v32 = vadd.f32 %v13718_v42, %v3098_v49  ;;  %v3551_v45 = vadd.f32 %v12605_v11, %v3399_v22  ;;  %v3401_v15 = vadd.f32 %v12615_v12, %v3250_v62  ;;  %v3550_v26 = vadd.f32 %v12611_v8, %v3398_v28 }
 0x18e   : >> { %v3546_v60 = vadd.f32 %v13712_v16, %v3394_v56  ;;  %v3698_v37 = vadd.f32 %v10993_v48, %v3547_v21  ;;  %v3548_v14 = vadd.f32 %v13717_v53, %v3396_v13 }
 0x18f   : >> { %v3658_v19 = vpop.f32.mrf.mxu1  ;;  %v3809_v25 = vpop.f32.mrf.mxu0  ;;  %v3400_v29 = vadd.f32 %v12623_v39, %v3249_v32  ;;  %v3553_v12 = vadd.f32 %v12617_v35, %v3401_v15 }
 0x190   : >> { %v3697_v38 = vadd.f32 %v3658_v19, %v3546_v60  ;;  %v3849_v48 = vadd.f32 %v11007_v51, %v3698_v37  ;;  %v9878_v51 = vld [vmem:[%s13680_s2] ss:$0 sm:$0xff] }
 0x191   : >> { %v10996_v55 = vpop.f32.mrf.mxu1  ;;  %v11010_v17 = vpop.f32.mrf.mxu0  ;;  %v3552_v39 = vadd.f32 %v12625_v47, %v3400_v29 }
 0x192   : >> { %v3700_v63 = vadd.f32 %v10996_v55, %v3549_v18  ;;  %v3848_v2 = vadd.f32 %v3809_v25, %v3697_v38 }
 0x193   : >> { %v3668_v1 = vpop.f32.mrf.mxu1  ;;  %v3819_v5 = vpop.f32.mrf.mxu0 }
 0x194   : >> { %v3699_v19 = vadd.f32 %v3668_v1, %v3548_v14  ;;  %v3851_v56 = vadd.f32 %v11010_v17, %v3700_v63 }
 0x195   : >> { %v10999_v30 = vpop.f32.mrf.mxu1  ;;  %v11013_v3 = vpop.f32.mrf.mxu0 }
 0x196   : >> { %v3702_v54 = vadd.f32 %v10999_v30, %v3551_v45  ;;  %v3850_v7 = vadd.f32 %v3819_v5, %v3699_v19 }
 0x197   : >> { %v3678_v6 = vpop.f32.mrf.mxu1  ;;  %v3829_v23 = vpop.f32.mrf.mxu0 }
 0x198   : >> { %v3701_v4 = vadd.f32 %v3678_v6, %v3550_v26  ;;  %v3853_v30 = vadd.f32 %v11013_v3, %v3702_v54 }
 0x199   : >> { %v11002_v27 = vpop.f32.mrf.mxu1  ;;  %v11016_v24 = vpop.f32.mrf.mxu0 }
 0x19a   : >> { %v3704_v61 = vadd.f32 %v11002_v27, %v3553_v12  ;;  %v3852_v16 = vadd.f32 %v3829_v23, %v3701_v4 }
 0x19b   : >> { %v3688_v43 = vpop.f32.mrf.mxu1  ;;  %v3839_v50 = vpop.f32.mrf.mxu0 }
 0x19c   : >> { %v3703_v35 = vadd.f32 %v3688_v43, %v3552_v39  ;;  %v3855_v47 = vadd.f32 %v11016_v24, %v3704_v61 }
 0x19d   : >> { %v11021_v52 = vpop.f32.mrf.mxu1  ;;  %v11035_v44 = vpop.f32.mrf.mxu0 }
 0x19e   : >> { %v4000_v57 = vadd.f32 %v11021_v52, %v3849_v48  ;;  %v3854_v41 = vadd.f32 %v3839_v50, %v3703_v35 }
 0x19f   : >> { %v3960_v55 = vpop.f32.mrf.mxu1  ;;  %v4111_v46 = vpop.f32.mrf.mxu0 }
 0x1a0   : >> { %v4151_v11 = vadd.f32 %v11035_v44, %v4000_v57  ;;  %v3999_v59 = vadd.f32 %v3960_v55, %v3848_v2 }
 0x1a1   : >> { %v11024_v25 = vpop.f32.mrf.mxu1  ;;  %v11038_v1 = vpop.f32.mrf.mxu0 }
 0x1a2   : >> { %v4166_v21 = vadd.f32 %v9878_v51, %v4151_v11  ;;  %v4150_v8 = vadd.f32 %v4111_v46, %v3999_v59  ;;  %v4002_v58 = vadd.f32 %v11024_v25, %v3851_v56 }
 0x1a3   : >> { %v3970_v33 = vpop.f32.mrf.mxu1  ;;  %v4121_v10 = vpop.f32.mrf.mxu0 }
 0x1a4   : >> { %v4174_v31 = vmax.f32 %v4166_v21, 0.0  ;;  %v4165_v17 = vadd.f32 %v9878_v51, %v4150_v8  ;;  %v4153_v0 = vadd.f32 %v11038_v1, %v4002_v58  ;;  %v4001_v34 = vadd.f32 %v3970_v33, %v3850_v7 }
 0x1a5   : >> { %v11027_v6 = vpop.f32.mrf.mxu1  ;;  %v11041_v60 = vpop.f32.mrf.mxu0 }
 0x1a6   : >> { %4183 = vst.msk [vmem:[#allocation2 + $0x8] sm:$0xff] %vm4181_vm3, %v4174_v31  ;;  %v4173_v5 = vmax.f32 %v4165_v17, 0.0  ;;  %v4168_v13 = vadd.f32 %v9878_v51, %v4153_v0  ;;  %v4152_v37 = vadd.f32 %v4121_v10, %v4001_v34  ;;  %v4004_v20 = vadd.f32 %v11027_v6, %v3853_v30 }
 0x1a7   : >> { %v3980_v3 = vpop.f32.mrf.mxu1  ;;  %v4131_v36 = vpop.f32.mrf.mxu0 }
 0x1a8   : >> { %4182 = vst.msk [vmem:[#allocation2] sm:$0xff] %vm4181_vm3, %v4173_v5  ;;  %v4176_v9 = vmax.f32 %v4168_v13, 0.0  ;;  %v4167_v49 = vadd.f32 %v9878_v51, %v4152_v37  ;;  %v4155_v22 = vadd.f32 %v11041_v60, %v4004_v20  ;;  %v4003_v27 = vadd.f32 %v3980_v3, %v3852_v16 }
 0x1a9   : >> { %v11030_v23 = vpop.f32.mrf.mxu1  ;;  %v11044_v18 = vpop.f32.mrf.mxu0 }
 0x1aa   : >> { %4185 = vst.msk [vmem:[#allocation2 + $0x18] sm:$0xff] %vm4181_vm3, %v4176_v9  ;;  %v4175_v38 = vmax.f32 %v4167_v49, 0.0  ;;  %v4170_v40 = vadd.f32 %v9878_v51, %v4155_v22  ;;  %v4154_v62 = vadd.f32 %v4131_v36, %v4003_v27  ;;  %v4006_v28 = vadd.f32 %v11030_v23, %v3855_v47 }
 0x1ab   : >> { %v3990_v43 = vpop.f32.mrf.mxu1  ;;  %v4141_v63 = vpop.f32.mrf.mxu0 }
 0x1ac   : >> { %4184 = vst.msk [vmem:[#allocation2 + $0x10] sm:$0xff] %vm4181_vm3, %v4175_v38  ;;  %v4178_v24 = vmax.f32 %v4170_v40, 0.0  ;;  %v4169_v53 = vadd.f32 %v9878_v51, %v4154_v62  ;;  %v4157_v14 = vadd.f32 %v11044_v18, %v4006_v28  ;;  %v4005_v48 = vadd.f32 %v3990_v43, %v3854_v41 }
 0x1ae   : >> { %4187 = vst.msk [vmem:[#allocation2 + $0x28] sm:$0xff] %vm4181_vm3, %v4178_v24  ;;  %v4177_v50 = vmax.f32 %v4169_v53, 0.0  ;;  %v4172_v42 = vadd.f32 %v9878_v51, %v4157_v14  ;;  %v4156_v32 = vadd.f32 %v4141_v63, %v4005_v48 }
 0x1af   : >> { %v4190_v44 = vld [vmem:[#allocation2] ss:$2 sm:$0xff]  ;;  %v4194_v2 = vld [vmem:[#allocation2 + $0x1] ss:$2 sm:$0xff] }
 0x1b0   : >> { %4186 = vst.msk [vmem:[#allocation2 + $0x20] sm:$0xff] %vm4181_vm3, %v4177_v50  ;;  %v4180_v45 = vmax.f32 %v4172_v42, 0.0  ;;  %v4171_v15 = vadd.f32 %v9878_v51, %v4156_v32  ;;  %v4197_v26 = vmax.f32 %v4190_v44, %v4194_v2 }
 0x1b2   : >> { %4189 = vst.msk [vmem:[#allocation2 + $0x38] sm:$0xff] %vm4181_vm3, %v4180_v45  ;;  %v4179_v52 = vmax.f32 %v4171_v15, 0.0 }
 0x1b3   : >> { %v4192_v54 = vld [vmem:[#allocation2 + $0x10] ss:$2 sm:$0x3f]  ;;  %v4196_v55 = vld [vmem:[#allocation2 + $0x11] ss:$2 sm:$0x3f] }
 0x1b4   : >> { %4188 = vst.msk [vmem:[#allocation2 + $0x30] sm:$0xff] %vm4181_vm3, %v4179_v52  ;;  %v4198_v59 = vmax.f32 %v4192_v54, %v4196_v55 }
 0x1b7   : >> { %v4200_v19 = vld [vmem:[#allocation2 + $0x20] ss:$2 sm:$0xff]  ;;  %v4204_v57 = vld [vmem:[#allocation2 + $0x21] ss:$2 sm:$0xff] }
 0x1b8   : >> { %v4207_v29 = vmax.f32 %v4200_v19, %v4204_v57 }
 0x1ba   : >> { %v4209_v46 = vmax.f32 %v4197_v26, %v4207_v29 }
 0x1bb   : >> { %v4202_v56 = vld [vmem:[#allocation2 + $0x30] ss:$2 sm:$0x3f]  ;;  %v4206_v11 = vld [vmem:[#allocation2 + $0x31] ss:$2 sm:$0x3f] }
 0x1bc   : >> { %4213 = vst.msk [vmem:[%s4212_s12] sm:$0xff] %vm4181_vm3, %v4209_v46  ;;  %v4208_v51 = vmax.f32 %v4202_v56, %v4206_v11  ;;  %390 = sbr.rel (!%p388_p11) target bundleno = 27 (0x1b), region = 175 }
 0x1be   : >> { %v4210_v12 = vmax.f32 %v4198_v59, %v4208_v51 }
 0x1c0   : >> { %4215 = vst.msk [vmem:[%s4212_s12 + $0x8] sm:$0x3f] %vm4214_vm4, %v4210_v12 }
 0x1c1 LB: >> { %v4241_v4 = vld [vmem:[%s13681_s3 + $0x38] sm:$0xff]  ;;  %v4240_v1 = vld [vmem:[%s13681_s3 + $0x30] sm:$0xff]  ;;  %v4239_v21 = vld [vmem:[%s13681_s3 + $0x28] sm:$0xff]  ;;  %s4222_s24 = smul.u32 28, %s11772_s13  ;;  %vm7010_vm5 = vcmask 130048   ;;  %vm7028_vm6 = vcmask 126976   ;;  %s11772_s13 = sphi %s12683_s13, %s4221_s13  }
 0x1c2   : >> { %v4231_v25 = vld [vmem:[%s13681_s3 + $0x18] sm:$0xff]  ;;  %11045 = vmatprep.subr.mxu0 %v4241_v4  ;;  %v4230_v7 = vld [vmem:[%s13681_s3 + $0x10] sm:$0xff]  ;;  %v4229_v8 = vld [vmem:[%s13681_s3 + $0x8] sm:$0xff]  ;;  %s7026_s29 = smul.u32 5, %s11772_s13  ;;  %s4221_s13 = sadd.s32 1, %s11772_s13  }
 0x1c3   : >> { %11059 = vmatprep.subr.mxu1 %v4231_v25  ;;  %11046 = vmatpush3.msra.mxu0 %v4241_v4  ;;  %v4238_v58 = vld [vmem:[%s13681_s3 + $0x20] sm:$0xff]  ;;  %s12713_s0 = scalar_lea.vmem [#allocation4], %s4222_s24  ;;  %v4446_v31 = vld [vmem:[%s13681_s3 + $0x58] sm:$0xff]  ;;  %v4445_v0 = vld [vmem:[%s13681_s3 + $0x50] sm:$0xff]  ;;  %p4218_p12 = scmp.ge.s32.totalorder %s4221_s13, 5  }
 0x1c4   : >> { %11060 = vmatpush3.msra.mxu1 %v4231_v25  ;;  %11047 = vmatprep.subr.mxu0 %v4240_v1  ;;  %v4228_v39 = vld [vmem:[%s13681_s3] sm:$0xff]  ;;  %v4557_v17 = vld [vmem:[%s13681_s3 + $0x78] sm:$0xff]  ;;  %v4556_v34 = vld [vmem:[%s13681_s3 + $0x70] sm:$0xff]  ;;  %s7027_s30 = scalar_lea.vmem [#allocation5], %s7026_s29  ;;  %vm11775_vm7 = vmmov (%p4218_p12), 0   ;;  %vm9065_vm8 = vcmask (%p4218_p12), 1043456  }
 0x1c5   : >> { %11061 = vmatprep.subr.mxu1 %v4230_v7  ;;  %11048 = vmatpush3.msra.mxu0 %v4240_v1  ;;  %v4444_v5 = vld [vmem:[%s13681_s3 + $0x48] sm:$0xff]  ;;  %v4443_v37 = vld [vmem:[%s13681_s3 + $0x40] sm:$0xff]  ;;  %v4668_v49 = vld [vmem:[%s13681_s3 + $0x98] sm:$0xff]  ;;  %vm8974_vm9 = vcmask (%p4218_p12), 982016   ;;  %vm9061_vm10 = vcmask (%p4218_p12), 687104   ;;  %s10144_s14 = sshll.u32 (%p4218_p12), %s11858_s21, 4 }
 0x1c6   : >> { %11062 = vmatpush3.msra.mxu1 %v4230_v7  ;;  %11049 = vmatprep.subr.mxu0 %v4239_v21  ;;  %v4555_v13 = vld [vmem:[%s13681_s3 + $0x68] sm:$0xff]  ;;  %v4554_v20 = vld [vmem:[%s13681_s3 + $0x60] sm:$0xff]  ;;  %v4781_v22 = vld [vmem:[%s13681_s3 + $0xb8] sm:$0xff]  ;;  %s9154_s25 = sshll.u32 (%p4218_p12), %s11896_s16, 4  ;;  %vm9139_vm11 = vcmask (%p4218_p12), 73728   ;;  %s13640_s24 = scalar_lea.hbm (%p4218_p12), %s13689_s11, %s10144_s14  ;;  %s9155_s25 = int_to_ptr.vmem [resolvable:$true] %s9154_s25 }
 0x1c7   : >> { %11063 = vmatprep.subr.mxu1 %v4229_v8  ;;  %v9879_v30 = vld [vmem:[%s12713_s0 + $0x1] sm:$0xff]  ;;  %11050 = vmatpush3.msra.mxu0 %v4239_v21  ;;  %v9880_v33 = vld [vmem:[%s12713_s0 + $0x9] sm:$0xff]  ;;  %v12736_v16 = vld [vmem:[%s12713_s0 + $0x11] sm:$0xff]  ;;  %s13720_s29 = sand.u32 (%p4218_p12), 1, %s11756_s18   ;;  %s11696_s12 = scalar_lea.vmem (%p4218_p12), %s9155_s25, 16 }
 0x1c8   : >> { %11064 = vmatpush3.msra.mxu1 %v4229_v8  ;;  %v4224_v61 = vld [vmem:[%s12713_s0] sm:$0xff]  ;;  %11051 = vmatprep.subr.mxu0 %v4238_v58  ;;  %v4225_v10 = vld [vmem:[%s12713_s0 + $0x8] sm:$0xff]  ;;  %v12739_v35 = vld [vmem:[%s12713_s0 + $0x10] sm:$0xff]  ;;  %p11697_p13 = scmp.ne.s32.totalorder (%p4218_p12), %s9155_s25, %s11696_s12  ;;  %s11776_s21 = smov (%p4218_p12), [#allocation6]  }
 0x1c9   : >> { %11065 = vmatprep.subr.mxu1 %v4228_v39  ;;  %11052 = vmatpush3.msra.mxu0 %v4238_v58  ;;  %v9882_v6 = vld [vmem:[%s12713_s0 + $0x19] sm:$0xf]  ;;  %v9891_v47 = vld [vmem:[%s12713_s0 + $0x2] sm:$0xff]  ;;  %v9892_v36 = vld [vmem:[%s12713_s0 + $0xa] sm:$0xff]  ;;  %s11700_s15 = sshll.u32 (%p4218_p12), %s11776_s21, 4  ;;  %s11701_s15 = int_to_ptr.vmem [resolvable:$false] %s11700_s15 }
 0x1ca   : >> { %11053 = vmatprep.mubr.msk.f32.mxu0 %vm4181_vm3, %v9879_v30  ;;  %11066 = vmatpush3.msra.mxu1 %v4228_v39  ;;  %v4227_v60 = vld [vmem:[%s12713_s0 + $0x18] sm:$0xf]  ;;  %v9899_v3 = vld [vmem:[%s12713_s0 + $0x3] sm:$0xff]  ;;  %v9900_v9 = vld [vmem:[%s12713_s0 + $0xb] sm:$0xff]  ;;  %p11698_p0 = pnand (%p4218_p12), %p11697_p13, %p11875_p5  ;;  %s11702_s1 = scalar_lea.vmem (%p4218_p12), %s11701_s15, 32 }
 0x1cb   : >> { %11067 = vmatprep.mubr.msk.f32.mxu1 %vm4181_vm3, %v4224_v61  ;;  %11054 = vmatmul.mubr.msk.f32.vlgmr.msra.gmra.mxu0 %vm4181_vm3, %v9880_v33  ;;  %v4667_v27 = vld [vmem:[%s13681_s3 + $0x90] sm:$0xff]  ;;  %v9894_v38 = vld [vmem:[%s12713_s0 + $0x1a] sm:$0xf]  ;;  %v4666_v62 = vld [vmem:[%s13681_s3 + $0x88] sm:$0xff]  ;;  %p11703_p2 = scmp.lt.s32.totalorder (%p4218_p12), %s9155_s25, %s11701_s15  ;;  %p11704_p3 = scmp.lt.s32.totalorder (%p4218_p12), %s11702_s1, %s11696_s12 }
 0x1cc   : >> { %11068 = vmatmul.mubr.msk.f32.vlgmr.msra.gmra.mxu1 %vm4181_vm3, %v4225_v10  ;;  %11073 = vmatprep.subr.mxu0 %v4446_v31  ;;  %v4780_v41 = vld [vmem:[%s13681_s3 + $0xb0] sm:$0xff]  ;;  %v9902_v40 = vld [vmem:[%s12713_s0 + $0x1b] sm:$0xf]  ;;  %v4779_v28 = vld [vmem:[%s13681_s3 + $0xa8] sm:$0xff]  ;;  %p11699_p1 = pneg (%p4218_p12), %p11698_p0 }
 0x1cd   : >> { %11087 = vmatprep.subr.mxu1 %v4557_v17  ;;  %11074 = vmatpush3.msra.mxu0 %v4446_v31  ;;  %v12782_v23 = vld [vmem:[%s12713_s0 + $0x12] sm:$0xff]  ;;  %v4665_v43 = vld [vmem:[%s13681_s3 + $0x80] sm:$0xff]  ;;  %v9910_v44 = vld [vmem:[%s12713_s0 + $0x1c] sm:$0xf]  ;;  %p11705_p4 = por (%p4218_p12), %p11704_p3, %p11703_p2 }
 0x1ce   : >> { %11088 = vmatpush3.msra.mxu1 %v4557_v17  ;;  %11075 = vmatprep.subr.mxu0 %v4445_v0  ;;  %v9901_v18 = vld [vmem:[%s12713_s0 + $0x13] sm:$0xff]  ;;  %v4778_v24 = vld [vmem:[%s13681_s3 + $0xa0] sm:$0xff]  ;;  %v4890_v19 = vld [vmem:[%s13681_s3 + $0xc8] sm:$0xff] }
 0x1cf   : >> { %11089 = vmatprep.subr.mxu1 %v4556_v34  ;;  %11056 = vmatprep.mubr.msk.f32.mxu0 %vm4181_vm3, %v12736_v16  ;;  %v9907_v53 = vld [vmem:[%s12713_s0 + $0x4] sm:$0xff]  ;;  %v9917_v14 = vld [vmem:[%s12713_s0 + $0xe] sm:$0xff]  ;;  %v9918_v63 = vld [vmem:[%s12713_s0 + $0x16] sm:$0xff]  ;;  %p11706_p7 = pnand (%p4218_p12), %p11705_p4, %p11699_p1 }
 0x1d0   : >> { %11070 = vmatprep.mubr.msk.f32.mxu1 %vm4181_vm3, %v12739_v35  ;;  %11076 = vmatpush3.msra.mxu0 %v4445_v0  ;;  %v9908_v48 = vld [vmem:[%s12713_s0 + $0xc] sm:$0xff]  ;;  %v4892_v50 = vld [vmem:[%s13681_s3 + $0xd8] sm:$0xff]  ;;  %v9920_v2 = vld [vmem:[%s12713_s0 + $0x26] sm:$0xf] }
 0x1d1   : >> { %11090 = vmatpush3.msra.mxu1 %v4556_v34  ;;  %11057 = vmatmul.mubr.msk.f32.gmra.mxu0 %vm4181_vm3, %v9882_v6  ;;  %v5003_v42 = vld [vmem:[%s13681_s3 + $0xf8] sm:$0xff]  ;;  %v4891_v32 = vld [vmem:[%s13681_s3 + $0xd0] sm:$0xff]  ;;  %v5001_v57 = vld [vmem:[%s13681_s3 + $0xe8] sm:$0xff] }
 0x1d2   : >> { %11071 = vmatmul.mubr.msk.f32.gmra.mxu1 %vm4181_vm3, %v4227_v60  ;;  %11077 = vmatprep.subr.mxu0 %v4444_v5  ;;  %v5002_v45 = vld [vmem:[%s13681_s3 + $0xf0] sm:$0xff]  ;;  %v12826_v52 = vld [vmem:[%s12713_s0 + $0x1e] sm:$0xff]  ;;  %v9930_v25 = vld [vmem:[%s12713_s0 + $0x27] sm:$0xf] }
 0x1d3   : >> { %11091 = vmatprep.subr.mxu1 %v4555_v13  ;;  %11078 = vmatpush3.msra.mxu0 %v4444_v5  ;;  %v9909_v15 = vld [vmem:[%s12713_s0 + $0x14] sm:$0xff]  ;;  %v4889_v26 = vld [vmem:[%s13681_s3 + $0xc0] sm:$0xff]  ;;  %v9940_v1 = vld [vmem:[%s12713_s0 + $0x28] sm:$0xf] }
 0x1d4   : >> { %11092 = vmatpush3.msra.mxu1 %v4555_v13  ;;  %11079 = vmatprep.subr.mxu0 %v4443_v37  ;;  %v5000_v29 = vld [vmem:[%s13681_s3 + $0xe0] sm:$0xff]  ;;  %v9927_v54 = vld [vmem:[%s12713_s0 + $0xf] sm:$0xff]  ;;  %v9928_v55 = vld [vmem:[%s12713_s0 + $0x17] sm:$0xff] }
 0x1d5   : >> { %11093 = vmatprep.subr.mxu1 %v4554_v20  ;;  %11080 = vmatpush3.msra.mxu0 %v4443_v37  ;;  %v9938_v46 = vld [vmem:[%s12713_s0 + $0x18] sm:$0xff]  ;;  %v5113_v59 = vld [vmem:[%s13681_s3 + $0x110] sm:$0xff]  ;;  %v12871_v4 = vld [vmem:[%s12713_s0 + $0x20] sm:$0xff] }
 0x1d6   : >> { %11081 = vmatprep.mubr.msk.f32.mxu0 %vm4181_vm3, %v9891_v47  ;;  %11094 = vmatpush3.msra.mxu1 %v4554_v20  ;;  %v5114_v56 = vld [vmem:[%s13681_s3 + $0x118] sm:$0xff]  ;;  %v5224_v51 = vld [vmem:[%s13681_s3 + $0x130] sm:$0xff]  ;;  %v5112_v7 = vld [vmem:[%s13681_s3 + $0x108] sm:$0xff] }
 0x1d7   : >> { %11095 = vmatprep.mubr.msk.f32.mxu1 %vm4181_vm3, %v9899_v3  ;;  %11082 = vmatmul.mubr.msk.f32.vlgmr.msra.gmra.mxu0 %vm4181_vm3, %v9892_v36  ;;  %v5225_v11 = vld [vmem:[%s13681_s3 + $0x138] sm:$0xff]  ;;  %v5223_v21 = vld [vmem:[%s13681_s3 + $0x128] sm:$0xff]  ;;  %v5111_v8 = vld [vmem:[%s13681_s3 + $0x100] sm:$0xff] }
 0x1d8   : >> { %11096 = vmatmul.mubr.msk.f32.vlgmr.msra.gmra.mxu1 %vm4181_vm3, %v9900_v9  ;;  %11101 = vmatprep.subr.mxu0 %v4668_v49  ;;  %v12868_v12 = vld [vmem:[%s12713_s0 + $0x1f] sm:$0xff]  ;;  %v5336_v10 = vld [vmem:[%s13681_s3 + $0x150] sm:$0xff]  ;;  %v9950_v34 = vld [vmem:[%s12713_s0 + $0x29] sm:$0xf] }
 0x1d9   : >> { %11115 = vmatprep.subr.mxu1 %v4781_v22  ;;  %11102 = vmatpush3.msra.mxu0 %v4668_v49  ;;  %v5222_v58 = vld [vmem:[%s13681_s3 + $0x120] sm:$0xff]  ;;  %v5337_v61 = vld [vmem:[%s13681_s3 + $0x158] sm:$0xff]  ;;  %v5447_v31 = vld [vmem:[%s13681_s3 + $0x170] sm:$0xff] }
 0x1da   : >> { %11116 = vmatpush3.msra.mxu1 %v4781_v22  ;;  %11103 = vmatprep.subr.mxu0 %v4667_v27  ;;  %v9948_v39 = vld [vmem:[%s12713_s0 + $0x19] sm:$0xff]  ;;  %v9949_v17 = vld [vmem:[%s12713_s0 + $0x21] sm:$0xff]  ;;  %v5558_v9 = vld [vmem:[%s13681_s3 + $0x190] sm:$0xff] }
 0x1db   : >> { %11117 = vmatprep.subr.mxu1 %v4780_v41  ;;  %11084 = vmatprep.mubr.msk.f32.mxu0 %vm4181_vm3, %v12782_v23  ;;  %v9958_v30 = vld [vmem:[%s12713_s0 + $0x1a] sm:$0xff]  ;;  %v9959_v0 = vld [vmem:[%s12713_s0 + $0x22] sm:$0xff]  ;;  %v5669_v49 = vld [vmem:[%s13681_s3 + $0x1b0] sm:$0xff] }
 0x1dc   : >> { %11098 = vmatprep.mubr.msk.f32.mxu1 %vm4181_vm3, %v9901_v18  ;;  %11104 = vmatpush3.msra.mxu0 %v4667_v27  ;;  %v5448_v33 = vld [vmem:[%s13681_s3 + $0x178] sm:$0xff]  ;;  %v5446_v6 = vld [vmem:[%s13681_s3 + $0x168] sm:$0xff]  ;;  %v5334_v60 = vld [vmem:[%s13681_s3 + $0x140] sm:$0xff] }
 0x1dd   : >> { %11118 = vmatpush3.msra.mxu1 %v4780_v41  ;;  %11085 = vmatmul.mubr.msk.f32.gmra.mxu0 %vm4181_vm3, %v9894_v38  ;;  %v5445_v5 = vld [vmem:[%s13681_s3 + $0x160] sm:$0xff]  ;;  %v5559_v3 = vld [vmem:[%s13681_s3 + $0x198] sm:$0xff]  ;;  %v12954_v22 = vld [vmem:[%s12713_s0 + $0x2c] sm:$0xff] }
 0x1de   : >> { %11099 = vmatmul.mubr.msk.f32.gmra.mxu1 %vm4181_vm3, %v9902_v40  ;;  %11105 = vmatprep.subr.mxu0 %v4666_v62  ;;  %v9967_v13 = vld [vmem:[%s12713_s0 + $0x1c] sm:$0xff]  ;;  %v9968_v20 = vld [vmem:[%s12713_s0 + $0x24] sm:$0xff]  ;;  %v12957_v27 = vld [vmem:[%s12713_s0 + $0x2d] sm:$0xff] }
 0x1df   : >> { %11119 = vmatprep.subr.mxu1 %v4779_v28  ;;  %11106 = vmatpush3.msra.mxu0 %v4666_v62  ;;  %v9977_v37 = vld [vmem:[%s12713_s0 + $0x1d] sm:$0xff]  ;;  %v9978_v47 = vld [vmem:[%s12713_s0 + $0x25] sm:$0xff]  ;;  %v9970_v41 = vld [vmem:[%s12713_s0 + $0x34] sm:$0xf] }
 0x1e0   : >> { %11120 = vmatpush3.msra.mxu1 %v4779_v28  ;;  %11107 = vmatprep.subr.mxu0 %v4665_v43  ;;  %v5670_v36 = vld [vmem:[%s13681_s3 + $0x1b8] sm:$0xff]  ;;  %v5557_v18 = vld [vmem:[%s13681_s3 + $0x188] sm:$0xff]  ;;  %v5556_v40 = vld [vmem:[%s13681_s3 + $0x180] sm:$0xff] }
 0x1e1   : >> { %11121 = vmatprep.subr.mxu1 %v4778_v24  ;;  %11108 = vmatpush3.msra.mxu0 %v4665_v43  ;;  %v5668_v38 = vld [vmem:[%s13681_s3 + $0x1a8] sm:$0xff]  ;;  %v5667_v62 = vld [vmem:[%s13681_s3 + $0x1a0] sm:$0xff] }
 0x1e2   : >> { %11109 = vmatprep.mubr.msk.f32.mxu0 %vm4181_vm3, %v9907_v53  ;;  %11122 = vmatpush3.msra.mxu1 %v4778_v24  ;;  %v9988_v28 = vld [vmem:[%s12713_s0 + $0x26] sm:$0xff]  ;;  %v5781_v24 = vld [vmem:[%s13681_s3 + $0x1d8] sm:$0xff] }
 0x1e3   : >> { %11123 = vmatprep.mubr.msk.f32.mxu1 %vm4181_vm3, %v9917_v14  ;;  %11110 = vmatmul.mubr.msk.f32.vlgmr.msra.gmra.mxu0 %vm4181_vm3, %v9908_v48  ;;  %v9998_v43 = vld [vmem:[%s12713_s0 + $0x27] sm:$0xff]  ;;  %v5893_v53 = vld [vmem:[%s13681_s3 + $0x1f8] sm:$0xff]  ;;  %v5780_v14 = vld [vmem:[%s13681_s3 + $0x1d0] sm:$0xff] }
 0x1e4   : >> { %11124 = vmatmul.mubr.msk.f32.vlgmr.msra.gmra.mxu1 %vm4181_vm3, %v9918_v63  ;;  %11129 = vmatprep.subr.mxu0 %v4892_v50  ;;  %v5892_v48 = vld [vmem:[%s13681_s3 + $0x1f0] sm:$0xff] }
 0x1e5   : >> { %11143 = vmatprep.subr.mxu1 %v5003_v42  ;;  %11130 = vmatpush3.msra.mxu0 %v4892_v50  ;;  %v13000_v63 = vld [vmem:[%s12713_s0 + $0x2e] sm:$0xff] }
 0x1e6   : >> { %11144 = vmatpush3.msra.mxu1 %v5003_v42  ;;  %11131 = vmatprep.subr.mxu0 %v4891_v32  ;;  %v9999_v50 = vld [vmem:[%s12713_s0 + $0x2f] sm:$0xff] }
 0x1e7   : >> { %11145 = vmatprep.subr.mxu1 %v5002_v45  ;;  %11112 = vmatprep.mubr.msk.f32.mxu0 %vm4181_vm3, %v9909_v15  ;;  %v9990_v42 = vld [vmem:[%s12713_s0 + $0x36] sm:$0xf]  ;;  %v5891_v15 = vld [vmem:[%s13681_s3 + $0x1e8] sm:$0xff] }
 0x1e8   : >> { %11126 = vmatprep.mubr.msk.f32.mxu1 %vm4181_vm3, %v12826_v52  ;;  %11132 = vmatpush3.msra.mxu0 %v4891_v32  ;;  %v10000_v32 = vld [vmem:[%s12713_s0 + $0x37] sm:$0xf] }
 0x1e9   : >> { %11146 = vmatpush3.msra.mxu1 %v5002_v45  ;;  %11113 = vmatmul.mubr.msk.f32.gmra.mxu0 %vm4181_vm3, %v9910_v44  ;;  %v5779_v45 = vld [vmem:[%s13681_s3 + $0x1c8] sm:$0xff]  ;;  %v5890_v44 = vld [vmem:[%s13681_s3 + $0x1e0] sm:$0xff] }
 0x1ea   : >> { %11127 = vmatmul.mubr.msk.f32.gmra.mxu1 %vm4181_vm3, %v9920_v2  ;;  %11133 = vmatprep.subr.mxu0 %v4890_v19  ;;  %v10017_v2 = vld [vmem:[%s12713_s0 + $0x2a] sm:$0xff] }
 0x1eb   : >> { %11147 = vmatprep.subr.mxu1 %v5001_v57  ;;  %11134 = vmatpush3.msra.mxu0 %v4890_v19  ;;  %v10008_v19 = vld [vmem:[%s12713_s0 + $0x28] sm:$0xff] }
 0x1ec   : >> { %11148 = vmatpush3.msra.mxu1 %v5001_v57  ;;  %11135 = vmatprep.subr.mxu0 %v4889_v26  ;;  %v10018_v57 = vld [vmem:[%s12713_s0 + $0x32] sm:$0xff] }
 0x1ed   : >> { %11149 = vmatprep.subr.mxu1 %v5000_v29  ;;  %11136 = vmatpush3.msra.mxu0 %v4889_v26  ;;  %v6004_v26 = vld [vmem:[%s13681_s3 + $0x218] sm:$0xff] }
 0x1ee   : >> { %11137 = vmatprep.mubr.msk.f32.mxu0 %vm4181_vm3, %v9927_v54  ;;  %11150 = vmatpush3.msra.mxu1 %v5000_v29  ;;  %v6115_v29 = vld [vmem:[%s13681_s3 + $0x238] sm:$0xff]  ;;  %v6003_v54 = vld [vmem:[%s13681_s3 + $0x210] sm:$0xff] }
 0x1ef   : >> { %11151 = vmatprep.mubr.msk.f32.mxu1 %vm4181_vm3, %v12739_v35  ;;  %11138 = vmatmul.mubr.msk.f32.vlgmr.msra.gmra.mxu0 %vm4181_vm3, %v9928_v55  ;;  %v5335_v35 = vld [vmem:[%s13681_s3 + $0x148] sm:$0xff]  ;;  %v6114_v55 = vld [vmem:[%s13681_s3 + $0x230] sm:$0xff] }
 0x1f0   : >> { %11152 = vmatmul.mubr.msk.f32.vlgmr.msra.gmra.mxu1 %vm4181_vm3, %v9938_v46  ;;  %11157 = vmatprep.subr.mxu0 %v5114_v56  ;;  %v10009_v46 = vld [vmem:[%s12713_s0 + $0x30] sm:$0xff] }
 0x1f1   : >> { %11171 = vmatprep.subr.mxu1 %v5225_v11  ;;  %11158 = vmatpush3.msra.mxu0 %v5114_v56  ;;  %v13044_v56 = vld [vmem:[%s12713_s0 + $0x3a] sm:$0xff] }
 0x1f2   : >> { %11172 = vmatpush3.msra.mxu1 %v5225_v11  ;;  %11159 = vmatprep.subr.mxu0 %v5113_v59  ;;  %v10010_v11 = vld [vmem:[%s12713_s0 + $0x38] sm:$0xf] }
 0x1f3   : >> { %11173 = vmatprep.subr.mxu1 %v5224_v51  ;;  %11140 = vmatprep.mubr.msk.f32.mxu0 %vm4181_vm3, %v12868_v12 }
 0x1f4   : >> { %11154 = vmatprep.mubr.msk.f32.mxu1 %vm4181_vm3, %v12871_v4  ;;  %11160 = vmatpush3.msra.mxu0 %v5113_v59  ;;  %v10020_v59 = vld [vmem:[%s12713_s0 + $0x42] sm:$0xf] }
 0x1f5   : >> { %11174 = vmatpush3.msra.mxu1 %v5224_v51  ;;  %11141 = vmatmul.mubr.msk.f32.gmra.mxu0 %vm4181_vm3, %v9930_v25  ;;  %v6002_v51 = vld [vmem:[%s13681_s3 + $0x208] sm:$0xff]  ;;  %v6112_v25 = vld [vmem:[%s13681_s3 + $0x220] sm:$0xff] }
 0x1f6   : >> { %11155 = vmatmul.mubr.msk.f32.gmra.mxu1 %vm4181_vm3, %v9940_v1  ;;  %11161 = vmatprep.subr.mxu0 %v5112_v7  ;;  %v10027_v1 = vld [vmem:[%s12713_s0 + $0x2b] sm:$0xff] }
 0x1f7   : >> { %11175 = vmatprep.subr.mxu1 %v5223_v21  ;;  %11162 = vmatpush3.msra.mxu0 %v5112_v7  ;;  %v10028_v7 = vld [vmem:[%s12713_s0 + $0x33] sm:$0xff] }
 0x1f8   : >> { %11176 = vmatpush3.msra.mxu1 %v5223_v21  ;;  %11163 = vmatprep.subr.mxu0 %v5111_v8  ;;  %v10038_v21 = vld [vmem:[%s12713_s0 + $0x34] sm:$0xff] }
 0x1f9   : >> { %11177 = vmatprep.subr.mxu1 %v5222_v58  ;;  %11164 = vmatpush3.msra.mxu0 %v5111_v8  ;;  %v6226_v8 = vld [vmem:[%s13681_s3 + $0x258] sm:$0xff] }
 0x1fa   : >> { %11165 = vmatprep.mubr.msk.f32.mxu0 %vm4181_vm3, %v12736_v16  ;;  %11178 = vmatpush3.msra.mxu1 %v5222_v58  ;;  %v9960_v16 = vld [vmem:[%s12713_s0 + $0x2a] sm:$0xf]  ;;  %v6337_v58 = vld [vmem:[%s13681_s3 + $0x278] sm:$0xff] }
 0x1fb   : >> { %11179 = vmatprep.mubr.msk.f32.mxu1 %vm4181_vm3, %v12782_v23  ;;  %11166 = vmatmul.mubr.msk.f32.vlgmr.msra.gmra.mxu0 %vm4181_vm3, %v9948_v39  ;;  %v9980_v23 = vld [vmem:[%s12713_s0 + $0x35] sm:$0xf] }
 0x1fc   : >> { %11180 = vmatmul.mubr.msk.f32.vlgmr.msra.gmra.mxu1 %vm4181_vm3, %v9958_v30  ;;  %11185 = vmatprep.subr.mxu0 %v5337_v61  ;;  %v6225_v39 = vld [vmem:[%s13681_s3 + $0x250] sm:$0xff] }
 0x1fd   : >> { %11199 = vmatprep.subr.mxu1 %v5448_v33  ;;  %11186 = vmatpush3.msra.mxu0 %v5337_v61  ;;  %v6336_v30 = vld [vmem:[%s13681_s3 + $0x270] sm:$0xff]  ;;  %v13086_v61 = vld [vmem:[%s12713_s0 + $0x3b] sm:$0xff] }
 0x1fe   : >> { %11200 = vmatpush3.msra.mxu1 %v5448_v33  ;;  %11187 = vmatprep.subr.mxu0 %v5336_v10  ;;  %v13089_v33 = vld [vmem:[%s12713_s0 + $0x3c] sm:$0xff] }
 0x1ff   : >> { %11201 = vmatprep.subr.mxu1 %v5447_v31  ;;  %11168 = vmatprep.mubr.msk.f32.mxu0 %vm4181_vm3, %v9949_v17  ;;  %v6224_v17 = vld [vmem:[%s13681_s3 + $0x248] sm:$0xff] }
 0x200   : >> { %11182 = vmatprep.mubr.msk.f32.mxu1 %vm4181_vm3, %v9959_v0  ;;  %11188 = vmatpush3.msra.mxu0 %v5336_v10  ;;  %v10030_v10 = vld [vmem:[%s12713_s0 + $0x43] sm:$0xf]  ;;  %v6335_v0 = vld [vmem:[%s13681_s3 + $0x268] sm:$0xff] }
 0x201   : >> { %11202 = vmatpush3.msra.mxu1 %v5447_v31  ;;  %11169 = vmatmul.mubr.msk.f32.gmra.mxu0 %vm4181_vm3, %v9950_v34  ;;  %v10040_v31 = vld [vmem:[%s12713_s0 + $0x44] sm:$0xf] }
 0x202   : >> { %11183 = vmatmul.mubr.msk.f32.gmra.mxu1 %vm4181_vm3, %v9960_v16  ;;  %11189 = vmatprep.subr.mxu0 %v5335_v35  ;;  %v6223_v34 = vld [vmem:[%s13681_s3 + $0x240] sm:$0xff] }
 0x203   : >> { %11203 = vmatprep.subr.mxu1 %v5446_v6  ;;  %11190 = vmatpush3.msra.mxu0 %v5335_v35  ;;  %v6334_v16 = vld [vmem:[%s13681_s3 + $0x260] sm:$0xff]  ;;  %v10048_v35 = vld [vmem:[%s12713_s0 + $0x35] sm:$0xff] }
 0x204   : >> { %11204 = vmatpush3.msra.mxu1 %v5446_v6  ;;  %11191 = vmatprep.subr.mxu0 %v5334_v60  ;;  %v10058_v6 = vld [vmem:[%s12713_s0 + $0x36] sm:$0xff] }
 0x205   : >> { %11205 = vmatprep.subr.mxu1 %v5445_v5  ;;  %11192 = vmatpush3.msra.mxu0 %v5334_v60  ;;  %v6449_v60 = vld [vmem:[%s13681_s3 + $0x298] sm:$0xff] }
 0x206   : >> { %11193 = vmatprep.mubr.msk.f32.mxu0 %vm4181_vm3, %v9967_v13  ;;  %11206 = vmatpush3.msra.mxu1 %v5445_v5  ;;  %v6560_v5 = vld [vmem:[%s13681_s3 + $0x2b8] sm:$0xff]  ;;  %v6448_v13 = vld [vmem:[%s13681_s3 + $0x290] sm:$0xff] }
 0x207   : >> { %11207 = vmatprep.mubr.msk.f32.mxu1 %vm4181_vm3, %v9977_v37  ;;  %11194 = vmatmul.mubr.msk.f32.vlgmr.msra.gmra.mxu0 %vm4181_vm3, %v9968_v20  ;;  %v6559_v37 = vld [vmem:[%s13681_s3 + $0x2b0] sm:$0xff]  ;;  %v10049_v20 = vld [vmem:[%s12713_s0 + $0x3d] sm:$0xff] }
 0x208   : >> { %11208 = vmatmul.mubr.msk.f32.vlgmr.msra.gmra.mxu1 %vm4181_vm3, %v9978_v47  ;;  %11213 = vmatprep.subr.mxu0 %v5559_v3  ;;  %v10059_v47 = vld [vmem:[%s12713_s0 + $0x3e] sm:$0xff] }
 0x209   : >> { %11227 = vmatprep.subr.mxu1 %v5670_v36  ;;  %11214 = vmatpush3.msra.mxu0 %v5559_v3  ;;  %v10050_v3 = vld [vmem:[%s12713_s0 + $0x45] sm:$0xf] }
 0x20a   : >> { %11228 = vmatpush3.msra.mxu1 %v5670_v36  ;;  %11215 = vmatprep.subr.mxu0 %v5558_v9  ;;  %v10060_v36 = vld [vmem:[%s12713_s0 + $0x46] sm:$0xf] }
 0x20b   : >> { %11229 = vmatprep.subr.mxu1 %v5669_v49  ;;  %11196 = vmatprep.mubr.msk.f32.mxu0 %vm4181_vm3, %v12954_v22 }
 0x20c   : >> { %11210 = vmatprep.mubr.msk.f32.mxu1 %vm4181_vm3, %v12957_v27  ;;  %11216 = vmatpush3.msra.mxu0 %v5558_v9  ;;  %v6447_v9 = vld [vmem:[%s13681_s3 + $0x288] sm:$0xff] }
 0x20d   : >> { %11230 = vmatpush3.msra.mxu1 %v5669_v49  ;;  %11197 = vmatmul.mubr.msk.f32.gmra.mxu0 %vm4181_vm3, %v9970_v41  ;;  %v6558_v49 = vld [vmem:[%s13681_s3 + $0x2a8] sm:$0xff]  ;;  %v10067_v41 = vld [vmem:[%s12713_s0 + $0x38] sm:$0xff] }
 0x20e   : >> { %11211 = vmatmul.mubr.msk.f32.gmra.mxu1 %vm4181_vm3, %v9980_v23  ;;  %11217 = vmatprep.subr.mxu0 %v5557_v18  ;;  %v10077_v23 = vld [vmem:[%s12713_s0 + $0x39] sm:$0xff] }
 0x20f   : >> { %11231 = vmatprep.subr.mxu1 %v5668_v38  ;;  %11218 = vmatpush3.msra.mxu0 %v5557_v18  ;;  %v10068_v18 = vld [vmem:[%s12713_s0 + $0x40] sm:$0xff] }
 0x210   : >> { %11232 = vmatpush3.msra.mxu1 %v5668_v38  ;;  %11219 = vmatprep.subr.mxu0 %v5556_v40  ;;  %v10078_v38 = vld [vmem:[%s12713_s0 + $0x41] sm:$0xff] }
 0x211   : >> { %11233 = vmatprep.subr.mxu1 %v5667_v62  ;;  %11220 = vmatpush3.msra.mxu0 %v5556_v40  ;;  %v6671_v40 = vld [vmem:[%s13681_s3 + $0x2d8] sm:$0xff] }
 0x212   : >> { %11221 = vmatprep.mubr.msk.f32.mxu0 %vm4181_vm3, %v12826_v52  ;;  %11234 = vmatpush3.msra.mxu1 %v5667_v62  ;;  %v5778_v52 = vld [vmem:[%s13681_s3 + $0x1c0] sm:$0xff]  ;;  %v6782_v62 = vld [vmem:[%s13681_s3 + $0x2f8] sm:$0xff] }
 0x213   : >> { %11235 = vmatprep.mubr.msk.f32.mxu1 %vm4181_vm3, %v12868_v12  ;;  %11222 = vmatmul.mubr.msk.f32.vlgmr.msra.gmra.mxu0 %vm4181_vm3, %v9988_v28  ;;  %v6113_v12 = vld [vmem:[%s13681_s3 + $0x228] sm:$0xff]  ;;  %v6670_v28 = vld [vmem:[%s13681_s3 + $0x2d0] sm:$0xff] }
 0x214   : >> { %11236 = vmatmul.mubr.msk.f32.vlgmr.msra.gmra.mxu1 %vm4181_vm3, %v9998_v43  ;;  %11241 = vmatprep.subr.mxu0 %v5781_v24  ;;  %v6781_v43 = vld [vmem:[%s13681_s3 + $0x2f0] sm:$0xff] }
 0x215   : >> { %11255 = vmatprep.subr.mxu1 %v5893_v53  ;;  %11242 = vmatpush3.msra.mxu0 %v5781_v24  ;;  %v10069_v24 = vld [vmem:[%s12713_s0 + $0x48] sm:$0xff] }
 0x216   : >> { %11256 = vmatpush3.msra.mxu1 %v5893_v53  ;;  %11243 = vmatprep.subr.mxu0 %v5780_v14  ;;  %v10079_v53 = vld [vmem:[%s12713_s0 + $0x49] sm:$0xff] }
 0x217   : >> { %11257 = vmatprep.subr.mxu1 %v5892_v48  ;;  %11224 = vmatprep.mubr.msk.f32.mxu0 %vm4181_vm3, %v13000_v63 }
 0x218   : >> { %11238 = vmatprep.mubr.msk.f32.mxu1 %vm4181_vm3, %v9999_v50  ;;  %11244 = vmatpush3.msra.mxu0 %v5780_v14  ;;  %v10070_v14 = vld [vmem:[%s12713_s0 + $0x50] sm:$0xf]  ;;  %v6780_v50 = vld [vmem:[%s13681_s3 + $0x2e8] sm:$0xff] }
 0x219   : >> { %11258 = vmatpush3.msra.mxu1 %v5892_v48  ;;  %11225 = vmatmul.mubr.msk.f32.gmra.mxu0 %vm4181_vm3, %v9990_v42  ;;  %v10080_v48 = vld [vmem:[%s12713_s0 + $0x51] sm:$0xf]  ;;  %v6668_v42 = vld [vmem:[%s13681_s3 + $0x2c0] sm:$0xff] }
 0x21a   : >> { %11239 = vmatmul.mubr.msk.f32.gmra.mxu1 %vm4181_vm3, %v10000_v32  ;;  %11245 = vmatprep.subr.mxu0 %v5779_v45  ;;  %v6779_v32 = vld [vmem:[%s13681_s3 + $0x2e0] sm:$0xff] }
 0x21b   : >> { %11259 = vmatprep.subr.mxu1 %v5891_v15  ;;  %11246 = vmatpush3.msra.mxu0 %v5779_v45  ;;  %v10088_v45 = vld [vmem:[%s12713_s0 + $0x42] sm:$0xff] }
 0x21c   : >> { %11260 = vmatpush3.msra.mxu1 %v5891_v15  ;;  %11247 = vmatprep.subr.mxu0 %v5778_v52  ;;  %v10098_v15 = vld [vmem:[%s12713_s0 + $0x43] sm:$0xff] }
 0x21d   : >> { %11261 = vmatprep.subr.mxu1 %v5890_v44  ;;  %11248 = vmatpush3.msra.mxu0 %v5778_v52  ;;  %v6893_v52 = vld [vmem:[%s13681_s3 + $0x318] sm:$0xff] }
 0x21e   : >> { %11249 = vmatprep.mubr.msk.f32.mxu0 %vm4181_vm3, %v12871_v4  ;;  %11262 = vmatpush3.msra.mxu1 %v5890_v44  ;;  %v6001_v4 = vld [vmem:[%s13681_s3 + $0x200] sm:$0xff]  ;;  %v6892_v44 = vld [vmem:[%s13681_s3 + $0x310] sm:$0xff] }
 0x21f   : >> { %11263 = vmatprep.mubr.msk.f32.mxu1 %vm4181_vm3, %v10017_v2  ;;  %11250 = vmatmul.mubr.msk.f32.vlgmr.msra.gmra.mxu0 %vm4181_vm3, %v10008_v19  ;;  %v10089_v2 = vld [vmem:[%s12713_s0 + $0x4a] sm:$0xff] }
 0x220   : >> { %11264 = vmatmul.mubr.msk.f32.vlgmr.msra.gmra.mxu1 %vm4181_vm3, %v10018_v57  ;;  %11269 = vmatprep.subr.mxu0 %v6004_v26  ;;  %v10099_v19 = vld [vmem:[%s12713_s0 + $0x4b] sm:$0xff] }
 0x221   : >> { %11283 = vmatprep.subr.mxu1 %v6115_v29  ;;  %11270 = vmatpush3.msra.mxu0 %v6004_v26  ;;  %v10090_v57 = vld [vmem:[%s12713_s0 + $0x52] sm:$0xf] }
 0x222   : >> { %11284 = vmatpush3.msra.mxu1 %v6115_v29  ;;  %11271 = vmatprep.subr.mxu0 %v6003_v54  ;;  %v10100_v26 = vld [vmem:[%s12713_s0 + $0x53] sm:$0xf]  ;;  %v6891_v29 = vld [vmem:[%s13681_s3 + $0x308] sm:$0xff] }
 0x223   : >> { %11285 = vmatprep.subr.mxu1 %v6114_v55  ;;  %11252 = vmatprep.mubr.msk.f32.mxu0 %vm4181_vm3, %v10009_v46  ;;  %v10108_v46 = vld [vmem:[%s12713_s0 + $0x44] sm:$0xff] }
 0x224   : >> { %11266 = vmatprep.mubr.msk.f32.mxu1 %vm4181_vm3, %v13044_v56  ;;  %11272 = vmatpush3.msra.mxu0 %v6003_v54  ;;  %v6890_v54 = vld [vmem:[%s13681_s3 + $0x300] sm:$0xff] }
 0x225   : >> { %11286 = vmatpush3.msra.mxu1 %v6114_v55  ;;  %11253 = vmatmul.mubr.msk.f32.gmra.mxu0 %vm4181_vm3, %v10010_v11  ;;  %v10109_v55 = vld [vmem:[%s12713_s0 + $0x4c] sm:$0xff] }
 0x226   : >> { %11267 = vmatmul.mubr.msk.f32.gmra.mxu1 %vm4181_vm3, %v10020_v59  ;;  %11273 = vmatprep.subr.mxu0 %v6002_v51 }
 0x227   : >> { %11287 = vmatprep.subr.mxu1 %v6113_v12  ;;  %11274 = vmatpush3.msra.mxu0 %v6002_v51 }
 0x228   : >> { %11288 = vmatpush3.msra.mxu1 %v6113_v12  ;;  %11275 = vmatprep.subr.mxu0 %v6001_v4 }
 0x229   : >> { %11289 = vmatprep.subr.mxu1 %v6112_v25  ;;  %11276 = vmatpush3.msra.mxu0 %v6001_v4 }
 0x22a   : >> { %11277 = vmatprep.mubr.msk.f32.mxu0 %vm4181_vm3, %v10027_v1  ;;  %11290 = vmatpush3.msra.mxu1 %v6112_v25 }
 0x22b   : >> { %11291 = vmatprep.mubr.msk.f32.mxu1 %vm4181_vm3, %v12954_v22  ;;  %11278 = vmatmul.mubr.msk.f32.vlgmr.msra.gmra.mxu0 %vm4181_vm3, %v10028_v7  ;;  %v6446_v22 = vld [vmem:[%s13681_s3 + $0x280] sm:$0xff] }
 0x22c   : >> { %11292 = vmatmul.mubr.msk.f32.vlgmr.msra.gmra.mxu1 %vm4181_vm3, %v10038_v21  ;;  %11297 = vmatprep.subr.mxu0 %v6226_v8 }
 0x22d   : >> { %11311 = vmatprep.subr.mxu1 %v6337_v58  ;;  %11298 = vmatpush3.msra.mxu0 %v6226_v8 }
 0x22e   : >> { %11312 = vmatpush3.msra.mxu1 %v6337_v58  ;;  %11299 = vmatprep.subr.mxu0 %v6225_v39 }
 0x22f   : >> { %11313 = vmatprep.subr.mxu1 %v6336_v30  ;;  %11280 = vmatprep.mubr.msk.f32.mxu0 %vm4181_vm3, %v13086_v61 }
 0x230   : >> { %11294 = vmatprep.mubr.msk.f32.mxu1 %vm4181_vm3, %v13089_v33  ;;  %11300 = vmatpush3.msra.mxu0 %v6225_v39 }
 0x231   : >> { %11314 = vmatpush3.msra.mxu1 %v6336_v30  ;;  %11281 = vmatmul.mubr.msk.f32.gmra.mxu0 %vm4181_vm3, %v10030_v10 }
 0x232   : >> { %11295 = vmatmul.mubr.msk.f32.gmra.mxu1 %vm4181_vm3, %v10040_v31  ;;  %11301 = vmatprep.subr.mxu0 %v6224_v17 }
 0x233   : >> { %11315 = vmatprep.subr.mxu1 %v6335_v0  ;;  %11302 = vmatpush3.msra.mxu0 %v6224_v17 }
 0x234   : >> { %11316 = vmatpush3.msra.mxu1 %v6335_v0  ;;  %11303 = vmatprep.subr.mxu0 %v6223_v34 }
 0x235   : >> { %11317 = vmatprep.subr.mxu1 %v6334_v16  ;;  %11304 = vmatpush3.msra.mxu0 %v6223_v34 }
 0x236   : >> { %11305 = vmatprep.mubr.msk.f32.mxu0 %vm4181_vm3, %v12957_v27  ;;  %11318 = vmatpush3.msra.mxu1 %v6334_v16  ;;  %v6557_v27 = vld [vmem:[%s13681_s3 + $0x2a0] sm:$0xff] }
 0x237   : >> { %11319 = vmatprep.mubr.msk.f32.mxu1 %vm4181_vm3, %v13000_v63  ;;  %11306 = vmatmul.mubr.msk.f32.vlgmr.msra.gmra.mxu0 %vm4181_vm3, %v10048_v35  ;;  %v6669_v63 = vld [vmem:[%s13681_s3 + $0x2c8] sm:$0xff] }
 0x238   : >> { %11320 = vmatmul.mubr.msk.f32.vlgmr.msra.gmra.mxu1 %vm4181_vm3, %v10058_v6  ;;  %11325 = vmatprep.subr.mxu0 %v6449_v60 }
 0x239   : >> { %11339 = vmatprep.subr.mxu1 %v6560_v5  ;;  %11326 = vmatpush3.msra.mxu0 %v6449_v60 }
 0x23a   : >> { %11340 = vmatpush3.msra.mxu1 %v6560_v5  ;;  %11327 = vmatprep.subr.mxu0 %v6448_v13 }
 0x23b   : >> { %11341 = vmatprep.subr.mxu1 %v6559_v37  ;;  %11308 = vmatprep.mubr.msk.f32.mxu0 %vm4181_vm3, %v10049_v20 }
 0x23c   : >> { %11322 = vmatprep.mubr.msk.f32.mxu1 %vm4181_vm3, %v10059_v47  ;;  %11328 = vmatpush3.msra.mxu0 %v6448_v13 }
 0x23d   : >> { %11342 = vmatpush3.msra.mxu1 %v6559_v37  ;;  %11309 = vmatmul.mubr.msk.f32.gmra.mxu0 %vm4181_vm3, %v10050_v3 }
 0x23e   : >> { %11323 = vmatmul.mubr.msk.f32.gmra.mxu1 %vm4181_vm3, %v10060_v36  ;;  %11329 = vmatprep.subr.mxu0 %v6447_v9 }
 0x23f   : >> { %11343 = vmatprep.subr.mxu1 %v6558_v49  ;;  %11330 = vmatpush3.msra.mxu0 %v6447_v9 }
 0x240   : >> { %11344 = vmatpush3.msra.mxu1 %v6558_v49  ;;  %11331 = vmatprep.subr.mxu0 %v6446_v22 }
 0x241   : >> { %11345 = vmatprep.subr.mxu1 %v6557_v27  ;;  %11332 = vmatpush3.msra.mxu0 %v6446_v22 }
 0x242   : >> { %11333 = vmatprep.mubr.msk.f32.mxu0 %vm4181_vm3, %v10067_v41  ;;  %11346 = vmatpush3.msra.mxu1 %v6557_v27 }
 0x243   : >> { %11347 = vmatprep.mubr.msk.f32.mxu1 %vm4181_vm3, %v10077_v23  ;;  %11334 = vmatmul.mubr.msk.f32.vlgmr.msra.gmra.mxu0 %vm4181_vm3, %v10068_v18 }
 0x244   : >> { %11348 = vmatmul.mubr.msk.f32.vlgmr.msra.gmra.mxu1 %vm4181_vm3, %v10078_v38  ;;  %11353 = vmatprep.subr.mxu0 %v6671_v40 }
 0x245   : >> { %11367 = vmatprep.subr.mxu1 %v6782_v62  ;;  %11354 = vmatpush3.msra.mxu0 %v6671_v40 }
 0x246   : >> { %11368 = vmatpush3.msra.mxu1 %v6782_v62  ;;  %11355 = vmatprep.subr.mxu0 %v6670_v28 }
 0x247   : >> { %11369 = vmatprep.subr.mxu1 %v6781_v43  ;;  %11336 = vmatprep.mubr.msk.f32.mxu0 %vm4181_vm3, %v10069_v24 }
 0x248   : >> { %11350 = vmatprep.mubr.msk.f32.mxu1 %vm4181_vm3, %v10079_v53  ;;  %11356 = vmatpush3.msra.mxu0 %v6670_v28 }
 0x249   : >> { %11370 = vmatpush3.msra.mxu1 %v6781_v43  ;;  %11337 = vmatmul.mubr.msk.f32.gmra.mxu0 %vm4181_vm3, %v10070_v14 }
 0x24a   : >> { %11351 = vmatmul.mubr.msk.f32.gmra.mxu1 %vm4181_vm3, %v10080_v48  ;;  %11357 = vmatprep.subr.mxu0 %v6669_v63 }
 0x24b   : >> { %11371 = vmatprep.subr.mxu1 %v6780_v50  ;;  %11358 = vmatpush3.msra.mxu0 %v6669_v63 }
 0x24c   : >> { %11372 = vmatpush3.msra.mxu1 %v6780_v50  ;;  %11359 = vmatprep.subr.mxu0 %v6668_v42 }
 0x24d   : >> { %11373 = vmatprep.subr.mxu1 %v6779_v32  ;;  %11360 = vmatpush3.msra.mxu0 %v6668_v42 }
 0x24e   : >> { %11361 = vmatprep.mubr.msk.f32.mxu0 %vm4181_vm3, %v13044_v56  ;;  %11374 = vmatpush3.msra.mxu1 %v6779_v32  ;;  %v10110_v56 = vld [vmem:[%s12713_s0 + $0x54] sm:$0xf] }
 0x24f   : >> { %11375 = vmatprep.mubr.msk.f32.mxu1 %vm4181_vm3, %v13086_v61  ;;  %11362 = vmatmul.mubr.msk.f32.vlgmr.msra.gmra.mxu0 %vm4181_vm3, %v10088_v45 }
 0x250   : >> { %11376 = vmatmul.mubr.msk.f32.vlgmr.msra.gmra.mxu1 %vm4181_vm3, %v10098_v15  ;;  %11381 = vmatprep.subr.mxu0 %v6893_v52 }
 0x251   : >> { %11630 = vmatprep.subr.mxu1 %v6893_v52  ;;  %11382 = vmatpush3.msra.mxu0 %v6893_v52 }
 0x252   : >> { %11634 = vmatpush3.msra.mxu1 %v6893_v52  ;;  %11383 = vmatprep.subr.mxu0 %v6892_v44 }
 0x253   : >> { %11631 = vmatprep.subr.mxu1 %v6892_v44  ;;  %11364 = vmatprep.mubr.msk.f32.mxu0 %vm4181_vm3, %v10089_v2 }
 0x254   : >> { %11378 = vmatprep.mubr.msk.f32.mxu1 %vm4181_vm3, %v10099_v19  ;;  %11384 = vmatpush3.msra.mxu0 %v6892_v44 }
 0x255   : >> { %11635 = vmatpush3.msra.mxu1 %v6892_v44  ;;  %11365 = vmatmul.mubr.msk.f32.gmra.mxu0 %vm4181_vm3, %v10090_v57 }
 0x256   : >> { %11379 = vmatmul.mubr.msk.f32.gmra.mxu1 %vm4181_vm3, %v10100_v26  ;;  %11385 = vmatprep.subr.mxu0 %v6891_v29 }
 0x257   : >> { %11632 = vmatprep.subr.mxu1 %v6891_v29  ;;  %11386 = vmatpush3.msra.mxu0 %v6891_v29 }
 0x258   : >> { %11636 = vmatpush3.msra.mxu1 %v6891_v29  ;;  %11387 = vmatprep.subr.mxu0 %v6890_v54 }
 0x259   : >> { %11633 = vmatprep.subr.mxu1 %v6890_v54  ;;  %11388 = vmatpush3.msra.mxu0 %v6890_v54 }
 0x25a   : >> { %11637 = vmatpush3.msra.mxu1 %v6890_v54  ;;  %11389 = vmatprep.mubr.msk.f32.mxu0 %vm4181_vm3, %v13089_v33 }
 0x25b   : >> { %11392 = vmatprep.mubr.msk.f32.mxu1 %vm4181_vm3, %v10109_v55  ;;  %11390 = vmatmul.mubr.msk.f32.vlgmr.msra.gmra.mxu0 %vm4181_vm3, %v10108_v46 }
 0x25c   : >> { %11393 = vmatmul.mubr.msk.f32.vlgmr.msra.gmra.mxu1 %vm4181_vm3, %v10110_v56 }
 0x28b   : >> { %v11055_v11 = vpop.f32.mrf.mxu0 }
 0x28c   : >> { %v11069_v59 = vpop.f32.mrf.mxu1 }
 0x28d   : >> { %v4321_v51 = vpop.f32.mrf.mxu0  ;;  %v4424_v15 = vadd.f32 %v11069_v59, %v11055_v11 }
 0x28e   : >> { %v4418_v12 = vpop.f32.mrf.mxu1 }
 0x28f   : >> { %v4419_v2 = vadd.f32 %v4418_v12, %v4321_v51 }
 0x291   : >> { %v11058_v4 = vpop.f32.mrf.mxu0 }
 0x292   : >> { %v11072_v25 = vpop.f32.mrf.mxu1 }
 0x293   : >> { %v4331_v1 = vpop.f32.mrf.mxu0 }
 0x294   : >> { %v4428_v7 = vpop.f32.mrf.mxu1 }
 0x295   : >> { %v4429_v19 = vadd.f32 %v4428_v7, %v4331_v1 }
 0x297   : >> { %v11083_v21 = vpop.f32.mrf.mxu0 }
 0x298   : >> { %v11097_v8 = vpop.f32.mrf.mxu1  ;;  %v4545_v57 = vadd.f32 %v11083_v21, %v4424_v15 }
 0x299   : >> { %v4525_v58 = vpop.f32.mrf.mxu0 }
 0x29a   : >> { %v4636_v39 = vpop.f32.mrf.mxu1  ;;  %v4544_v54 = vadd.f32 %v4525_v58, %v4419_v2  ;;  %v4656_v46 = vadd.f32 %v11097_v8, %v4545_v57 }
 0x29c   : >> { %v4655_v25 = vadd.f32 %v4636_v39, %v4544_v54 }
 0x29d   : >> { %v11086_v30 = vpop.f32.mrf.mxu0 }
 0x29e   : >> { %v11100_v61 = vpop.f32.mrf.mxu1 }
 0x29f   : >> { %v4535_v33 = vpop.f32.mrf.mxu0 }
 0x2a0   : >> { %v4646_v10 = vpop.f32.mrf.mxu1  ;;  %v4546_v55 = vadd.f32 %v4535_v33, %v4429_v19 }
 0x2a2   : >> { %v4657_v30 = vadd.f32 %v4646_v10, %v4546_v55 }
 0x2a3   : >> { %v11111_v31 = vpop.f32.mrf.mxu0 }
 0x2a4   : >> { %v11125_v17 = vpop.f32.mrf.mxu1  ;;  %v4767_v61 = vadd.f32 %v11111_v31, %v4656_v46 }
 0x2a5   : >> { %v4747_v0 = vpop.f32.mrf.mxu0 }
 0x2a6   : >> { %v4860_v34 = vpop.f32.mrf.mxu1  ;;  %v4880_v11 = vadd.f32 %v11125_v17, %v4767_v61 }
 0x2a9   : >> { %v11114_v16 = vpop.f32.mrf.mxu0 }
 0x2aa   : >> { %v11128_v35 = vpop.f32.mrf.mxu1 }
 0x2ab   : >> { %v4757_v6 = vpop.f32.mrf.mxu0 }
 0x2ac   : >> { %v4870_v60 = vpop.f32.mrf.mxu1 }
 0x2af   : >> { %v11139_v5 = vpop.f32.mrf.mxu0 }
 0x2b0   : >> { %v11153_v13 = vpop.f32.mrf.mxu1  ;;  %v4991_v1 = vadd.f32 %v11139_v5, %v4880_v11 }
 0x2b1   : >> { %v4971_v37 = vpop.f32.mrf.mxu0 }
 0x2b2   : >> { %v5082_v20 = vpop.f32.mrf.mxu1  ;;  %v5102_v8 = vadd.f32 %v11153_v13, %v4991_v1 }
 0x2b5   : >> { %v11142_v47 = vpop.f32.mrf.mxu0 }
 0x2b6   : >> { %v11156_v3 = vpop.f32.mrf.mxu1  ;;  %v4766_v47 = vadd.f32 %v4747_v0, %v4655_v25 }
 0x2b7   : >> { %v4981_v36 = vpop.f32.mrf.mxu0  ;;  %v4768_v3 = vadd.f32 %v4757_v6, %v4657_v30 }
 0x2b8   : >> { %v5092_v9 = vpop.f32.mrf.mxu1  ;;  %v4879_v51 = vadd.f32 %v4860_v34, %v4766_v47 }
 0x2b9   : >> { %v4881_v12 = vadd.f32 %v4870_v60, %v4768_v3 }
 0x2ba   : >> { %v4990_v58 = vadd.f32 %v4971_v37, %v4879_v51 }
 0x2bb   : >> { %v11167_v49 = vpop.f32.mrf.mxu0  ;;  %v4992_v33 = vadd.f32 %v4981_v36, %v4881_v12 }
 0x2bc   : >> { %v11181_v22 = vpop.f32.mrf.mxu1  ;;  %v5101_v39 = vadd.f32 %v5082_v20, %v4990_v58  ;;  %v5213_v31 = vadd.f32 %v11167_v49, %v5102_v8 }
 0x2bd   : >> { %v5193_v27 = vpop.f32.mrf.mxu0  ;;  %v5103_v10 = vadd.f32 %v5092_v9, %v4992_v33 }
 0x2be   : >> { %v5304_v41 = vpop.f32.mrf.mxu1  ;;  %v5212_v0 = vadd.f32 %v5193_v27, %v5101_v39  ;;  %v5324_v17 = vadd.f32 %v11181_v22, %v5213_v31 }
 0x2c0   : >> { %v5323_v34 = vadd.f32 %v5304_v41, %v5212_v0 }
 0x2c1   : >> { %v11170_v23 = vpop.f32.mrf.mxu0 }
 0x2c2   : >> { %v11184_v18 = vpop.f32.mrf.mxu1 }
 0x2c3   : >> { %v5203_v38 = vpop.f32.mrf.mxu0 }
 0x2c4   : >> { %v5314_v40 = vpop.f32.mrf.mxu1  ;;  %v5214_v6 = vadd.f32 %v5203_v38, %v5103_v10 }
 0x2c6   : >> { %v5325_v60 = vadd.f32 %v5314_v40, %v5214_v6 }
 0x2c7   : >> { %v11195_v62 = vpop.f32.mrf.mxu0 }
 0x2c8   : >> { %v11209_v28 = vpop.f32.mrf.mxu1  ;;  %v5436_v5 = vadd.f32 %v11195_v62, %v5324_v17 }
 0x2c9   : >> { %v5416_v43 = vpop.f32.mrf.mxu0 }
 0x2ca   : >> { %v5527_v24 = vpop.f32.mrf.mxu1  ;;  %v5435_v37 = vadd.f32 %v5416_v43, %v5323_v34  ;;  %v5547_v13 = vadd.f32 %v11209_v28, %v5436_v5 }
 0x2cc   : >> { %v5546_v20 = vadd.f32 %v5527_v24, %v5435_v37 }
 0x2cd   : >> { %v11198_v53 = vpop.f32.mrf.mxu0 }
 0x2ce   : >> { %v11212_v14 = vpop.f32.mrf.mxu1 }
 0x2cf   : >> { %v5426_v48 = vpop.f32.mrf.mxu0 }
 0x2d0   : >> { %v5537_v63 = vpop.f32.mrf.mxu1  ;;  %v5437_v36 = vadd.f32 %v5426_v48, %v5325_v60 }
 0x2d2   : >> { %v5548_v9 = vadd.f32 %v5537_v63, %v5437_v36  ;;  %v10115_v36 = vld [vmem:[%s13682_s4] ss:$0 sm:$0xff] }
 0x2d3   : >> { %v11223_v50 = vpop.f32.mrf.mxu0 }
 0x2d4   : >> { %v13227_v42 = vpop.f32.mrf.mxu1  ;;  %v5658_v49 = vadd.f32 %v11223_v50, %v5547_v13 }
 0x2d5   : >> { %v5638_v32 = vpop.f32.mrf.mxu0 }
 0x2d6   : >> { %v13229_v45 = vpop.f32.mrf.mxu1  ;;  %v5657_v27 = vadd.f32 %v5638_v32, %v5546_v20  ;;  %v5769_v22 = vadd.f32 %v13227_v42, %v5658_v49 }
 0x2d8   : >> { %v5768_v40 = vadd.f32 %v13229_v45, %v5657_v27 }
 0x2d9   : >> { %v11226_v52 = vpop.f32.mrf.mxu0 }
 0x2da   : >> { %v11240_v44 = vpop.f32.mrf.mxu1 }
 0x2db   : >> { %v5648_v26 = vpop.f32.mrf.mxu0 }
 0x2dc   : >> { %v5759_v29 = vpop.f32.mrf.mxu1  ;;  %v5659_v38 = vadd.f32 %v5648_v26, %v5548_v9 }
 0x2de   : >> { %v5770_v62 = vadd.f32 %v5759_v29, %v5659_v38 }
 0x2df   : >> { %v11251_v56 = vpop.f32.mrf.mxu0 }
 0x2e0   : >> { %v11265_v4 = vpop.f32.mrf.mxu1  ;;  %v5880_v30 = vadd.f32 %v11251_v56, %v5769_v22 }
 0x2e1   : >> { %v5860_v16 = vpop.f32.mrf.mxu0 }
 0x2e2   : >> { %v5972_v35 = vpop.f32.mrf.mxu1  ;;  %v5879_v28 = vadd.f32 %v5860_v16, %v5768_v40  ;;  %v5992_v47 = vadd.f32 %v11265_v4, %v5880_v30 }
 0x2e4   : >> { %v5991_v50 = vadd.f32 %v5972_v35, %v5879_v28 }
 0x2e5   : >> { %v11254_v59 = vpop.f32.mrf.mxu0 }
 0x2e6   : >> { %v11268_v23 = vpop.f32.mrf.mxu1 }
 0x2e7   : >> { %v5870_v7 = vpop.f32.mrf.mxu0 }
 0x2e8   : >> { %v5982_v21 = vpop.f32.mrf.mxu1  ;;  %v5881_v61 = vadd.f32 %v5870_v7, %v5770_v62 }
 0x2ea   : >> { %v5993_v3 = vadd.f32 %v5982_v21, %v5881_v61 }
 0x2eb   : >> { %v11279_v18 = vpop.f32.mrf.mxu0 }
 0x2ec   : >> { %v11293_v53 = vpop.f32.mrf.mxu1  ;;  %v6103_v11 = vadd.f32 %v11279_v18, %v5992_v47  ;;  %v13719_v47 = vmov (%p4218_p12), 0.0  }
 0x2ed   : >> { %v6083_v14 = vpop.f32.mrf.mxu0  ;;  %11395 = vmatprep.subr.mxu0 (%p4218_p12), %v13719_v47  ;;  %11402 = vmatprep.subr.mxu1 (%p4218_p12), %v13719_v47 }
 0x2ee   : >> { %v6194_v15 = vpop.f32.mrf.mxu1  ;;  %v6102_v59 = vadd.f32 %v6083_v14, %v5991_v50  ;;  %v6214_v23 = vadd.f32 %v11293_v53, %v6103_v11  ;;  %v7032_v50 = vld [vmem:[%s13683_s5] sm:$0xff] (%p4218_p12)  ;;  %v7110_v11 = vld [vmem:[%s13683_s5 + $0x10] sm:$0xff] (%p4218_p12)  ;;  %11399 = vmatprep.mubr.msk.f32.mxu0 (%p4218_p12), %vm11775_vm7, %v13719_v47  ;;  %11406 = vmatprep.mubr.msk.f32.mxu1 (%p4218_p12), %vm11775_vm7, %v13719_v47 }
 0x2f0   : >> { %v6213_v45 = vadd.f32 %v6194_v15, %v6102_v59  ;;  %v7265_v59 = vld [vmem:[%s13683_s5 + $0x38] sm:$0xff] (%p4218_p12) }
 0x2f1   : >> { %v11282_v52 = vpop.f32.mrf.mxu0 }
 0x2f2   : >> { %v11296_v44 = vpop.f32.mrf.mxu1 }
 0x2f3   : >> { %v6093_v2 = vpop.f32.mrf.mxu0 }
 0x2f4   : >> { %v6204_v19 = vpop.f32.mrf.mxu1  ;;  %v6104_v42 = vadd.f32 %v6093_v2, %v5993_v3 }
 0x2f6   : >> { %v6215_v29 = vadd.f32 %v6204_v19, %v6104_v42  ;;  %v7187_v42 = vld [vmem:[%s13683_s5 + $0x20] sm:$0xff] (%p4218_p12) }
 0x2f7   : >> { %v11307_v57 = vpop.f32.mrf.mxu0 }
 0x2f8   : >> { %v11321_v54 = vpop.f32.mrf.mxu1  ;;  %v6325_v56 = vadd.f32 %v11307_v57, %v6214_v23 }
 0x2f9   : >> { %v6305_v55 = vpop.f32.mrf.mxu0 }
 0x2fa   : >> { %v6416_v46 = vpop.f32.mrf.mxu1  ;;  %v6324_v16 = vadd.f32 %v6305_v55, %v6213_v45  ;;  %v6436_v4 = vadd.f32 %v11321_v54, %v6325_v56  ;;  %v7342_v45 = vld [vmem:[%s13683_s5 + $0x48] sm:$0xff] (%p4218_p12)  ;;  %v7341_v56 = vld [vmem:[%s13683_s5 + $0x40] sm:$0xff] (%p4218_p12) }
 0x2fc   : >> { %v6435_v35 = vadd.f32 %v6416_v46, %v6324_v16 }
 0x2fd   : >> { %v11310_v25 = vpop.f32.mrf.mxu0 }
 0x2fe   : >> { %v11324_v41 = vpop.f32.mrf.mxu1 }
 0x2ff   : >> { %v6315_v43 = vpop.f32.mrf.mxu0 }
 0x300   : >> { %v6426_v48 = vpop.f32.mrf.mxu1  ;;  %v6326_v7 = vadd.f32 %v6315_v43, %v6215_v29  ;;  %v7419_v29 = vld [vmem:[%s13683_s5 + $0x58] sm:$0xff] (%p4218_p12) }
 0x302   : >> { %v6437_v21 = vadd.f32 %v6426_v48, %v6326_v7  ;;  %v7496_v7 = vld [vmem:[%s13683_s5 + $0x68] sm:$0xff] (%p4218_p12) }
 0x303   : >> { %v11335_v24 = vpop.f32.mrf.mxu0 }
 0x304   : >> { %v11349_v63 = vpop.f32.mrf.mxu1  ;;  %v6548_v18 = vadd.f32 %v11335_v24, %v6436_v4  ;;  %v7033_v24 = vld [vmem:[%s13683_s5 + $0x8] sm:$0xff] (%p4218_p12)  ;;  %v7573_v4 = vld [vmem:[%s13683_s5 + $0x78] sm:$0xff] (%p4218_p12) }
 0x305   : >> { %v6528_v32 = vpop.f32.mrf.mxu0  ;;  %11396 = vmatpush3.msra.mxu0 (%p4218_p12), %v7033_v24 }
 0x306   : >> { %v6639_v26 = vpop.f32.mrf.mxu1  ;;  %v6547_v31 = vadd.f32 %v6528_v32, %v6435_v35  ;;  %v6659_v53 = vadd.f32 %v11349_v63, %v6548_v18  ;;  %v7111_v63 = vld [vmem:[%s13683_s5 + $0x18] sm:$0xff] (%p4218_p12)  ;;  %11397 = vmatprep.subr.mxu0 (%p4218_p12), %v13719_v47  ;;  %v7572_v35 = vld [vmem:[%s13683_s5 + $0x70] sm:$0xff] (%p4218_p12)  ;;  %v7650_v18 = vld [vmem:[%s13683_s5 + $0x88] sm:$0xff] (%p4218_p12) }
 0x307   : > { %11403 = vmatpush3.msra.mxu1 (%p4218_p12), %v7111_v63  ;;  %11398 = vmatpush3.msra.mxu0 (%p4218_p12), %v7032_v50  ;;  %v8650_v63 = vld [vmem:[%s13683_s5 + $0x150] sm:$0xff] (%p4218_p12) }
 0x308   : >> { %v6658_v15 = vadd.f32 %v6639_v26, %v6547_v31  ;;  %11404 = vmatprep.subr.mxu1 (%p4218_p12), %v13719_v47  ;;  %v7188_v26 = vld [vmem:[%s13683_s5 + $0x28] sm:$0xff] (%p4218_p12)  ;;  %11409 = vmatprep.subr.mxu0 (%p4218_p12), %v13719_v47 }
 0x309   : >> { %v11338_v51 = vpop.f32.mrf.mxu0  ;;  %11405 = vmatpush3.msra.mxu1 (%p4218_p12), %v7110_v11  ;;  %v8805_v11 = vld [vmem:[%s13683_s5 + $0x178] sm:$0xff] (%p4218_p12) }
 0x30a   : >> { %v11352_v12 = vpop.f32.mrf.mxu1  ;;  %11416 = vmatprep.subr.mxu1 (%p4218_p12), %v13719_v47  ;;  %v7264_v51 = vld [vmem:[%s13683_s5 + $0x30] sm:$0xff] (%p4218_p12) }
 0x30b   : >> { %v6538_v1 = vpop.f32.mrf.mxu0 }
 0x30c   : >> { %v6649_v58 = vpop.f32.mrf.mxu1  ;;  %v6549_v14 = vadd.f32 %v6538_v1, %v6437_v21 }
 0x30e   : >> { %v6660_v17 = vadd.f32 %v6649_v58, %v6549_v14  ;;  %v7418_v58 = vld [vmem:[%s13683_s5 + $0x50] sm:$0xff] (%p4218_p12) }
 0x30f   : >> { %v11363_v33 = vpop.f32.mrf.mxu0  ;;  %v7726_v14 = vld [vmem:[%s13683_s5 + $0x90] sm:$0xff] (%p4218_p12) }
 0x310   : >> { %v11377_v8 = vpop.f32.mrf.mxu1  ;;  %v6770_v52 = vadd.f32 %v11363_v33, %v6659_v53  ;;  %v7495_v33 = vld [vmem:[%s13683_s5 + $0x60] sm:$0xff] (%p4218_p12) }
 0x311   : >> { %v6750_v39 = vpop.f32.mrf.mxu0 }
 0x312   : >> { %v6861_v10 = vpop.f32.mrf.mxu1  ;;  %v6769_v60 = vadd.f32 %v6750_v39, %v6658_v15  ;;  %v6881_v2 = vadd.f32 %v11377_v8, %v6770_v52  ;;  %v7727_v39 = vld [vmem:[%s13683_s5 + $0x98] sm:$0xff] (%p4218_p12)  ;;  %v7803_v15 = vld [vmem:[%s13683_s5 + $0xa0] sm:$0xff] (%p4218_p12)  ;;  %v7880_v52 = vld [vmem:[%s13683_s5 + $0xb0] sm:$0xff] (%p4218_p12) }
 0x314   : >> { %v6880_v57 = vadd.f32 %v6861_v10, %v6769_v60  ;;  %v7649_v10 = vld [vmem:[%s13683_s5 + $0x80] sm:$0xff] (%p4218_p12)  ;;  %v8035_v60 = vld [vmem:[%s13683_s5 + $0xd8] sm:$0xff] (%p4218_p12) }
 0x315   : >> { %v11366_v0 = vpop.f32.mrf.mxu0 }
 0x316   : >> { %v11380_v6 = vpop.f32.mrf.mxu1  ;;  %v7804_v0 = vld [vmem:[%s13683_s5 + $0xa8] sm:$0xff] (%p4218_p12) }
 0x317   : >> { %v6760_v44 = vpop.f32.mrf.mxu0  ;;  %v7881_v6 = vld [vmem:[%s13683_s5 + $0xb8] sm:$0xff] (%p4218_p12) }
 0x318   : >> { %v6871_v34 = vpop.f32.mrf.mxu1  ;;  %v6771_v5 = vadd.f32 %v6760_v44, %v6660_v17 }
 0x31a   : >> { %v6882_v19 = vadd.f32 %v6871_v34, %v6771_v5  ;;  %v7958_v34 = vld [vmem:[%s13683_s5 + $0xc8] sm:$0xff] (%p4218_p12)  ;;  %v7957_v5 = vld [vmem:[%s13683_s5 + $0xc0] sm:$0xff] (%p4218_p12) }
 0x31b   : >> { %v11391_v37 = vpop.f32.mrf.mxu0 }
 0x31c   : >> { %v11394_v13 = vpop.f32.mrf.mxu1  ;;  %v6992_v54 = vadd.f32 %v11391_v37, %v6881_v2 }
 0x31d   : >> { %v6972_v20 = vpop.f32.mrf.mxu0  ;;  %v8189_v13 = vld [vmem:[%s13683_s5 + $0xf8] sm:$0xff] (%p4218_p12) }
 0x31e   : >> { %v6982_v9 = vpop.f32.mrf.mxu1  ;;  %v7003_v49 = vadd.f32 %v10115_v36, %v6992_v54  ;;  %v6991_v55 = vadd.f32 %v6972_v20, %v6880_v57  ;;  %v8111_v57 = vld [vmem:[%s13683_s5 + $0xe0] sm:$0xff] (%p4218_p12)  ;;  %v8188_v20 = vld [vmem:[%s13683_s5 + $0xf0] sm:$0xff] (%p4218_p12) }
 0x31f   : >> { %v6993_v46 = vadd.f32 %v6982_v9, %v6882_v19  ;;  %v8034_v19 = vld [vmem:[%s13683_s5 + $0xd0] sm:$0xff] (%p4218_p12) }
 0x320   : >> { %v7007_v27 = vmax.f32 %v7003_v49, 0.0  ;;  %v7002_v38 = vadd.f32 %v10115_v36, %v6991_v55  ;;  %v8266_v49 = vld [vmem:[%s13683_s5 + $0x108] sm:$0xff] (%p4218_p12)  ;;  %v8343_v55 = vld [vmem:[%s13683_s5 + $0x118] sm:$0xff] (%p4218_p12) }
 0x321   : >> { %v7004_v22 = vadd.f32 %v10115_v36, %v6993_v46  ;;  %v8112_v36 = vld [vmem:[%s13683_s5 + $0xe8] sm:$0xff] (%p4218_p12)  ;;  %v8265_v46 = vld [vmem:[%s13683_s5 + $0x100] sm:$0xff] (%p4218_p12) }
 0x322   : >> { %7012 = vst.msk [vmem:[#allocation3 + $0x8] sm:$0xff] %vm7010_vm5, %v7007_v27  ;;  %v7006_v25 = vmax.f32 %v7002_v38, 0.0  ;;  %v8342_v38 = vld [vmem:[%s13683_s5 + $0x110] sm:$0xff] (%p4218_p12) }
 0x323   : >> { %v7008_v41 = vmax.f32 %v7004_v22, 0.0 }
 0x324   : >> { %7011 = vst.msk [vmem:[#allocation3] sm:$0xff] %vm7010_vm5, %v7006_v25  ;;  %v8420_v25 = vld [vmem:[%s13683_s5 + $0x128] sm:$0xff] (%p4218_p12) }
 0x325   : >> { %7013 = vst.msk [vmem:[#allocation3 + $0x10] sm:$0xff] %vm7010_vm5, %v7008_v41  ;;  %v8497_v41 = vld [vmem:[%s13683_s5 + $0x138] sm:$0xff] (%p4218_p12) }
 0x32b   : >> { %v7016_v40 = vld [vmem:[#allocation3] ss:$2 sm:$0x1f]  ;;  %v7018_v62 = vld [vmem:[#allocation3 + $0x1] ss:$2 sm:$0x1f] }
 0x32c   : >> { %v7019_v30 = vmax.f32 %v7016_v40, %v7018_v62  ;;  %v7021_v43 = vld [vmem:[#allocation3 + $0xe] ss:$2 sm:$0x1f]  ;;  %v7023_v48 = vld [vmem:[#allocation3 + $0xf] ss:$2 sm:$0x1f] }
 0x32d   : >> { %v7024_v28 = vmax.f32 %v7021_v43, %v7023_v48  ;;  %4220 = sbr.rel (!%p4218_p12) target bundleno = 449 (0x1c1), region = 186  ;;  %v8419_v40 = vld [vmem:[%s13683_s5 + $0x120] sm:$0xff] (%p4218_p12)  ;;  %v8574_v48 = vld [vmem:[%s13683_s5 + $0x148] sm:$0xff] (%p4218_p12) }
 0x32f   : >> { %v7025_v61 = vmax.f32 %v7019_v30, %v7024_v28  ;;  %v8496_v30 = vld [vmem:[%s13683_s5 + $0x130] sm:$0xff] (%p4218_p12)  ;;  %v8651_v28 = vld [vmem:[%s13683_s5 + $0x158] sm:$0xff] (%p4218_p12) }
 0x331   : >> { %7029 = vst.msk [vmem:[%s7027_s30] sm:$0x1f] %vm7028_vm6, %v7025_v61  ;;  %v8573_v61 = vld [vmem:[%s13683_s5 + $0x140] sm:$0xff] (%p4218_p12)  ;;  %s9142_s30 = scalar_lea.sflag (%p4218_p12), [#allocation7], %s13720_s29 }
 0x338   : > { %v7031_v3 = vld [vmem:[#allocation5] sm:$0x1]  ;;  %v7109_v32 = vld [vmem:[#allocation5 + $0x1] sm:$0x1]  ;;  %v7186_v23 = vld [vmem:[#allocation5 + $0x2] sm:$0x1] }
 0x339   : > { %11400 = vmatmul.mubr.msk.f32.vlgmr.msra.gmra.mxu0 %vm7010_vm5, %v7031_v3  ;;  %11407 = vmatmul.mubr.msk.f32.vlgmr.msra.gmra.mxu1 %vm7010_vm5, %v7109_v32  ;;  %v7263_v12 = vld [vmem:[#allocation5 + $0x3] sm:$0x1]  ;;  %v7340_v1 = vld [vmem:[#allocation5 + $0x4] sm:$0x1]  ;;  %v7417_v16 = vld [vmem:[#allocation5 + $0x5] sm:$0x1] }
 0x33a   : > { %11410 = vmatpush3.msra.mxu0 %v7188_v26  ;;  %11417 = vmatpush3.msra.mxu1 %v7265_v59  ;;  %v7494_v8 = vld [vmem:[#allocation5 + $0x6] sm:$0x1]  ;;  %v7571_v21 = vld [vmem:[#allocation5 + $0x7] sm:$0x1]  ;;  %v7648_v31 = vld [vmem:[#allocation5 + $0x8] sm:$0x1] }
 0x33b   : > { %11411 = vmatprep.subr.mxu0 %v13719_v47  ;;  %11413 = vmatprep.mubr.msk.f32.mxu0 %vm11775_vm7, %v13719_v47  ;;  %v7725_v53 = vld [vmem:[#allocation5 + $0x9] sm:$0x1]  ;;  %v7802_v17 = vld [vmem:[#allocation5 + $0xa] sm:$0x1]  ;;  %v7879_v44 = vld [vmem:[#allocation5 + $0xb] sm:$0x1] }
 0x33c   : > { %11412 = vmatpush3.msra.mxu0 %v7187_v42  ;;  %11418 = vmatprep.subr.mxu1 %v13719_v47  ;;  %v7956_v2 = vld [vmem:[#allocation5 + $0xc] sm:$0x1]  ;;  %v8033_v37 = vld [vmem:[#allocation5 + $0xd] sm:$0x1]  ;;  %v8110_v54 = vld [vmem:[#allocation5 + $0xe] sm:$0x1] }
 0x33d   : > { %11414 = vmatmul.mubr.msk.f32.vlgmr.msra.gmra.mxu0 %vm7010_vm5, %v7186_v23  ;;  %11419 = vmatpush3.msra.mxu1 %v7264_v51  ;;  %v8187_v9 = vld [vmem:[#allocation5 + $0xf] sm:$0x1]  ;;  %v8264_v27 = vld [vmem:[#allocation5 + $0x10] sm:$0x1]  ;;  %v8341_v22 = vld [vmem:[#allocation5 + $0x11] sm:$0x1] }
 0x33e   : > { %11420 = vmatprep.mubr.msk.f32.mxu1 %vm11775_vm7, %v13719_v47  ;;  %11423 = vmatprep.subr.mxu0 %v13719_v47  ;;  %v8418_v62 = vld [vmem:[#allocation5 + $0x12] sm:$0x1]  ;;  %v8495_v43 = vld [vmem:[#allocation5 + $0x13] sm:$0x1]  ;;  %v8572_v24 = vld [vmem:[#allocation5 + $0x14] sm:$0x1] }
 0x33f   : > { %11421 = vmatmul.mubr.msk.f32.vlgmr.msra.gmra.mxu1 %vm7010_vm5, %v7263_v12  ;;  %11424 = vmatpush3.msra.mxu0 %v7342_v45  ;;  %v8649_v50 = vld [vmem:[#allocation5 + $0x15] sm:$0x1]  ;;  %v8728_v3 = vld [vmem:[%s13683_s5 + $0x168] sm:$0xff]  ;;  %v8727_v32 = vld [vmem:[%s13683_s5 + $0x160] sm:$0xff] }
 0x340   : > { %11430 = vmatprep.subr.mxu1 %v13719_v47  ;;  %11425 = vmatprep.subr.mxu0 %v13719_v47  ;;  %v8726_v26 = vld [vmem:[#allocation5 + $0x16] sm:$0x1]  ;;  %v8804_v59 = vld [vmem:[%s13683_s5 + $0x170] sm:$0xff]  ;;  %v8803_v42 = vld [vmem:[#allocation5 + $0x17] sm:$0x1] }
 0x341   : > { %11431 = vmatpush3.msra.mxu1 %v7419_v29  ;;  %11426 = vmatpush3.msra.mxu0 %v7341_v56  ;;  %v8882_v23 = vld [vmem:[%s13683_s5 + $0x188] sm:$0xff]  ;;  %v8881_v51 = vld [vmem:[%s13683_s5 + $0x180] sm:$0xff]  ;;  %v8972_v45 = vld [vmem:[%s13685_s7 + $0x70] sm:$0xff] }
 0x342   : > { %11427 = vmatprep.mubr.msk.f32.mxu0 %vm11775_vm7, %v13719_v47  ;;  %11432 = vmatprep.subr.mxu1 %v13719_v47  ;;  %v8880_v12 = vld [vmem:[#allocation5 + $0x18] sm:$0x1]  ;;  %v8971_v29 = vld [vmem:[%s13685_s7 + $0x68] sm:$0xff] }
 0x343   : > { %11428 = vmatmul.mubr.msk.f32.vlgmr.msra.gmra.mxu0 %vm7010_vm5, %v7340_v1  ;;  %11433 = vmatpush3.msra.mxu1 %v7418_v58  ;;  %v8970_v56 = vld [vmem:[%s13685_s7 + $0x60] sm:$0xff]  ;;  %v8969_v1 = vld [vmem:[%s13685_s7 + $0x58] sm:$0xff]  ;;  %v8968_v58 = vld [vmem:[%s13685_s7 + $0x50] sm:$0xff] }
 0x344   : > { %11434 = vmatprep.mubr.msk.f32.mxu1 %vm11775_vm7, %v13719_v47  ;;  %11437 = vmatprep.subr.mxu0 %v13719_v47 }
 0x345   : > { %11435 = vmatmul.mubr.msk.f32.vlgmr.msra.gmra.mxu1 %vm7010_vm5, %v7417_v16  ;;  %11438 = vmatpush3.msra.mxu0 %v7496_v7  ;;  %v8967_v16 = vld [vmem:[%s13685_s7 + $0x48] sm:$0xff]  ;;  %v8966_v7 = vld [vmem:[%s13685_s7 + $0x40] sm:$0xff] }
 0x346   : > { %11444 = vmatprep.subr.mxu1 %v13719_v47  ;;  %11439 = vmatprep.subr.mxu0 %v13719_v47 }
 0x347   : > { %11445 = vmatpush3.msra.mxu1 %v7573_v4  ;;  %11440 = vmatpush3.msra.mxu0 %v7495_v33  ;;  %v8965_v4 = vld [vmem:[%s13685_s7 + $0x38] sm:$0xff]  ;;  %v8964_v33 = vld [vmem:[%s13685_s7 + $0x30] sm:$0xff] }
 0x348   : > { %11441 = vmatprep.mubr.msk.f32.mxu0 %vm11775_vm7, %v13719_v47  ;;  %11446 = vmatprep.subr.mxu1 %v13719_v47 }
 0x349   : > { %11442 = vmatmul.mubr.msk.f32.vlgmr.msra.gmra.mxu0 %vm7010_vm5, %v7494_v8  ;;  %11447 = vmatpush3.msra.mxu1 %v7572_v35  ;;  %v8963_v8 = vld [vmem:[%s13685_s7 + $0x28] sm:$0xff]  ;;  %v8962_v35 = vld [vmem:[%s13685_s7 + $0x20] sm:$0xff] }
 0x34a   : > { %11448 = vmatprep.mubr.msk.f32.mxu1 %vm11775_vm7, %v13719_v47  ;;  %11451 = vmatprep.subr.mxu0 %v13719_v47 }
 0x34b   : > { %11449 = vmatmul.mubr.msk.f32.vlgmr.msra.gmra.mxu1 %vm7010_vm5, %v7571_v21  ;;  %11452 = vmatpush3.msra.mxu0 %v7650_v18  ;;  %v8961_v21 = vld [vmem:[%s13685_s7 + $0x18] sm:$0xff]  ;;  %v8960_v18 = vld [vmem:[%s13685_s7 + $0x10] sm:$0xff] }
 0x34c   : > { %11458 = vmatprep.subr.mxu1 %v13719_v47  ;;  %11453 = vmatprep.subr.mxu0 %v13719_v47 }
 0x34d   : > { %11459 = vmatpush3.msra.mxu1 %v7727_v39  ;;  %11454 = vmatpush3.msra.mxu0 %v7649_v10  ;;  %v8959_v39 = vld [vmem:[%s13685_s7 + $0x8] sm:$0xff]  ;;  %v8958_v10 = vld [vmem:[%s13685_s7] sm:$0xff] }
 0x34e   : > { %11455 = vmatprep.mubr.msk.f32.mxu0 %vm11775_vm7, %v13719_v47  ;;  %11460 = vmatprep.subr.mxu1 %v13719_v47 }
 0x34f   : > { %11456 = vmatmul.mubr.msk.f32.vlgmr.msra.gmra.mxu0 %vm7010_vm5, %v7648_v31  ;;  %11461 = vmatpush3.msra.mxu1 %v7726_v14  ;;  %v9059_v31 = vld [vmem:[%s13687_s9 + $0x50] sm:$0xf]  ;;  %v9058_v14 = vld [vmem:[%s13687_s9 + $0x48] sm:$0xff] }
 0x350   : > { %11462 = vmatprep.mubr.msk.f32.mxu1 %vm11775_vm7, %v13719_v47  ;;  %11465 = vmatprep.subr.mxu0 %v13719_v47 }
 0x351   : > { %11463 = vmatmul.mubr.msk.f32.vlgmr.msra.gmra.mxu1 %vm7010_vm5, %v7725_v53  ;;  %11466 = vmatpush3.msra.mxu0 %v7804_v0  ;;  %v9057_v53 = vld [vmem:[%s13687_s9 + $0x40] sm:$0xff]  ;;  %v9056_v0 = vld [vmem:[%s13687_s9 + $0x38] sm:$0xff] }
 0x352   : > { %11472 = vmatprep.subr.mxu1 %v13719_v47  ;;  %11467 = vmatprep.subr.mxu0 %v13719_v47 }
 0x353   : > { %11473 = vmatpush3.msra.mxu1 %v7881_v6  ;;  %11468 = vmatpush3.msra.mxu0 %v7803_v15  ;;  %v9055_v6 = vld [vmem:[%s13687_s9 + $0x30] sm:$0xff]  ;;  %v9054_v15 = vld [vmem:[%s13687_s9 + $0x28] sm:$0xff] }
 0x354   : > { %11469 = vmatprep.mubr.msk.f32.mxu0 %vm11775_vm7, %v13719_v47  ;;  %11474 = vmatprep.subr.mxu1 %v13719_v47 }
 0x355   : > { %11470 = vmatmul.mubr.msk.f32.vlgmr.msra.gmra.mxu0 %vm7010_vm5, %v7802_v17  ;;  %11475 = vmatpush3.msra.mxu1 %v7880_v52  ;;  %v9053_v17 = vld [vmem:[%s13687_s9 + $0x20] sm:$0xff]  ;;  %v9052_v52 = vld [vmem:[%s13687_s9 + $0x18] sm:$0xff] }
 0x356   : > { %11476 = vmatprep.mubr.msk.f32.mxu1 %vm11775_vm7, %v13719_v47  ;;  %11479 = vmatprep.subr.mxu0 %v13719_v47 }
 0x357   : > { %11477 = vmatmul.mubr.msk.f32.vlgmr.msra.gmra.mxu1 %vm7010_vm5, %v7879_v44  ;;  %11480 = vmatpush3.msra.mxu0 %v7958_v34  ;;  %v7030_v44 = vld [vmem:[%s13684_s6] sm:$0x1] }
 0x358   : > { %11486 = vmatprep.subr.mxu1 %v13719_v47  ;;  %11481 = vmatprep.subr.mxu0 %v13719_v47 }
 0x359   : > { %11487 = vmatpush3.msra.mxu1 %v8035_v60  ;;  %11482 = vmatpush3.msra.mxu0 %v7957_v5 }
 0x35a   : > { %11483 = vmatprep.mubr.msk.f32.mxu0 %vm11775_vm7, %v13719_v47  ;;  %11488 = vmatprep.subr.mxu1 %v13719_v47 }
 0x35b   : > { %11484 = vmatmul.mubr.msk.f32.vlgmr.msra.gmra.mxu0 %vm7010_vm5, %v7956_v2  ;;  %11489 = vmatpush3.msra.mxu1 %v8034_v19 }
 0x35c   : > { %11490 = vmatprep.mubr.msk.f32.mxu1 %vm11775_vm7, %v13719_v47  ;;  %11493 = vmatprep.subr.mxu0 %v13719_v47 }
 0x35d   : > { %11491 = vmatmul.mubr.msk.f32.vlgmr.msra.gmra.mxu1 %vm7010_vm5, %v8033_v37  ;;  %11494 = vmatpush3.msra.mxu0 %v8112_v36 }
 0x35e   : > { %11500 = vmatprep.subr.mxu1 %v13719_v47  ;;  %11495 = vmatprep.subr.mxu0 %v13719_v47 }
 0x35f   : > { %11501 = vmatpush3.msra.mxu1 %v8189_v13  ;;  %11496 = vmatpush3.msra.mxu0 %v8111_v57 }
 0x360   : > { %11497 = vmatprep.mubr.msk.f32.mxu0 %vm11775_vm7, %v13719_v47  ;;  %11502 = vmatprep.subr.mxu1 %v13719_v47 }
 0x361   : > { %11498 = vmatmul.mubr.msk.f32.vlgmr.msra.gmra.mxu0 %vm7010_vm5, %v8110_v54  ;;  %11503 = vmatpush3.msra.mxu1 %v8188_v20 }
 0x362   : > { %11504 = vmatprep.mubr.msk.f32.mxu1 %vm11775_vm7, %v13719_v47  ;;  %11507 = vmatprep.subr.mxu0 %v13719_v47 }
 0x363   : > { %11505 = vmatmul.mubr.msk.f32.vlgmr.msra.gmra.mxu1 %vm7010_vm5, %v8187_v9  ;;  %11508 = vmatpush3.msra.mxu0 %v8266_v49 }
 0x364   : > { %11514 = vmatprep.subr.mxu1 %v13719_v47  ;;  %11509 = vmatprep.subr.mxu0 %v13719_v47 }
 0x365   : > { %11515 = vmatpush3.msra.mxu1 %v8343_v55  ;;  %11510 = vmatpush3.msra.mxu0 %v8265_v46 }
 0x366   : > { %11511 = vmatprep.mubr.msk.f32.mxu0 %vm11775_vm7, %v13719_v47  ;;  %11516 = vmatprep.subr.mxu1 %v13719_v47 }
 0x367   : > { %11512 = vmatmul.mubr.msk.f32.vlgmr.msra.gmra.mxu0 %vm7010_vm5, %v8264_v27  ;;  %11517 = vmatpush3.msra.mxu1 %v8342_v38 }
 0x368   : > { %11518 = vmatprep.mubr.msk.f32.mxu1 %vm11775_vm7, %v13719_v47  ;;  %11521 = vmatprep.subr.mxu0 %v13719_v47 }
 0x369   : > { %11519 = vmatmul.mubr.msk.f32.vlgmr.msra.gmra.mxu1 %vm7010_vm5, %v8341_v22  ;;  %11522 = vmatpush3.msra.mxu0 %v8420_v25 }
 0x36a   : > { %11528 = vmatprep.subr.mxu1 %v13719_v47  ;;  %11523 = vmatprep.subr.mxu0 %v13719_v47 }
 0x36b   : > { %11529 = vmatpush3.msra.mxu1 %v8497_v41  ;;  %11524 = vmatpush3.msra.mxu0 %v8419_v40 }
 0x36c   : > { %11525 = vmatprep.mubr.msk.f32.mxu0 %vm11775_vm7, %v13719_v47  ;;  %11530 = vmatprep.subr.mxu1 %v13719_v47 }
 0x36d   : > { %11526 = vmatmul.mubr.msk.f32.vlgmr.msra.gmra.mxu0 %vm7010_vm5, %v8418_v62  ;;  %11531 = vmatpush3.msra.mxu1 %v8496_v30 }
 0x36e   : > { %11532 = vmatprep.mubr.msk.f32.mxu1 %vm11775_vm7, %v13719_v47  ;;  %11535 = vmatprep.subr.mxu0 %v13719_v47 }
 0x36f   : > { %11533 = vmatmul.mubr.msk.f32.vlgmr.msra.gmra.mxu1 %vm7010_vm5, %v8495_v43  ;;  %11536 = vmatpush3.msra.mxu0 %v8574_v48 }
 0x370   : > { %11542 = vmatprep.subr.mxu1 %v13719_v47  ;;  %11537 = vmatprep.subr.mxu0 %v13719_v47 }
 0x371   : > { %11543 = vmatpush3.msra.mxu1 %v8651_v28  ;;  %11538 = vmatpush3.msra.mxu0 %v8573_v61 }
 0x372   : > { %11539 = vmatprep.mubr.msk.f32.mxu0 %vm11775_vm7, %v13719_v47  ;;  %11544 = vmatprep.subr.mxu1 %v13719_v47 }
 0x373   : > { %11540 = vmatmul.mubr.msk.f32.vlgmr.msra.gmra.mxu0 %vm7010_vm5, %v8572_v24  ;;  %11545 = vmatpush3.msra.mxu1 %v8650_v63 }
 0x374   : > { %11546 = vmatprep.mubr.msk.f32.mxu1 %vm11775_vm7, %v13719_v47  ;;  %11549 = vmatprep.subr.mxu0 %v13719_v47 }
 0x375   : > { %11547 = vmatmul.mubr.msk.f32.vlgmr.msra.gmra.mxu1 %vm7010_vm5, %v8649_v50  ;;  %11550 = vmatpush3.msra.mxu0 %v8728_v3 }
 0x376   : > { %11556 = vmatprep.subr.mxu1 %v13719_v47  ;;  %11551 = vmatprep.subr.mxu0 %v13719_v47 }
 0x377   : > { %11557 = vmatpush3.msra.mxu1 %v8805_v11  ;;  %11552 = vmatpush3.msra.mxu0 %v8727_v32 }
 0x378   : > { %11553 = vmatprep.mubr.msk.f32.mxu0 %vm11775_vm7, %v13719_v47  ;;  %11558 = vmatprep.subr.mxu1 %v13719_v47 }
 0x379   : > { %11554 = vmatmul.mubr.msk.f32.vlgmr.msra.gmra.mxu0 %vm7010_vm5, %v8726_v26  ;;  %11559 = vmatpush3.msra.mxu1 %v8804_v59 }
 0x37a   : > { %11560 = vmatprep.mubr.msk.f32.mxu1 %vm11775_vm7, %v13719_v47  ;;  %11563 = vmatprep.subr.mxu0 %v13719_v47 }
 0x37b   : > { %11561 = vmatmul.mubr.msk.f32.vlgmr.msra.gmra.mxu1 %vm7010_vm5, %v8803_v42  ;;  %11564 = vmatpush3.msra.mxu0 %v8882_v23 }
 0x37c   : > { %11565 = vmatprep.subr.mxu0 %v13719_v47  ;;  %11567 = vmatprep.mubr.msk.f32.mxu0 %vm11775_vm7, %v13719_v47 }
 0x37d   : > { %11566 = vmatpush3.msra.mxu0 %v8881_v51  ;;  %11570 = vmatprep.subr.mxu1 %v13719_v47 }
 0x37e   : > { %11568 = vmatmul.mubr.msk.f32.vlgmr.msra.gmra.mxu0 %vm7010_vm5, %v8880_v12  ;;  %11600 = vmatprep.mubr.msk.f32.mxu1 %vm11775_vm7, %v13719_v47 }
 0x37f   : > { %11603 = vmatprep.subr.mxu0 %v13719_v47  ;;  %11625 = vmatprep.mubr.msk.f32.mxu0 %vm11775_vm7, %v13719_v47 }
 0x380   : > { %11571 = vmatpush3.msra.mxu1 %v8972_v45  ;;  %11604 = vmatpush3.msk.msra.mxu0 %vm9065_vm8, %v9059_v31 }
 0x381   : > { %11572 = vmatprep.subr.mxu1 %v13719_v47  ;;  %11605 = vmatprep.subr.mxu0 %v13719_v47 }
 0x382   : > { %11573 = vmatpush3.msra.mxu1 %v8971_v29  ;;  %11606 = vmatpush3.msra.mxu0 %v9058_v14 }
 0x383   : > { %11574 = vmatprep.subr.mxu1 %v13719_v47  ;;  %11607 = vmatprep.subr.mxu0 %v13719_v47 }
 0x384   : > { %11575 = vmatpush3.msra.mxu1 %v8970_v56  ;;  %11608 = vmatpush3.msra.mxu0 %v9057_v53 }
 0x385   : > { %11576 = vmatprep.subr.mxu1 %v13719_v47  ;;  %11609 = vmatprep.subr.mxu0 %v13719_v47 }
 0x386   : > { %11577 = vmatpush3.msra.mxu1 %v8969_v1  ;;  %11610 = vmatpush3.msra.mxu0 %v9056_v0 }
 0x387   : > { %11578 = vmatprep.subr.mxu1 %v13719_v47  ;;  %11611 = vmatprep.subr.mxu0 %v13719_v47 }
 0x388   : > { %11579 = vmatpush3.msra.mxu1 %v8968_v58  ;;  %11612 = vmatpush3.msra.mxu0 %v9055_v6 }
 0x389   : > { %11580 = vmatprep.subr.mxu1 %v13719_v47  ;;  %11613 = vmatprep.subr.mxu0 %v13719_v47 }
 0x38a   : > { %11581 = vmatpush3.msra.mxu1 %v8967_v16  ;;  %11614 = vmatpush3.msra.mxu0 %v9054_v15 }
 0x38b   : > { %11582 = vmatprep.subr.mxu1 %v13719_v47  ;;  %11615 = vmatprep.subr.mxu0 %v13719_v47 }
 0x38c   : > { %11583 = vmatpush3.msra.mxu1 %v8966_v7  ;;  %11616 = vmatpush3.msra.mxu0 %v9053_v17 }
 0x38d   : > { %11584 = vmatprep.subr.mxu1 %v13719_v47  ;;  %11617 = vmatprep.subr.mxu0 %v13719_v47 }
 0x38e   : > { %11585 = vmatpush3.msra.mxu1 %v8965_v4  ;;  %11618 = vmatpush3.msra.mxu0 %v9052_v52 }
 0x38f   : > { %11586 = vmatprep.subr.mxu1 %v13719_v47  ;;  %11619 = vmatprep.subr.mxu0 %v13719_v47 }
 0x390   : > { %11587 = vmatpush3.msra.mxu1 %v8964_v33 }
 0x391   : > { %11588 = vmatprep.subr.mxu1 %v13719_v47 }
 0x392   : > { %11589 = vmatpush3.msra.mxu1 %v8963_v8 }
 0x393   : > { %11590 = vmatprep.subr.mxu1 %v13719_v47 }
 0x394   : > { %11591 = vmatpush3.msra.mxu1 %v8962_v35 }
 0x395   : > { %11592 = vmatprep.subr.mxu1 %v13719_v47 }
 0x396   : > { %11593 = vmatpush3.msra.mxu1 %v8961_v21 }
 0x397   : > { %11594 = vmatprep.subr.mxu1 %v13719_v47 }
 0x398   : > { %11595 = vmatpush3.msra.mxu1 %v8960_v18 }
 0x399   : > { %11596 = vmatprep.subr.mxu1 %v13719_v47 }
 0x39a   : > { %11597 = vmatpush3.msra.mxu1 %v8959_v39 }
 0x39b   : > { %11598 = vmatprep.subr.mxu1 %v13719_v47 }
 0x39c   : > { %11599 = vmatpush3.msra.mxu1 %v8958_v10 }
 0x3f9   : > { %v7104_v34 = vpop.f32.mrf.mxu0  ;;  %v7181_v5 = vpop.f32.mrf.mxu1 }
 0x3fa   : > { %v7108_v60 = vadd.f32 %v7104_v34, %v7030_v44 }
 0x3fb   : > { %v11401_v2 = vpop.f32.mrf.mxu0  ;;  %v11408_v37 = vpop.f32.mrf.mxu1 }
 0x3fc   : > { %v7185_v19 = vadd.f32 %v7181_v5, %v7108_v60 }
 0x3fd   : > { %v7258_v36 = vpop.f32.mrf.mxu0 }
 0x3fe   : > { %v7262_v13 = vadd.f32 %v7258_v36, %v7185_v19 }
 0x3ff   : > { %v7335_v57 = vpop.f32.mrf.mxu1  ;;  %v11415_v54 = vpop.f32.mrf.mxu0 }
 0x400   : > { %v7339_v20 = vadd.f32 %v7335_v57, %v7262_v13 }
 0x401   : > { %v11422_v9 = vpop.f32.mrf.mxu1 }
 0x403   : > { %v7412_v49 = vpop.f32.mrf.mxu0 }
 0x404   : > { %v7416_v55 = vadd.f32 %v7412_v49, %v7339_v20 }
 0x405   : > { %v7489_v46 = vpop.f32.mrf.mxu1  ;;  %v11429_v27 = vpop.f32.mrf.mxu0 }
 0x406   : > { %v7493_v38 = vadd.f32 %v7489_v46, %v7416_v55  ;;  %v9051_v55 = vld [vmem:[%s13687_s9 + $0x10] sm:$0xff]  ;;  %v9050_v46 = vld [vmem:[%s13687_s9 + $0x8] sm:$0xff]  ;;  %v9049_v27 = vld [vmem:[%s13687_s9] sm:$0xff] }
 0x407   : > { %v11436_v22 = vpop.f32.mrf.mxu1  ;;  %11620 = vmatpush3.msra.mxu0 %v9051_v55 }
 0x408   : > { %11621 = vmatprep.subr.mxu0 %v13719_v47 }
 0x409   : > { %v7566_v25 = vpop.f32.mrf.mxu0  ;;  %11622 = vmatpush3.msra.mxu0 %v9050_v46 }
 0x40a   : > { %v7570_v41 = vadd.f32 %v7566_v25, %v7493_v38  ;;  %11623 = vmatprep.subr.mxu0 %v13719_v47  ;;  %v8973_v38 = vld [vmem:[%s13686_s8] sm:$0x1] }
 0x40b   : > { %v7643_v40 = vpop.f32.mrf.mxu1  ;;  %v11443_v62 = vpop.f32.mrf.mxu0  ;;  %11624 = vmatpush3.msra.mxu0 %v9049_v27 }
 0x40c   : > { %v7647_v30 = vadd.f32 %v7643_v40, %v7570_v41  ;;  %v9060_v62 = vld [vmem:[%s13688_s10] sm:$0x1] }
 0x40d   : > { %v11450_v43 = vpop.f32.mrf.mxu1 }
 0x40f   : > { %v7720_v48 = vpop.f32.mrf.mxu0 }
 0x410   : > { %v7724_v28 = vadd.f32 %v7720_v48, %v7647_v30 }
 0x411   : > { %v7797_v61 = vpop.f32.mrf.mxu1  ;;  %v11457_v24 = vpop.f32.mrf.mxu0 }
 0x412   : > { %v7801_v63 = vadd.f32 %v7797_v61, %v7724_v28 }
 0x413   : > { %v11464_v50 = vpop.f32.mrf.mxu1 }
 0x415   : > { %v7874_v3 = vpop.f32.mrf.mxu0 }
 0x416   : > { %v7878_v11 = vadd.f32 %v7874_v3, %v7801_v63 }
 0x417   : > { %v7951_v32 = vpop.f32.mrf.mxu1  ;;  %v11471_v26 = vpop.f32.mrf.mxu0 }
 0x418   : > { %v7955_v59 = vadd.f32 %v7951_v32, %v7878_v11 }
 0x419   : > { %v11478_v42 = vpop.f32.mrf.mxu1 }
 0x41b   : > { %v8028_v23 = vpop.f32.mrf.mxu0 }
 0x41c   : > { %v8032_v51 = vadd.f32 %v8028_v23, %v7955_v59 }
 0x41d   : > { %v8105_v12 = vpop.f32.mrf.mxu1  ;;  %v11485_v45 = vpop.f32.mrf.mxu0 }
 0x41e   : > { %v8109_v29 = vadd.f32 %v8105_v12, %v8032_v51 }
 0x41f   : > { %v11492_v56 = vpop.f32.mrf.mxu1 }
 0x421   : > { %v8182_v1 = vpop.f32.mrf.mxu0 }
 0x422   : > { %v8186_v58 = vadd.f32 %v8182_v1, %v8109_v29 }
 0x423   : > { %v8259_v16 = vpop.f32.mrf.mxu1  ;;  %v11499_v7 = vpop.f32.mrf.mxu0 }
 0x424   : > { %v8263_v4 = vadd.f32 %v8259_v16, %v8186_v58 }
 0x425   : > { %v11506_v33 = vpop.f32.mrf.mxu1 }
 0x427   : > { %v8336_v8 = vpop.f32.mrf.mxu0 }
 0x428   : > { %v8340_v35 = vadd.f32 %v8336_v8, %v8263_v4 }
 0x429   : > { %v8413_v21 = vpop.f32.mrf.mxu1  ;;  %v11513_v18 = vpop.f32.mrf.mxu0 }
 0x42a   : > { %v8417_v39 = vadd.f32 %v8413_v21, %v8340_v35 }
 0x42b   : > { %v11520_v10 = vpop.f32.mrf.mxu1 }
 0x42d   : > { %v8490_v31 = vpop.f32.mrf.mxu0 }
 0x42e   : > { %v8494_v14 = vadd.f32 %v8490_v31, %v8417_v39 }
 0x42f   : > { %v8567_v53 = vpop.f32.mrf.mxu1  ;;  %v11527_v0 = vpop.f32.mrf.mxu0 }
 0x430   : > { %v8571_v6 = vadd.f32 %v8567_v53, %v8494_v14 }
 0x431   : > { %v11534_v15 = vpop.f32.mrf.mxu1 }
 0x433   : > { %v8644_v17 = vpop.f32.mrf.mxu0 }
 0x434   : > { %v8648_v52 = vadd.f32 %v8644_v17, %v8571_v6 }
 0x435   : > { %v8721_v44 = vpop.f32.mrf.mxu1  ;;  %v11541_v34 = vpop.f32.mrf.mxu0 }
 0x436   : > { %v8725_v60 = vadd.f32 %v8721_v44, %v8648_v52 }
 0x437   : > { %v11548_v5 = vpop.f32.mrf.mxu1 }
 0x439   : > { %v8798_v2 = vpop.f32.mrf.mxu0 }
 0x43a   : > { %v8802_v19 = vadd.f32 %v8798_v2, %v8725_v60 }
 0x43b   : > { %v8875_v37 = vpop.f32.mrf.mxu1  ;;  %v11555_v36 = vpop.f32.mrf.mxu0 }
 0x43c   : > { %v8879_v13 = vadd.f32 %v8875_v37, %v8802_v19 }
 0x43d   : > { %v11562_v57 = vpop.f32.mrf.mxu1 }
 0x43e   : > { %v8952_v54 = vpop.f32.mrf.mxu0 }
 0x43f   : > { %v8956_v20 = vadd.f32 %v8952_v54, %v8879_v13 }
 0x440   : > { %v11569_v9 = vpop.f32.mrf.mxu0 }
 0x441   : > { %v8957_v49 = vmax.f32 %v8956_v20, 0.0 }
 0x443   : > { %11601 = vmatmul.mubr.msk.f32.vlgmr.msra.gmra.mxu1 %vm8974_vm9, %v8957_v49 }
 0x503   : > { %v9044_v22 = vpop.f32.mrf.mxu1 }
 0x504   : > { %v9045_v25 = vadd.f32 %v9044_v22, %v8973_v38 }
 0x505   : > { %v11602_v41 = vpop.f32.mrf.mxu1 }
 0x506   : > { %v9048_v40 = vmax.f32 %v9045_v25, 0.0 }
 0x508   : > { %11626 = vmatmul.mubr.msk.f32.vlgmr.msra.gmra.mxu0 %vm9061_vm10, %v9048_v40 }
 0x5c8   : > { %v9135_v47 = vpop.f32.mrf.mxu0 }
 0x5c9   : > { %v9136_v30 = vadd.f32 %v9135_v47, %v9060_v62 }
 0x5ca   : > { %v11627_v43 = vpop.f32.mrf.mxu0 }
 0x5cb   : > { %9140 = vst.msk [vmem:[%s11896_s16] sm:$0x1] %vm9139_vm11, %v9136_v30 }
 0x5cc   : > { %11709 = shalt.err (!%p11706_p7)
}
 0x5cd   : > { %s11710_s16 = scalar_lea.hbm %s13640_s24, 16  ;;  %s11714_s13 = scalar_lea.hbm %s13689_s11, 32 }
 0x5ce   : > { %p11711_p8 = scmp.ne.s32.totalorder %s13640_s24, %s11710_s16  ;;  %p11715_p11 = scmp.lt.s32.totalorder %s13640_s24, %s13689_s11 }
 0x5cf   : > { %p11716_p12 = scmp.lt.s32.totalorder %s11714_s13, %s11710_s16 }
 0x5d0   : > { %p11712_p9 = pnand %p11711_p8, %p11875_p5 }
 0x5d1   : > { %p11717_p13 = por %p11716_p12, %p11715_p11 }
 0x5d2   : > { %p11713_p10 = pneg %p11712_p9 }
 0x5d4   : > { %p11718_p0 = pnand %p11717_p13, %p11713_p10 }
 0x5d6   : > { %11721 = shalt.err (!%p11718_p0)
}
 0x5d7   : > { %11639 = dma.vmem_to_hbm [thread:$0]  (%p11875_p5), %s9155_s25, 16, %s13640_s24, %s9142_s30  }
 0x5d8 PF: > { %p11645_p1 = scmp.ge.s32.totalorder %s11764_s20, 2  ;;  %s9166_s12 = sand.u32 1, %s11752_s17  }
 0x5d9   : > { %s9167_s21 = scalar_lea.sflag [#allocation7], %s9166_s12 }
 0x5da   : > { %p11642_p2 = pnand %p11645_p1, %p11879_p6 }
 0x5dc   : > { %p11643_p3 = pneg %p11642_p2 }
 0x5de   : > { %11747 = dma.done.wait (%p11643_p3), %s9167_s21, 16  }
 0x5df   : > { %11749 = vsyncadd (%p11643_p3), %s9167_s21, 4294967280  ;;  %p21_p4 = scmp.ge.s32.totalorder %s11862_s23, 4   ;;  %s13721_s17 = smov %s11756_s18 }
 0x5e0   : > { %s13722_s18 = smov %s11760_s19  ;;  %s13723_s19 = smov %s11873_s26 }
 0x5e1   : > { %s13724_s20 = smov %s11862_s23  ;;  %23 = sbr.rel (!%p21_p4) target bundleno = 6 (0x6), region = 197 }
 0x5e6   :  { %9171 = vsyncpa [#allocation7], 1 }
 0x5e7   :  { %9173 = vsyncpa [#allocation7 + $0x1], 1 }

</bundles_post_ra>
